<compile_context>
chip_gen: v5e
topology: v5e:2x2
jax: 0.10.0
libtpu: 0.0.40
codegen_flags: <defaults>
</compile_context>

<pallas_src>
import functools
import math

import jax
import jax.numpy as jnp
from jax import lax
from jax.experimental import pallas as pl
from jax.experimental.pallas import tpu as pltpu


# ----------------------------------------------------------------------------
# Fused kernel: conv3x3(pad=1)+ReLU -> conv3x3(pad=1)+ReLU -> [maxpool 2x2]
# ----------------------------------------------------------------------------
def _fused_conv_block_kernel(x_ref, w1_ref, b1_ref, w2_ref, b2_ref,
                             skip_ref, *pool_refs, img_h):
    """One (batch, row-tile) step of the fused conv block.

    x_ref    : (1, H+4, W+2, Cin)  zero-padded input, whole image for this b
    w1_ref   : (9*Cin, C)          conv1 weights in im2col layout (kh,kw,ci) x co
    b1_ref   : (1, C)
    w2_ref   : (9*C, C)            conv2 weights in im2col layout
    b2_ref   : (1, C)
    skip_ref : (1, TH, W, C)       row tile of conv2+ReLU output (skip connection)
    pool_refs[0] (optional): (1, TH//2, W//2, C)  maxpooled row tile
    """
    h = pl.program_id(1)
    _, TH, W, C = skip_ref.shape
    Cin = x_ref.shape[-1]

    # Row-tile offset in conv-output row coordinates.
    r0 = pl.multiple_of(h * TH, TH)

    # ---------------- conv1 + ReLU over the tile plus a 1-row halo ----------
    # Extended conv1 rows g = r0-1 .. r0+TH  need padded-input rows r0 .. r0+TH+3
    xs = x_ref[0, pl.ds(r0, TH + 4), :, :]                 # (TH+4, W+2, Cin)

    taps = []
    for kh in range(3):
        for kw in range(3):
            t = xs[kh:kh + TH + 2, kw:kw + W, :]           # (TH+2, W, Cin)
            taps.append(t.reshape((TH + 2) * W, Cin))
    p1 = jnp.concatenate(taps, axis=-1)                    # (N1, 9*Cin)

    y1 = jnp.dot(p1, w1_ref[...], preferred_element_type=jnp.float32)
    y1 = jnp.maximum(y1 + b1_ref[0], 0.0)                  # (N1, C) f32
    y1 = y1.reshape(TH + 2, W, C)

    # conv2's zero padding in H: zero out halo rows that fall outside the image
    # (the halo rows inside the image are real conv1 rows, recomputed per tile).
    j = lax.broadcasted_iota(jnp.int32, (TH + 2, 1, 1), 0)
    g = r0 + j - 1
    valid = jnp.logical_and(g >= 0, g < img_h)
    y1 = y1 * valid.astype(y1.dtype)

    # conv2's zero padding in W.
    zcol = jnp.zeros((TH + 2, 1, C), jnp.float32)
    y1p = jnp.concatenate([zcol, y1, zcol], axis=1)        # (TH+2, W+2, C)

    # ---------------- conv2 + ReLU ------------------------------------------
    taps2 = []
    for kh in range(3):
        for kw in range(3):
            t = y1p[kh:kh + TH, kw:kw + W, :]              # (TH, W, C)
            taps2.append(t.reshape(TH * W, C))
    p2 = jnp.concatenate(taps2, axis=-1)                   # (TH*W, 9*C)

    y2 = jnp.dot(p2, w2_ref[...], preferred_element_type=jnp.float32)
    y2 = jnp.maximum(y2 + b2_ref[0], 0.0)                  # (TH*W, C) f32
    out = y2.reshape(TH, W, C)

    skip_ref[0] = out.astype(skip_ref.dtype)

    # ---------------- 2x2 max pool on the VMEM-resident activation ----------
    if pool_refs:
        pool_ref = pool_refs[0]
        o4 = out.reshape(TH // 2, 2, W, C)                 # split rows into pairs
        rowmax = jnp.maximum(o4[:, 0], o4[:, 1])           # (TH//2, W, C)
        cols = [jnp.maximum(rowmax[:, 2 * i:2 * i + 1, :],
                            rowmax[:, 2 * i + 1:2 * i + 2, :])
                for i in range(W // 2)]
        pooled = jnp.concatenate(cols, axis=1)             # (TH//2, W//2, C)
        pool_ref[0] = pooled.astype(pool_ref.dtype)


# ----------------------------------------------------------------------------
# Wrapper around pallas_call
# ----------------------------------------------------------------------------
def _pick_tile_h(H, max_tile=16):
    for t in range(min(H, max_tile), 1, -1):
        if t % 2 == 0 and H % t == 0:
            return t
    return H


def fused_conv_block(x_nhwc, w1, b1, w2, b2, *, max_pooling=True, tile_h=None,
                     interpret=False):
    """x_nhwc: (B,H,W,Cin); w1:(C,Cin,3,3); w2:(C,C,3,3) torch layout; b:(C,)."""
    B, H, W, Cin = x_nhwc.shape
    C = w1.shape[0]
    assert w1.shape == (C, Cin, 3, 3) and w2.shape == (C, C, 3, 3)
    if max_pooling:
        assert H % 2 == 0 and W % 2 == 0

    if tile_h is None:
        tile_h = _pick_tile_h(H)
    assert H % tile_h == 0
    if max_pooling:
        assert tile_h % 2 == 0
    n_h = H // tile_h

    # im2col weight layout: rows ordered (kh, kw, cin), columns = cout.
    w1_mat = jnp.transpose(w1, (2, 3, 1, 0)).reshape(9 * Cin, C)
    w2_mat = jnp.transpose(w2, (2, 3, 1, 0)).reshape(9 * C, C)
    b1_2d = b1.reshape(1, C)
    b2_2d = b2.reshape(1, C)

    # Zero-pad H by 2 (conv1 pad + conv2 halo) and W by 1 (conv1 pad).
    # TODO(synk): fold this pad into the kernel (zero-init VMEM scratch + copy
    # interior) to also save the HBM round trip of the (small, Cin-channel) input.
    x_pad = jnp.pad(x_nhwc, ((0, 0), (2, 2), (1, 1), (0, 0)))

    kernel = functools.partial(_fused_conv_block_kernel, img_h=H)

    skip_shape = jax.ShapeDtypeStruct((B, H, W, C), x_nhwc.dtype)
    skip_spec = pl.BlockSpec((1, tile_h, W, C), lambda b, h: (b, h, 0, 0))
    if max_pooling:
        out_shape = (skip_shape,
                     jax.ShapeDtypeStruct((B, H // 2, W // 2, C), x_nhwc.dtype))
        out_specs = (skip_spec,
                     pl.BlockSpec((1, tile_h // 2, W // 2, C),
                                  lambda b, h: (b, h, 0, 0)))
    else:
        out_shape = skip_shape
        out_specs = skip_spec

    outs = pl.pallas_call(
        kernel,
        out_shape=out_shape,
        grid=(B, n_h),
        in_specs=[
            pl.BlockSpec((1, H + 4, W + 2, Cin), lambda b, h: (b, 0, 0, 0)),
            pl.BlockSpec((9 * Cin, C), lambda b, h: (0, 0)),
            pl.BlockSpec((1, C), lambda b, h: (0, 0)),
            pl.BlockSpec((9 * C, C), lambda b, h: (0, 0)),
            pl.BlockSpec((1, C), lambda b, h: (0, 0)),
        ],
        out_specs=out_specs,
        compiler_params=pltpu.CompilerParams(
            dimension_semantics=("parallel", "arbitrary")),
        interpret=interpret,
    )(x_pad, w1_mat, b1_2d, w2_mat, b2_2d)

    if max_pooling:
        skip, pooled = outs
        return pooled, skip
    skip = outs
    return skip, skip


# ----------------------------------------------------------------------------
# conv_block forward (PyTorch-compatible NCHW interface)
# ----------------------------------------------------------------------------
def conv_block_forward(x_nchw, params, *, max_pooling=True, dropout_prob=0.0,
                       tile_h=None):
    """Equivalent of conv_block.forward. Returns (next_layer, skip) in NCHW."""
    # NCHW -> NHWC layout glue.
    # TODO(synk): keep the whole network in NHWC to avoid these HBM transposes.
    x = jnp.transpose(x_nchw, (0, 2, 3, 1))

    next_nhwc, skip_nhwc = fused_conv_block(
        x, params["w1"], params["b1"], params["w2"], params["b2"],
        max_pooling=max_pooling, tile_h=tile_h)

    # dropout_prob == 0 in this config -> no-op (matches nn.Dropout(p=0)).
    # TODO(synk): dropout with p > 0 would need pltpu.prng_* inside the kernel.
    next_layer = jnp.transpose(next_nhwc, (0, 3, 1, 2))
    skip = jnp.transpose(skip_nhwc, (0, 3, 1, 2))
    return next_layer, skip


# ----------------------------------------------------------------------------
# Parameter init (kaiming_normal_(fan_out, relu) + randn bias, like the module)
# ----------------------------------------------------------------------------
def init_params(key, in_ch, n_filters):
    k1, k2, k3, k4 = jax.random.split(key, 4)
    std = math.sqrt(2.0 / (n_filters * 3 * 3))
    return {
        "w1": jax.random.normal(k1, (n_filters, in_ch, 3, 3), jnp.float32) * std,
        "b1": jax.random.normal(k2, (n_filters,), jnp.float32),
        "w2": jax.random.normal(k3, (n_filters, n_filters, 3, 3), jnp.float32) * std,
        "b2": jax.random.normal(k4, (n_filters,), jnp.float32),
    }


# ----------------------------------------------------------------------------
# Pure-JAX reference (correctness check only)
# ----------------------------------------------------------------------------
def _reference(x_nchw, params):
    def conv(x, w, b):
        y = lax.conv_general_dilated(
            x, w, window_strides=(1, 1), padding=((1, 1), (1, 1)),
            dimension_numbers=("NCHW", "OIHW", "NCHW"))
        return jax.nn.relu(y + b[None, :, None, None])

    out = conv(x_nchw, params["w1"], params["b1"])
    out = conv(out, params["w2"], params["b2"])
    skip = out
    pooled = lax.reduce_window(out, -jnp.inf, lax.max,
                               (1, 1, 2, 2), (1, 1, 2, 2), "VALID")
    return pooled, skip


if __name__ == "__main__":
    key = jax.random.PRNGKey(0)
    kx, kp = jax.random.split(key)

    B, Cin, H, W = 2, 4, 16, 16
    n_filters = 32

    x = jax.random.normal(kx, (B, Cin, H, W), jnp.float32)
    params = init_params(kp, Cin, n_filters)

    # tile_h=8 -> grid=(B, 2): exercises the row-tiling + halo/mask path.
    fwd = jax.jit(functools.partial(conv_block_forward, max_pooling=True,
                                    dropout_prob=0.0, tile_h=8))
    next_layer, skip = fwd(x, params)
    jax.block_until_ready((next_layer, skip))

    ref_next, ref_skip = _reference(x, params)
    assert next_layer.shape == (B, n_filters, H // 2, W // 2)
    assert skip.shape == (B, n_filters, H, W)
    assert jnp.allclose(next_layer, ref_next, atol=1e-4, rtol=1e-4)
    assert jnp.allclose(skip, ref_skip, atol=1e-4, rtol=1e-4)

    # max_pooling=False path.
    fwd_np = jax.jit(functools.partial(conv_block_forward, max_pooling=False,
                                       dropout_prob=0.0, tile_h=8))
    nl2, sk2 = fwd_np(x, params)
    jax.block_until_ready((nl2, sk2))
    assert jnp.allclose(sk2, ref_skip, atol=1e-4, rtol=1e-4)
    assert jnp.allclose(nl2, ref_skip, atol=1e-4, rtol=1e-4)

    print("KERNEL_OK")
</pallas_src>

<mosaic_0001>
module attributes {stable_mosaic.version = 11 : i64} {
  func.func @_fused_conv_block_kernel(%arg0: i32, %arg1: i32, %arg2: memref<1x20x18x4xf32, #tpu.memory_space<vmem>>, %arg3: memref<36x32xf32, #tpu.memory_space<vmem>>, %arg4: memref<1x32xf32, #tpu.memory_space<vmem>>, %arg5: memref<288x32xf32, #tpu.memory_space<vmem>>, %arg6: memref<1x32xf32, #tpu.memory_space<vmem>>, %arg7: memref<1x8x16x32xf32, #tpu.memory_space<vmem>>, %arg8: memref<1x4x8x32xf32, #tpu.memory_space<vmem>>) attributes {dimension_semantics = [#tpu.dimension_semantics<parallel>, #tpu.dimension_semantics<arbitrary>], iteration_bounds = array<i64: 2, 2>, scalar_prefetch = 0 : i64, scratch_operands = 0 : i64, tpu.core_type = #tpu.core_type<tc>, window_params = [{transform_indices = @transform_0, window_bounds = array<i64: 1, 20, 18, 4>}, {pipeline_mode = #tpu.pipeline_mode<synchronous>, transform_indices = @transform_1, window_bounds = array<i64: 36, 32>}, {pipeline_mode = #tpu.pipeline_mode<synchronous>, transform_indices = @transform_2, window_bounds = array<i64: 1, 32>}, {pipeline_mode = #tpu.pipeline_mode<synchronous>, transform_indices = @transform_3, window_bounds = array<i64: 288, 32>}, {pipeline_mode = #tpu.pipeline_mode<synchronous>, transform_indices = @transform_4, window_bounds = array<i64: 1, 32>}, {transform_indices = @transform_5, window_bounds = array<i64: 1, 8, 16, 32>}, {transform_indices = @transform_6, window_bounds = array<i64: 1, 4, 8, 32>}]} {
    %c8_i32 = arith.constant 8 : i32
    %0 = arith.muli %arg1, %c8_i32 : i32
    %1 = tpu.assume_multiple %0, 8 : i32
    %c0 = arith.constant 0 : index
    %2 = arith.index_cast %1 : i32 to index
    %c0_0 = arith.constant 0 : index
    %c0_1 = arith.constant 0 : index
    %3 = vector.load %arg2[%c0, %2, %c0_0, %c0_1] : memref<1x20x18x4xf32, #tpu.memory_space<vmem>>, vector<1x12x18x4xf32>
    %4 = vector.shape_cast %3 : vector<1x12x18x4xf32> to vector<12x18x4xf32>
    %5 = vector.extract_strided_slice %4 {offsets = [0, 0, 0], sizes = [10, 16, 4], strides = [1, 1, 1]} : vector<12x18x4xf32> to vector<10x16x4xf32>
    %6 = vector.shape_cast %5 : vector<10x16x4xf32> to vector<160x4xf32>
    %7 = vector.extract_strided_slice %4 {offsets = [0, 1, 0], sizes = [10, 16, 4], strides = [1, 1, 1]} : vector<12x18x4xf32> to vector<10x16x4xf32>
    %8 = vector.shape_cast %7 : vector<10x16x4xf32> to vector<160x4xf32>
    %9 = vector.extract_strided_slice %4 {offsets = [0, 2, 0], sizes = [10, 16, 4], strides = [1, 1, 1]} : vector<12x18x4xf32> to vector<10x16x4xf32>
    %10 = vector.shape_cast %9 : vector<10x16x4xf32> to vector<160x4xf32>
    %11 = vector.extract_strided_slice %4 {offsets = [1, 0, 0], sizes = [10, 16, 4], strides = [1, 1, 1]} : vector<12x18x4xf32> to vector<10x16x4xf32>
    %12 = vector.shape_cast %11 : vector<10x16x4xf32> to vector<160x4xf32>
    %13 = vector.extract_strided_slice %4 {offsets = [1, 1, 0], sizes = [10, 16, 4], strides = [1, 1, 1]} : vector<12x18x4xf32> to vector<10x16x4xf32>
    %14 = vector.shape_cast %13 : vector<10x16x4xf32> to vector<160x4xf32>
    %15 = vector.extract_strided_slice %4 {offsets = [1, 2, 0], sizes = [10, 16, 4], strides = [1, 1, 1]} : vector<12x18x4xf32> to vector<10x16x4xf32>
    %16 = vector.shape_cast %15 : vector<10x16x4xf32> to vector<160x4xf32>
    %17 = vector.extract_strided_slice %4 {offsets = [2, 0, 0], sizes = [10, 16, 4], strides = [1, 1, 1]} : vector<12x18x4xf32> to vector<10x16x4xf32>
    %18 = vector.shape_cast %17 : vector<10x16x4xf32> to vector<160x4xf32>
    %19 = vector.extract_strided_slice %4 {offsets = [2, 1, 0], sizes = [10, 16, 4], strides = [1, 1, 1]} : vector<12x18x4xf32> to vector<10x16x4xf32>
    %20 = vector.shape_cast %19 : vector<10x16x4xf32> to vector<160x4xf32>
    %21 = vector.extract_strided_slice %4 {offsets = [2, 2, 0], sizes = [10, 16, 4], strides = [1, 1, 1]} : vector<12x18x4xf32> to vector<10x16x4xf32>
    %22 = vector.shape_cast %21 : vector<10x16x4xf32> to vector<160x4xf32>
    %23 = tpu.concatenate %6, %8, %10, %12, %14, %16, %18, %20, %22 in 1 : vector<160x4xf32>, vector<160x4xf32>, vector<160x4xf32>, vector<160x4xf32>, vector<160x4xf32>, vector<160x4xf32>, vector<160x4xf32>, vector<160x4xf32>, vector<160x4xf32> -> vector<160x36xf32>
    %c0_2 = arith.constant 0 : index
    %c0_3 = arith.constant 0 : index
    %24 = vector.load %arg3[%c0_2, %c0_3] : memref<36x32xf32, #tpu.memory_space<vmem>>, vector<36x32xf32>
    %cst = arith.constant dense<0.000000e+00> : vector<160x32xf32>
    %25 = tpu.matmul %23, %24, %cst {dimension_numbers = #tpu.dot_dimension_numbers<[1], [0], [0], [1], [0, 0, 1, 1], [], []>} : vector<160x36xf32>, vector<36x32xf32>, vector<160x32xf32> -> vector<160x32xf32>
    %c0_4 = arith.constant 0 : index
    %c0_5 = arith.constant 0 : index
    %26 = vector.load %arg4[%c0_4, %c0_5] : memref<1x32xf32, #tpu.memory_space<vmem>>, vector<1x32xf32>
    %27 = vector.shape_cast %26 : vector<1x32xf32> to vector<32xf32>
    %28 = vector.shape_cast %27 : vector<32xf32> to vector<1x32xf32>
    %29 = vector.broadcast %28 : vector<1x32xf32> to vector<160x32xf32>
    %30 = arith.addf %25, %29 : vector<160x32xf32>
    %cst_6 = arith.constant 0.000000e+00 : f32
    %31 = vector.broadcast %cst_6 : f32 to vector<160x32xf32>
    %32 = arith.maximumf %30, %31 : vector<160x32xf32>
    %33 = vector.shape_cast %32 : vector<160x32xf32> to vector<10x16x32xf32>
    %34 = tpu.iota {dimensions = array<i32: 0>} : vector<10x1x1xi32>
    %35 = vector.broadcast %1 : i32 to vector<10x1x1xi32>
    %36 = arith.addi %35, %34 : vector<10x1x1xi32>
    %c1_i32 = arith.constant 1 : i32
    %37 = vector.broadcast %c1_i32 : i32 to vector<10x1x1xi32>
    %38 = arith.subi %36, %37 : vector<10x1x1xi32>
    %c0_i32 = arith.constant 0 : i32
    %39 = vector.broadcast %c0_i32 : i32 to vector<10x1x1xi32>
    %40 = arith.cmpi sge, %38, %39 : vector<10x1x1xi32>
    %c16_i32 = arith.constant 16 : i32
    %41 = vector.broadcast %c16_i32 : i32 to vector<10x1x1xi32>
    %42 = arith.cmpi slt, %38, %41 : vector<10x1x1xi32>
    %43 = arith.andi %40, %42 : vector<10x1x1xi1>
    %44 = arith.extui %43 : vector<10x1x1xi1> to vector<10x1x1xi32>
    %45 = arith.sitofp %44 : vector<10x1x1xi32> to vector<10x1x1xf32>
    %46 = vector.broadcast %45 : vector<10x1x1xf32> to vector<10x16x32xf32>
    %47 = arith.mulf %33, %46 : vector<10x16x32xf32>
    %cst_7 = arith.constant 0.000000e+00 : f32
    %48 = vector.broadcast %cst_7 : f32 to vector<10x1x32xf32>
    %49 = tpu.concatenate %48, %47, %48 in 1 : vector<10x1x32xf32>, vector<10x16x32xf32>, vector<10x1x32xf32> -> vector<10x18x32xf32>
    %50 = vector.extract_strided_slice %49 {offsets = [0, 0, 0], sizes = [8, 16, 32], strides = [1, 1, 1]} : vector<10x18x32xf32> to vector<8x16x32xf32>
    %51 = vector.shape_cast %50 : vector<8x16x32xf32> to vector<128x32xf32>
    %52 = vector.extract_strided_slice %49 {offsets = [0, 1, 0], sizes = [8, 16, 32], strides = [1, 1, 1]} : vector<10x18x32xf32> to vector<8x16x32xf32>
    %53 = vector.shape_cast %52 : vector<8x16x32xf32> to vector<128x32xf32>
    %54 = vector.extract_strided_slice %49 {offsets = [0, 2, 0], sizes = [8, 16, 32], strides = [1, 1, 1]} : vector<10x18x32xf32> to vector<8x16x32xf32>
    %55 = vector.shape_cast %54 : vector<8x16x32xf32> to vector<128x32xf32>
    %56 = vector.extract_strided_slice %49 {offsets = [1, 0, 0], sizes = [8, 16, 32], strides = [1, 1, 1]} : vector<10x18x32xf32> to vector<8x16x32xf32>
    %57 = vector.shape_cast %56 : vector<8x16x32xf32> to vector<128x32xf32>
    %58 = vector.extract_strided_slice %49 {offsets = [1, 1, 0], sizes = [8, 16, 32], strides = [1, 1, 1]} : vector<10x18x32xf32> to vector<8x16x32xf32>
    %59 = vector.shape_cast %58 : vector<8x16x32xf32> to vector<128x32xf32>
    %60 = vector.extract_strided_slice %49 {offsets = [1, 2, 0], sizes = [8, 16, 32], strides = [1, 1, 1]} : vector<10x18x32xf32> to vector<8x16x32xf32>
    %61 = vector.shape_cast %60 : vector<8x16x32xf32> to vector<128x32xf32>
    %62 = vector.extract_strided_slice %49 {offsets = [2, 0, 0], sizes = [8, 16, 32], strides = [1, 1, 1]} : vector<10x18x32xf32> to vector<8x16x32xf32>
    %63 = vector.shape_cast %62 : vector<8x16x32xf32> to vector<128x32xf32>
    %64 = vector.extract_strided_slice %49 {offsets = [2, 1, 0], sizes = [8, 16, 32], strides = [1, 1, 1]} : vector<10x18x32xf32> to vector<8x16x32xf32>
    %65 = vector.shape_cast %64 : vector<8x16x32xf32> to vector<128x32xf32>
    %66 = vector.extract_strided_slice %49 {offsets = [2, 2, 0], sizes = [8, 16, 32], strides = [1, 1, 1]} : vector<10x18x32xf32> to vector<8x16x32xf32>
    %67 = vector.shape_cast %66 : vector<8x16x32xf32> to vector<128x32xf32>
    %68 = tpu.concatenate %51, %53, %55, %57, %59, %61, %63, %65, %67 in 1 : vector<128x32xf32>, vector<128x32xf32>, vector<128x32xf32>, vector<128x32xf32>, vector<128x32xf32>, vector<128x32xf32>, vector<128x32xf32>, vector<128x32xf32>, vector<128x32xf32> -> vector<128x288xf32>
    %c0_8 = arith.constant 0 : index
    %c0_9 = arith.constant 0 : index
    %69 = vector.load %arg5[%c0_8, %c0_9] : memref<288x32xf32, #tpu.memory_space<vmem>>, vector<288x32xf32>
    %cst_10 = arith.constant dense<0.000000e+00> : vector<128x32xf32>
    %70 = tpu.matmul %68, %69, %cst_10 {dimension_numbers = #tpu.dot_dimension_numbers<[1], [0], [0], [1], [0, 0, 1, 1], [], []>} : vector<128x288xf32>, vector<288x32xf32>, vector<128x32xf32> -> vector<128x32xf32>
    %c0_11 = arith.constant 0 : index
    %c0_12 = arith.constant 0 : index
    %71 = vector.load %arg6[%c0_11, %c0_12] : memref<1x32xf32, #tpu.memory_space<vmem>>, vector<1x32xf32>
    %72 = vector.shape_cast %71 : vector<1x32xf32> to vector<32xf32>
    %73 = vector.shape_cast %72 : vector<32xf32> to vector<1x32xf32>
    %74 = vector.broadcast %73 : vector<1x32xf32> to vector<128x32xf32>
    %75 = arith.addf %70, %74 : vector<128x32xf32>
    %cst_13 = arith.constant 0.000000e+00 : f32
    %76 = vector.broadcast %cst_13 : f32 to vector<128x32xf32>
    %77 = arith.maximumf %75, %76 : vector<128x32xf32>
    %78 = vector.shape_cast %77 : vector<128x32xf32> to vector<8x16x32xf32>
    %c0_14 = arith.constant 0 : index
    %c0_15 = arith.constant 0 : index
    %c0_16 = arith.constant 0 : index
    %c0_17 = arith.constant 0 : index
    %79 = vector.load %arg7[%c0_14, %c0_15, %c0_16, %c0_17] : memref<1x8x16x32xf32, #tpu.memory_space<vmem>>, vector<1x8x16x32xf32>
    %80 = vector.shape_cast %79 : vector<1x8x16x32xf32> to vector<8x16x32xf32>
    %81 = vector.shape_cast %78 : vector<8x16x32xf32> to vector<1x8x16x32xf32>
    tpu.vector_store %arg7[%c0_14, %c0_15, %c0_16, %c0_17], %81 {strides = array<i32>} : memref<1x8x16x32xf32, #tpu.memory_space<vmem>>, vector<1x8x16x32xf32>,
    %82 = vector.shape_cast %78 : vector<8x16x32xf32> to vector<4x2x16x32xf32>
    %83 = vector.extract_strided_slice %82 {offsets = [0, 0, 0, 0], sizes = [4, 1, 16, 32], strides = [1, 1, 1, 1]} : vector<4x2x16x32xf32> to vector<4x1x16x32xf32>
    %84 = vector.shape_cast %83 : vector<4x1x16x32xf32> to vector<4x16x32xf32>
    %85 = vector.extract_strided_slice %82 {offsets = [0, 1, 0, 0], sizes = [4, 1, 16, 32], strides = [1, 1, 1, 1]} : vector<4x2x16x32xf32> to vector<4x1x16x32xf32>
    %86 = vector.shape_cast %85 : vector<4x1x16x32xf32> to vector<4x16x32xf32>
    %87 = arith.maximumf %84, %86 : vector<4x16x32xf32>
    %88 = vector.extract_strided_slice %87 {offsets = [0, 0, 0], sizes = [4, 1, 32], strides = [1, 1, 1]} : vector<4x16x32xf32> to vector<4x1x32xf32>
    %89 = vector.extract_strided_slice %87 {offsets = [0, 1, 0], sizes = [4, 1, 32], strides = [1, 1, 1]} : vector<4x16x32xf32> to vector<4x1x32xf32>
    %90 = arith.maximumf %88, %89 : vector<4x1x32xf32>
    %91 = vector.extract_strided_slice %87 {offsets = [0, 2, 0], sizes = [4, 1, 32], strides = [1, 1, 1]} : vector<4x16x32xf32> to vector<4x1x32xf32>
    %92 = vector.extract_strided_slice %87 {offsets = [0, 3, 0], sizes = [4, 1, 32], strides = [1, 1, 1]} : vector<4x16x32xf32> to vector<4x1x32xf32>
    %93 = arith.maximumf %91, %92 : vector<4x1x32xf32>
    %94 = vector.extract_strided_slice %87 {offsets = [0, 4, 0], sizes = [4, 1, 32], strides = [1, 1, 1]} : vector<4x16x32xf32> to vector<4x1x32xf32>
    %95 = vector.extract_strided_slice %87 {offsets = [0, 5, 0], sizes = [4, 1, 32], strides = [1, 1, 1]} : vector<4x16x32xf32> to vector<4x1x32xf32>
    %96 = arith.maximumf %94, %95 : vector<4x1x32xf32>
    %97 = vector.extract_strided_slice %87 {offsets = [0, 6, 0], sizes = [4, 1, 32], strides = [1, 1, 1]} : vector<4x16x32xf32> to vector<4x1x32xf32>
    %98 = vector.extract_strided_slice %87 {offsets = [0, 7, 0], sizes = [4, 1, 32], strides = [1, 1, 1]} : vector<4x16x32xf32> to vector<4x1x32xf32>
    %99 = arith.maximumf %97, %98 : vector<4x1x32xf32>
    %100 = vector.extract_strided_slice %87 {offsets = [0, 8, 0], sizes = [4, 1, 32], strides = [1, 1, 1]} : vector<4x16x32xf32> to vector<4x1x32xf32>
    %101 = vector.extract_strided_slice %87 {offsets = [0, 9, 0], sizes = [4, 1, 32], strides = [1, 1, 1]} : vector<4x16x32xf32> to vector<4x1x32xf32>
    %102 = arith.maximumf %100, %101 : vector<4x1x32xf32>
    %103 = vector.extract_strided_slice %87 {offsets = [0, 10, 0], sizes = [4, 1, 32], strides = [1, 1, 1]} : vector<4x16x32xf32> to vector<4x1x32xf32>
    %104 = vector.extract_strided_slice %87 {offsets = [0, 11, 0], sizes = [4, 1, 32], strides = [1, 1, 1]} : vector<4x16x32xf32> to vector<4x1x32xf32>
    %105 = arith.maximumf %103, %104 : vector<4x1x32xf32>
    %106 = vector.extract_strided_slice %87 {offsets = [0, 12, 0], sizes = [4, 1, 32], strides = [1, 1, 1]} : vector<4x16x32xf32> to vector<4x1x32xf32>
    %107 = vector.extract_strided_slice %87 {offsets = [0, 13, 0], sizes = [4, 1, 32], strides = [1, 1, 1]} : vector<4x16x32xf32> to vector<4x1x32xf32>
    %108 = arith.maximumf %106, %107 : vector<4x1x32xf32>
    %109 = vector.extract_strided_slice %87 {offsets = [0, 14, 0], sizes = [4, 1, 32], strides = [1, 1, 1]} : vector<4x16x32xf32> to vector<4x1x32xf32>
    %110 = vector.extract_strided_slice %87 {offsets = [0, 15, 0], sizes = [4, 1, 32], strides = [1, 1, 1]} : vector<4x16x32xf32> to vector<4x1x32xf32>
    %111 = arith.maximumf %109, %110 : vector<4x1x32xf32>
    %112 = tpu.concatenate %90, %93, %96, %99, %102, %105, %108, %111 in 1 : vector<4x1x32xf32>, vector<4x1x32xf32>, vector<4x1x32xf32>, vector<4x1x32xf32>, vector<4x1x32xf32>, vector<4x1x32xf32>, vector<4x1x32xf32>, vector<4x1x32xf32> -> vector<4x8x32xf32>
    %c0_18 = arith.constant 0 : index
    %c0_19 = arith.constant 0 : index
    %c0_20 = arith.constant 0 : index
    %c0_21 = arith.constant 0 : index
    %113 = vector.load %arg8[%c0_18, %c0_19, %c0_20, %c0_21] : memref<1x4x8x32xf32, #tpu.memory_space<vmem>>, vector<1x4x8x32xf32>
    %114 = vector.shape_cast %113 : vector<1x4x8x32xf32> to vector<4x8x32xf32>
    %115 = vector.shape_cast %112 : vector<4x8x32xf32> to vector<1x4x8x32xf32>
    tpu.vector_store %arg8[%c0_18, %c0_19, %c0_20, %c0_21], %115 {strides = array<i32>} : memref<1x4x8x32xf32, #tpu.memory_space<vmem>>, vector<1x4x8x32xf32>,
    return
  }
  func.func @transform_0(%arg0: i32, %arg1: i32) -> (i32, i32, i32, i32) {
    %c0_i32 = arith.constant 0 : i32
    %c0_i32_0 = arith.constant 0 : i32
    %c0_i32_1 = arith.constant 0 : i32
    %c0_i32_2 = arith.constant 0 : i32
    return %arg0, %c0_i32, %c0_i32_0, %c0_i32_1 : i32, i32, i32, i32
  }
  func.func @transform_1(%arg0: i32, %arg1: i32) -> (i32, i32) {
    %c0_i32 = arith.constant 0 : i32
    %c0_i32_0 = arith.constant 0 : i32
    %c0_i32_1 = arith.constant 0 : i32
    return %c0_i32, %c0_i32_0 : i32, i32
  }
  func.func @transform_2(%arg0: i32, %arg1: i32) -> (i32, i32) {
    %c0_i32 = arith.constant 0 : i32
    %c0_i32_0 = arith.constant 0 : i32
    %c0_i32_1 = arith.constant 0 : i32
    return %c0_i32, %c0_i32_0 : i32, i32
  }
  func.func @transform_3(%arg0: i32, %arg1: i32) -> (i32, i32) {
    %c0_i32 = arith.constant 0 : i32
    %c0_i32_0 = arith.constant 0 : i32
    %c0_i32_1 = arith.constant 0 : i32
    return %c0_i32, %c0_i32_0 : i32, i32
  }
  func.func @transform_4(%arg0: i32, %arg1: i32) -> (i32, i32) {
    %c0_i32 = arith.constant 0 : i32
    %c0_i32_0 = arith.constant 0 : i32
    %c0_i32_1 = arith.constant 0 : i32
    return %c0_i32, %c0_i32_0 : i32, i32
  }
  func.func @transform_5(%arg0: i32, %arg1: i32) -> (i32, i32, i32, i32) {
    %c0_i32 = arith.constant 0 : i32
    %c0_i32_0 = arith.constant 0 : i32
    %c0_i32_1 = arith.constant 0 : i32
    return %arg0, %arg1, %c0_i32, %c0_i32_0 : i32, i32, i32, i32
  }
  func.func @transform_6(%arg0: i32, %arg1: i32) -> (i32, i32, i32, i32) {
    %c0_i32 = arith.constant 0 : i32
    %c0_i32_0 = arith.constant 0 : i32
    %c0_i32_1 = arith.constant 0 : i32
    return %arg0, %arg1, %c0_i32, %c0_i32_0 : i32, i32, i32, i32
  }
}

</mosaic_0001>

<bundles_post_ra>
// kernel: conv_block_forward.1
= control target key start
LH: loop header
LB: loop body
LE: loop exit
PB: predicated region body
PF: predicated region fallthrough
CT: control target
= control target key end

     0   :  { %s5164_s0 = inlined_call_operand.vmem [shape: f32[2,20,18,4], index: 0, kind: input, shape index: {}]   ;;  %s5165_s1 = inlined_call_operand.vmem [shape: f32[36,32], index: 1, kind: input, shape index: {}]   ;;  %s5166_s2 = inlined_call_operand.vmem [shape: f32[1,32], index: 2, kind: input, shape index: {}]   ;;  %s5167_s3 = inlined_call_operand.vmem [shape: f32[288,32], index: 3, kind: input, shape index: {}]   ;;  %s5168_s4 = inlined_call_operand.vmem [shape: f32[1,32], index: 4, kind: input, shape index: {}]   ;;  %s5169_s5 = inlined_call_operand.hbm [shape: f32[2,16,16,32], index: 5, kind: output, shape index: {0}]   ;;  %s5170_s6 = inlined_call_operand.hbm [shape: f32[2,8,8,32], index: 6, kind: output, shape index: {1}]  }
   0x1   :  { %5186 = sst [smem:[#allocation62_spill]] %s5164_s0 }
   0x2   :  { %5187 = sst [smem:[#allocation63_spill]] %s5165_s1 }
   0x3   :  { %12 = vsyncpa [#allocation3], 0 }
   0x4   :  { %14 = vsyncpa [#allocation3 + $0x1], 0 }
   0x5   :  { %15 = vsyncpa [#allocation5], 0 }
   0x6   :  { %17 = vsyncpa [#allocation5 + $0x1], 0  ;;  %s3195_s21 = smov 0   ;;  %s3197_s22 = smov 0  }
   0x7   :  { %s3199_s23 = smov 0   ;;  %s3201_s24 = smov 0  }
   0x8   :  { %s3203_s25 = smov 0   ;;  %s3205_s26 = smov 0  }
   0x9   :  { %s3207_s27 = smov 0   ;;  %s3209_s28 = smov 0  }
   0xa LB: > { %s2599_s29 = sadd.s32 4294967295, %s3146_s28   ;;  %s2600_s30 = sadd.s32 4294967294, %s3146_s28   ;;  %s3146_s28 = sphi %s3209_s28, %s23_s28   ;;  %s3142_s27 = sphi %s3207_s27, %s5338_s27   ;;  %s3138_s26 = sphi %s3205_s26, %s5337_s26   ;;  %s3134_s25 = sphi %s3203_s25, %s5336_s25   ;;  %s3130_s24 = sphi %s3201_s24, %s5335_s24   ;;  %s3126_s23 = sphi %s3199_s23, %s5334_s23   ;;  %s3122_s22 = sphi %s3197_s22, %s5333_s22   ;;  %s3118_s21 = sphi %s3195_s21, %s5332_s21  }
   0xb   : > { %s32_s7 = sadd.s32 1, %s3138_s26  ;;  %s35_s8 = sadd.s32 1, %s3142_s27 }
   0xc   : > { %p33_p0 = scmp.ge.s32.totalorder %s32_s7, 2  ;;  %p164_p1 = scmp.ne.s32.totalorder %s3126_s23, %s3122_s22 }
   0xd   : > { %p165_p2 = scmp.eq.s32.totalorder %s2599_s29, 3  ;;  %p170_p5 = scmp.ne.s32.totalorder %s3122_s22, %s3118_s21 }
   0xe   : > { %s5340_s7 = smov (%p33_p0, %s32_s7), 0  ;;  %s5342_s8 = smov (!%p33_p0, %s35_s8), %s3142_s27 }
   0xf   : > { %s150_s9 = ssub.s32 %s3138_s26, %s5340_s7  ;;  %p3246_p3 = por %p165_p2, %p164_p1 }
  0x10   : > { %p37_p4 = scmp.ge.s32.totalorder %s5342_s8, 2  ;;  %p171_p6 = scmp.eq.s32.totalorder %s2600_s30, 3 }
  0x11   : > { %p2603_p7 = scmp.ge.s32.totalorder %s3146_s28, 1  ;;  %p237_p9 = scmp.lt.s32.totalorder %s3146_s28, 5 }
  0x12   : > { %s5344_s8 = smov (%p37_p4, %s5342_s8), 0  ;;  %p3255_p8 = por %p171_p6, %p170_p5 }
  0x13   : > { %s149_s12 = ssub.s32 %s3142_s27, %s5344_s8  ;;  %s154_s13 = sadd.s32 1, %s3126_s23 }
  0x14   : > { %s151_s14 = sor.u32 %s150_s9, %s149_s12  ;;  %p238_p10 = pnand %p2603_p7, %p237_p9 }
  0x15   : > { %p152_p11 = scmp.eq.s32.totalorder %s151_s14, 0 }
  0x16   : > { %241 = sbr.rel (%p238_p10) target bundleno = 1004 (0x3ec), region = 40 }
  0x17   : > { %s3264_s15 = scalar_select %p152_p11, %s3126_s23, %s154_s13  }
  0x1b   : > { %p272_p12 = scmp.lt.s32.totalorder %s3134_s25, 1  ;;  %s2608_s17 = smul.u32 192, %s3130_s24  ;;  %vm348_vm0 = vcmask 1046528   ;;  %vm5185_vm1 = vcmask 1045504   ;;  %vm5184_vm2 = vcmask 1043456   ;;  %vm956_vm3 = vcmask 31744  }
  0x1c   : > { %s5190_s0 = sld [smem:[#allocation62_spill]]  ;;  %s3148_s9 = smov 4   ;;  %vm977_vm4 = vcmask 64512   ;;  %vm998_vm5 = vcmask 97280   ;;  %vm1019_vm6 = vcmask 130048   ;;  %vm1040_vm7 = vcmask 162816  }
  0x1d   : > { %s273_s16 = scalar_select %p272_p12, %s3134_s25, 1  ;;  %vm1061_vm8 = vcmask 195584   ;;  %vm1082_vm9 = vcmask 228352   ;;  %vm1103_vm10 = vcmask 261120   ;;  %vm1133_vm11 = vcmask 293888  }
  0x1e   : > { %s5181_s12 = smov 8   ;;  %s3150_s13 = smov 12  }
  0x1f   : > { %s2682_s18 = smul.u32 480, %s273_s16  ;;  %s5183_s14 = smov 16  }
  0x20   : > { %s3152_s16 = smov 24   ;;  %s3155_s19 = smov 28  }
  0x21   : > { %s5243_s1 = sld [smem:[#allocation63_spill]] }
  0x22   : > { %s276_s29 = scalar_lea.vmem %s5190_s0, %s2682_s18  ;;  %s3154_s18 = smov 32  }
  0x23   : > { %s3272_s30 = scalar_lea.vmem %s276_s29, %s2608_s17  ;;  %s3153_s17 = smov 20  }
  0x24   : > { %v3275_v0 = vld [vmem:[%s3272_s30 + $0x30] sm:$0xff]  ;;  %v3278_v1 = vld [vmem:[%s3272_s30 + $0x38] sm:$0xff]  ;;  %v3286_v5 = vld [vmem:[%s3272_s30 + $0x20] sm:$0xff]  ;;  %s2671_s0 = sshll.u32 %s3130_s24, 2 }
  0x25   : > { %v3281_v2 = vld [vmem:[%s3272_s30 + $0x18] sm:$0xff]  ;;  %v359_v3 = vrot.slane %v3275_v0, 1  ;;  %v360_v4 = vrot.slane %v3278_v1, 1  ;;  %5191 = vst [vmem:[#allocation8_spill] sm:$0xff] %v3286_v5  ;;  %v3290_v7 = vld [vmem:[%s3272_s30] sm:$0xff]  ;;  %v3293_v8 = vld [vmem:[%s3272_s30 + $0x8] sm:$0xff] }
  0x26   : > { %v354_v6 = vrot.slane %v3281_v2, 1  ;;  %v355_v9 = vrot.slane %v3286_v5, 1  ;;  %v349_v10 = vrot.slane %v3290_v7, 1  ;;  %v350_v11 = vrot.slane %v3293_v8, 1  ;;  %v3299_v12 = vld [vmem:[%s3272_s30 + $0x40] sm:$0x3] }
  0x27   : > { %v3302_v13 = vsel %vm348_vm0, %v359_v3, %v360_v4  ;;  %v3305_v14 = vld [vmem:[%s3272_s30 + $0x28] sm:$0x3]  ;;  %v3308_v15 = vld [vmem:[%s3272_s30 + $0x10] sm:$0x3]  ;;  %v362_v18 = vrot.slane %v3299_v12, 1  ;;  %v3330_v24 = vld [vmem:[%s3272_s30 + $0x60] sm:$0xff] }
  0x28   : > { %484 = vrot.lane.b32.xlu2 %v3302_v13, %s3148_s9  ;;  %v3313_v16 = vsel %vm348_vm0, %v354_v6, %v355_v9  ;;  %v351_v17 = vsel %vm348_vm0, %v349_v10, %v350_v11  ;;  %v357_v19 = vrot.slane %v3305_v14, 1  ;;  %v352_v20 = vrot.slane %v3308_v15, 1  ;;  %v3333_v25 = vld [vmem:[%s3272_s30 + $0x68] sm:$0xff]  ;;  %v3336_v26 = vld [vmem:[%s3272_s30 + $0x50] sm:$0xff]  ;;  %v3339_v27 = vld [vmem:[%s3272_s30 + $0x58] sm:$0x3] }
  0x29   : > { %480 = vrot.lane.b32.xlu1 %v3313_v16, %s3148_s9  ;;  %476 = vrot.lane.b32.xlu0 %v351_v17, %s3148_s9  ;;  %v3323_v21 = vsel %vm348_vm0, %v360_v4, %v362_v18  ;;  %v3342_v28 = vld [vmem:[%s3272_s30 + $0x48] sm:$0xff]  ;;  %v369_v29 = vrot.slane %v3330_v24, 1  ;;  %v370_v30 = vrot.slane %v3333_v25, 1  ;;  %v365_v31 = vrot.slane %v3336_v26, 1  ;;  %v3364_v37 = vld [vmem:[%s3272_s30 + $0x80] sm:$0xff] }
  0x2a   : > { %v3326_v22 = vsel %vm348_vm0, %v355_v9, %v357_v19  ;;  %v353_v23 = vsel %vm348_vm0, %v350_v11, %v352_v20  ;;  %v367_v32 = vrot.slane %v3339_v27, 1  ;;  %v364_v33 = vrot.slane %v3342_v28, 1  ;;  %v3367_v38 = vld [vmem:[%s3272_s30 + $0x88] sm:$0x3]  ;;  %v3370_v39 = vld [vmem:[%s3272_s30 + $0x78] sm:$0xff]  ;;  %v3398_v49 = vld [vmem:[%s3272_s30 + $0xb0] sm:$0xff] }
  0x2b   : > { %v3355_v34 = vsel %vm348_vm0, %v369_v29, %v370_v30  ;;  %v3373_v40 = vld [vmem:[%s3272_s30 + $0x70] sm:$0x3]  ;;  %v375_v41 = vrot.slane %v3364_v37, 1  ;;  %v377_v42 = vrot.slane %v3367_v38, 1  ;;  %v374_v43 = vrot.slane %v3370_v39, 1  ;;  %v3395_v48 = vld [vmem:[%s3272_s30 + $0xa8] sm:$0xff] }
  0x2c   : > { %v3358_v35 = vsel %vm348_vm0, %v365_v31, %v367_v32  ;;  %v3361_v36 = vsel %vm348_vm0, %v364_v33, %v365_v31  ;;  %v372_v44 = vrot.slane %v3373_v40, 1  ;;  %v3401_v50 = vld [vmem:[%s3272_s30 + $0x98] sm:$0xff]  ;;  %v3404_v51 = vld [vmem:[%s3272_s30 + $0xa0] sm:$0x3]  ;;  %v3407_v52 = vld [vmem:[%s3272_s30 + $0x90] sm:$0xff]  ;;  %v384_v53 = vrot.slane %v3395_v48, 1 }
  0x2d   : > { %v3386_v45 = vsel %vm348_vm0, %v375_v41, %v377_v42  ;;  %v3389_v46 = vsel %vm348_vm0, %v374_v43, %v375_v41  ;;  %v385_v54 = vrot.slane %v3398_v49, 1  ;;  %v380_v55 = vrot.slane %v3401_v50, 1  ;;  %v3430_v61 = vld [vmem:[%s3272_s30 + $0xc8] sm:$0xff]  ;;  %v3433_v62 = vld [vmem:[%s3272_s30 + $0xd0] sm:$0x3]  ;;  %v3436_v63 = vld [vmem:[%s3272_s30 + $0xc0] sm:$0xff] }
  0x2e   : > { %v3392_v47 = vsel %vm348_vm0, %v370_v30, %v372_v44  ;;  %v382_v56 = vrot.slane %v3404_v51, 1  ;;  %v379_v57 = vrot.slane %v3407_v52, 1  ;;  %v3439_v3 = vld [vmem:[%s3272_s30 + $0xb8] sm:$0x3]  ;;  %v390_v4 = vrot.slane %v3430_v61, 1  ;;  %v3461_v19 = vld [vmem:[%s3272_s30 + $0xe0] sm:$0xff] }
  0x2f   : > { %v3421_v58 = vsel %vm348_vm0, %v384_v53, %v385_v54  ;;  %v392_v6 = vrot.slane %v3433_v62, 1  ;;  %v389_v9 = vrot.slane %v3436_v63, 1  ;;  %v387_v10 = vrot.slane %v3439_v3, 1  ;;  %5192 = vst [vmem:[#allocation9_spill] sm:$0xff] %v3461_v19  ;;  %v3464_v20 = vld [vmem:[%s3272_s30 + $0xe8] sm:$0x3] }
  0x30   : > { %486 = vrot.lane.b32.xlu2 %v3323_v21, %s3148_s9  ;;  %v3424_v59 = vsel %vm348_vm0, %v380_v55, %v382_v56  ;;  %v3427_v60 = vsel %vm348_vm0, %v379_v57, %v380_v55  ;;  %v400_v29 = vrot.slane %v3290_v7, 2  ;;  %v401_v30 = vrot.slane %v3293_v8, 2 }
  0x31   : > { %482 = vrot.lane.b32.xlu1 %v3326_v22, %s3148_s9  ;;  %478 = vrot.lane.b32.xlu0 %v353_v23, %s3148_s9  ;;  %v3452_v11 = vsel %vm348_vm0, %v390_v4, %v392_v6  ;;  %v3455_v17 = vsel %vm348_vm0, %v389_v9, %v390_v4  ;;  %v3458_v18 = vsel %vm348_vm0, %v385_v54, %v387_v10  ;;  %v3467_v23 = vld [vmem:[%s3272_s30 + $0xd8] sm:$0xff]  ;;  %v395_v31 = vrot.slane %v3461_v19, 1 }
  0x32   : > { %5193 = vst [vmem:[#allocation10_spill] sm:$0xff] %v3467_v23  ;;  %v397_v32 = vrot.slane %v3464_v20, 1  ;;  %v394_v33 = vrot.slane %v3467_v23, 1  ;;  %v402_v41 = vsel %vm5185_vm1, %v400_v29, %v401_v30  ;;  %v406_v44 = vrot.slane %v3286_v5, 2 }
  0x33   : > { %v408_v53 = vrot.slane %v3305_v14, 2  ;;  %v405_v54 = vrot.slane %v3281_v2, 2  ;;  %v403_v55 = vrot.slane %v3308_v15, 2  ;;  %v415_v14 = vrot.slane %v3342_v28, 2 }
  0x34   : > { %v3482_v42 = vsel %vm348_vm0, %v395_v31, %v397_v32  ;;  %v3485_v43 = vsel %vm348_vm0, %v394_v33, %v395_v31  ;;  %v416_v15 = vrot.slane %v3336_v26, 2  ;;  %v411_v6 = vrot.slane %v3278_v1, 2 }
  0x35   : > { %v3497_v56 = vsel %vm5185_vm1, %v406_v44, %v408_v53  ;;  %v3500_v57 = vsel %vm5185_vm1, %v405_v54, %v406_v44  ;;  %v404_v4 = vsel %vm5185_vm1, %v401_v30, %v403_v55  ;;  %v413_v9 = vrot.slane %v3299_v12, 2 }
  0x36   : > { %v410_v10 = vrot.slane %v3275_v0, 2  ;;  %v3514_v29 = vsel %vm5185_vm1, %v415_v14, %v416_v15  ;;  %v421_v12 = vrot.slane %v3333_v25, 2  ;;  %v423_v32 = vrot.slane %v3373_v40, 2 }
  0x37   : > { %v3517_v30 = vsel %vm5185_vm1, %v411_v6, %v413_v9  ;;  %v420_v33 = vrot.slane %v3330_v24, 2  ;;  %v431_v40 = vrot.slane %v3401_v50, 2  ;;  %v426_v55 = vrot.slane %v3364_v37, 2 }
  0x38   : > { %492 = vrot.lane.b32.xlu2 %v3355_v34, %s3148_s9  ;;  %v3520_v31 = vsel %vm5185_vm1, %v410_v10, %v411_v6  ;;  %v3533_v44 = vsel %vm5185_vm1, %v421_v12, %v423_v32  ;;  %v425_v14 = vrot.slane %v3370_v39, 2  ;;  %v438_v10 = vrot.slane %v3439_v3, 2 }
  0x39   : > { %490 = vrot.lane.b32.xlu1 %v3358_v35, %s3148_s9  ;;  %488 = vrot.lane.b32.xlu0 %v3361_v36, %s3148_s9  ;;  %v3536_v53 = vsel %vm5185_vm1, %v420_v33, %v421_v12  ;;  %v435_v12 = vrot.slane %v3395_v48, 2  ;;  %v433_v32 = vrot.slane %v3404_v51, 2  ;;  %v445_v51 = vrot.slane %v3467_v23, 2 }
  0x3a   : > { %v3559_v9 = vsel %vm5185_vm1, %v425_v14, %v426_v55  ;;  %v446_v3 = vrot.slane %v3461_v19, 2  ;;  %v440_v14 = vrot.slane %v3436_v63, 2 }
  0x40   : > { %498 = vrot.lane.b32.xlu2 %v3386_v45, %s3148_s9 }
  0x41   : > { %496 = vrot.lane.b32.xlu1 %v3389_v46, %s3148_s9  ;;  %494 = vrot.lane.b32.xlu0 %v3392_v47, %s3148_s9 }
  0x48   : > { %504 = vrot.lane.b32.xlu2 %v3421_v58, %s3148_s9 }
  0x49   : > { %502 = vrot.lane.b32.xlu1 %v3424_v59, %s3148_s9  ;;  %500 = vrot.lane.b32.xlu0 %v3427_v60, %s3148_s9 }
  0x50   : > { %510 = vrot.lane.b32.xlu2 %v3452_v11, %s3148_s9 }
  0x51   : > { %508 = vrot.lane.b32.xlu1 %v3455_v17, %s3148_s9  ;;  %506 = vrot.lane.b32.xlu0 %v3458_v18, %s3148_s9 }
  0x58   : > { %536 = vrot.lane.b32.xlu2 %v402_v41, %s5181_s12  ;;  %v418_v41 = vrot.slane %v3339_v27, 2  ;;  %v430_v27 = vrot.slane %v3407_v52, 2 }
  0x59   : > { %514 = vrot.lane.b32.xlu1 %v3482_v42, %s3148_s9  ;;  %512 = vrot.lane.b32.xlu0 %v3485_v43, %s3148_s9  ;;  %s5263_s9 = smov 16  }
  0x5a   : > { %v3539_v54 = vsel %vm5185_vm1, %v416_v15, %v418_v41  ;;  %v3553_v15 = vsel %vm5185_vm1, %v430_v27, %v431_v40  ;;  %v3578_v27 = vsel %vm5185_vm1, %v431_v40, %v433_v32  ;;  %v443_v40 = vrot.slane %v3433_v62, 2 }
  0x5b   : > { %v448_v32 = vrot.slane %v3464_v20, 2 }
  0x60   : > { %542 = vrot.lane.b32.xlu2 %v3497_v56, %s5181_s12 }
  0x61   : > { %540 = vrot.lane.b32.xlu1 %v3500_v57, %s5181_s12  ;;  %538 = vrot.lane.b32.xlu0 %v404_v4, %s5181_s12  ;;  %v428_v4 = vrot.slane %v3367_v38, 2  ;;  %v436_v38 = vrot.slane %v3398_v49, 2 }
  0x63   : > { %v3556_v6 = vsel %vm5185_vm1, %v426_v55, %v428_v4  ;;  %v3572_v33 = vsel %vm5185_vm1, %v436_v38, %v438_v10  ;;  %v3575_v41 = vsel %vm5185_vm1, %v435_v12, %v436_v38  ;;  %v441_v4 = vrot.slane %v3430_v61, 2 }
  0x64   : > { %v3594_v38 = vsel %vm5185_vm1, %v445_v51, %v446_v3  ;;  %v3612_v51 = vsel %vm5185_vm1, %v446_v3, %v448_v32 }
  0x65   : > { %5195 = vst [vmem:[#allocation12_spill] sm:$0xff] %v3594_v38  ;;  %v3597_v10 = vsel %vm5185_vm1, %v441_v4, %v443_v40  ;;  %v3600_v12 = vsel %vm5185_vm1, %v440_v14, %v441_v4 }
  0x66   : > { %5197 = vst [vmem:[#allocation14_spill] sm:$0xff] %v3612_v51 }
  0x68   : > { %548 = vrot.lane.b32.xlu2 %v3514_v29, %s5181_s12 }
  0x69   : > { %546 = vrot.lane.b32.xlu1 %v3517_v30, %s5181_s12  ;;  %544 = vrot.lane.b32.xlu0 %v3520_v31, %s5181_s12 }
  0x70   : > { %554 = vrot.lane.b32.xlu2 %v3533_v44, %s5181_s12 }
  0x71   : > { %552 = vrot.lane.b32.xlu1 %v3536_v53, %s5181_s12  ;;  %550 = vrot.lane.b32.xlu0 %v3539_v54, %s5181_s12 }
  0x78   : > { %560 = vrot.lane.b32.xlu2 %v3553_v15, %s5181_s12 }
  0x79   : > { %558 = vrot.lane.b32.xlu1 %v3556_v6, %s5181_s12  ;;  %556 = vrot.lane.b32.xlu0 %v3559_v9, %s5181_s12 }
  0x80   : > { %566 = vrot.lane.b32.xlu2 %v3572_v33, %s5181_s12 }
  0x81   : > { %564 = vrot.lane.b32.xlu1 %v3575_v41, %s5181_s12  ;;  %562 = vrot.lane.b32.xlu0 %v3578_v27, %s5181_s12 }
  0x82   : > { %v3588_v55 = vpop.permute.xlu2 %484 }
  0x83   : > { %5194 = vst [vmem:[#allocation11_spill] sm:$0xff] %v3588_v55 }
  0x88   : > { %572 = vrot.lane.b32.xlu2 %v3594_v38, %s5181_s12 }
  0x89   : > { %570 = vrot.lane.b32.xlu1 %v3597_v10, %s5181_s12  ;;  %568 = vrot.lane.b32.xlu0 %v3600_v12, %s5181_s12 }
  0x8a   : > { %v3608_v62 = vpop.permute.xlu2 %486 }
  0x8b   : > { %5196 = vst [vmem:[#allocation13_spill] sm:$0xff] %v3608_v62 }
  0x90   : > { %598 = vrot.lane.b32.xlu2 %v3286_v5, %s3150_s13  ;;  %v3683_v5 = vld [vmem:[%s3272_s30 + $0xf8] sm:$0xff] }
  0x91   : > { %596 = vrot.lane.b32.xlu1 %v3281_v2, %s3150_s13  ;;  %574 = vrot.lane.b32.xlu0 %v3612_v51, %s5181_s12 }
  0x92   : > { %v3620_v4 = vpop.permute.xlu2 %492 }
  0x93   : > { %5198 = vst [vmem:[#allocation15_spill] sm:$0xff] %v3620_v4 }
  0x98   : > { %604 = vrot.lane.b32.xlu2 %v3342_v28, %s3150_s13 }
  0x99   : > { %602 = vrot.lane.b32.xlu1 %v3278_v1, %s3150_s13  ;;  %600 = vrot.lane.b32.xlu0 %v3275_v0, %s3150_s13 }
  0x9a   : > { %v3628_v20 = vpop.permute.xlu2 %498 }
  0x9b   : > { %5199 = vst [vmem:[#allocation16_spill] sm:$0xff] %v3628_v20  ;;  %v3630_v3 = vpop.permute.xlu1 %480  ;;  %v3632_v40 = vpop.permute.xlu0 %476 }
  0xa0   : > { %610 = vrot.lane.b32.xlu2 %v3333_v25, %s3150_s13 }
  0xa1   : > { %608 = vrot.lane.b32.xlu1 %v3330_v24, %s3150_s13  ;;  %606 = vrot.lane.b32.xlu0 %v3336_v26, %s3150_s13 }
  0xa2   : > { %v3640_v14 = vpop.permute.xlu2 %504 }
  0xa3   : > { %5200 = vst [vmem:[#allocation17_spill] sm:$0xff] %v3640_v14  ;;  %v3642_v32 = vpop.permute.xlu1 %482  ;;  %v3644_v4 = vpop.permute.xlu0 %478 }
  0xa4   : > { %5201 = vst [vmem:[#allocation18_spill] sm:$0xff] %v3642_v32 }
  0xa8   : > { %616 = vrot.lane.b32.xlu2 %v3407_v52, %s3150_s13 }
  0xa9   : > { %614 = vrot.lane.b32.xlu1 %v3364_v37, %s3150_s13  ;;  %612 = vrot.lane.b32.xlu0 %v3370_v39, %s3150_s13 }
  0xaa   : > { %v3652_v20 = vpop.permute.xlu2 %510 }
  0xab   : > { %5202 = vst [vmem:[#allocation19_spill] sm:$0xff] %v3652_v20  ;;  %v3654_v51 = vpop.permute.xlu1 %490  ;;  %v3656_v14 = vpop.permute.xlu0 %488 }
  0xac   : > { %5203 = vst [vmem:[#allocation20_spill] sm:$0xff] %v3654_v51 }
  0xad   : > { %5204 = vst [vmem:[#allocation21_spill] sm:$0xff] %v3656_v14 }
  0xb0   : > { %622 = vrot.lane.b32.xlu2 %v3398_v49, %s3150_s13 }
  0xb1   : > { %620 = vrot.lane.b32.xlu1 %v3395_v48, %s3150_s13  ;;  %618 = vrot.lane.b32.xlu0 %v3401_v50, %s3150_s13 }
  0xb2   : > { %v3664_v62 = vpop.permute.xlu2 %536 }
  0xb3   : > { %v3666_v38 = vpop.permute.xlu1 %496  ;;  %v3668_v55 = vpop.permute.xlu0 %494 }
  0xb4   : > { %5205 = vst [vmem:[#allocation22_spill] sm:$0xff] %v3666_v38  ;;  %v3686_v38 = vld [vmem:[%s3272_s30 + $0xf0] sm:$0xff] }
  0xb5   : > { %5206 = vst [vmem:[#allocation23_spill] sm:$0xff] %v3668_v55 }
  0xb6   : > { %5210 = vst [vmem:[#allocation27_spill] sm:$0xff] %v3686_v38 }
  0xb8   : > { %628 = vrot.lane.b32.xlu2 %v3467_v23, %s3150_s13 }
  0xb9   : > { %626 = vrot.lane.b32.xlu1 %v3430_v61, %s3150_s13  ;;  %624 = vrot.lane.b32.xlu0 %v3436_v63, %s3150_s13 }
  0xba   : > { %v3676_v20 = vpop.permute.xlu2 %542 }
  0xbb   : > { %5207 = vst [vmem:[#allocation24_spill] sm:$0xff] %v3676_v20  ;;  %v3678_v51 = vpop.permute.xlu1 %502  ;;  %v3680_v14 = vpop.permute.xlu0 %500 }
  0xbc   : > { %5208 = vst [vmem:[#allocation25_spill] sm:$0xff] %v3678_v51 }
  0xbd   : > { %5209 = vst [vmem:[#allocation26_spill] sm:$0xff] %v3680_v14 }
  0xc0   : > { %634 = vrot.lane.b32.xlu2 %v3683_v5, %s3150_s13 }
  0xc1   : > { %632 = vrot.lane.b32.xlu1 %v3686_v38, %s3150_s13  ;;  %630 = vrot.lane.b32.xlu0 %v3461_v19, %s3150_s13  ;;  %s3158_s13 = smov 96  }
  0xc2   : > { %v3694_v55 = vpop.permute.xlu2 %548 }
  0xc3   : > { %5211 = vst [vmem:[#allocation28_spill] sm:$0xff] %v3694_v55  ;;  %v3696_v23 = vpop.permute.xlu1 %508  ;;  %v3698_v51 = vpop.permute.xlu0 %506 }
  0xc4   : > { %5212 = vst [vmem:[#allocation29_spill] sm:$0xff] %v3696_v23 }
  0xc5   : > { %5213 = vst [vmem:[#allocation30_spill] sm:$0xff] %v3698_v51 }
  0xc8   : > { %660 = vrot.lane.b32.xlu2 %v3302_v13, %s5183_s14 }
  0xc9   : > { %658 = vrot.lane.b32.xlu1 %v3326_v22, %s5183_s14  ;;  %656 = vrot.lane.b32.xlu0 %v3313_v16, %s5183_s14 }
  0xca   : > { %v3706_v14 = vpop.permute.xlu2 %554 }
  0xcb   : > { %5214 = vst [vmem:[#allocation31_spill] sm:$0xff] %v3706_v14  ;;  %v3708_v20 = vpop.permute.xlu1 %514  ;;  %v3710_v19 = vpop.permute.xlu0 %512 }
  0xcc   : > { %5215 = vst [vmem:[#allocation32_spill] sm:$0xff] %v3708_v20 }
  0xcd   : > { %5216 = vst [vmem:[#allocation33_spill] sm:$0xff] %v3710_v19 }
  0xd0   : > { %666 = vrot.lane.b32.xlu2 %v3358_v35, %s5183_s14 }
  0xd1   : > { %664 = vrot.lane.b32.xlu1 %v3361_v36, %s5183_s14  ;;  %662 = vrot.lane.b32.xlu0 %v3323_v21, %s5183_s14 }
  0xd2   : > { %v3718_v23 = vpop.permute.xlu2 %560 }
  0xd3   : > { %5217 = vst [vmem:[#allocation34_spill] sm:$0xff] %v3718_v23  ;;  %v3720_v22 = vpop.permute.xlu1 %540  ;;  %v3722_v16 = vpop.permute.xlu0 %538 }
  0xd8   : > { %672 = vrot.lane.b32.xlu2 %v3389_v46, %s5183_s14 }
  0xd9   : > { %670 = vrot.lane.b32.xlu1 %v3392_v47, %s5183_s14  ;;  %668 = vrot.lane.b32.xlu0 %v3355_v34, %s5183_s14 }
  0xda   : > { %v3730_v19 = vpop.permute.xlu2 %566 }
  0xdb   : > { %5218 = vst [vmem:[#allocation35_spill] sm:$0xff] %v3730_v19  ;;  %v3732_v20 = vpop.permute.xlu1 %546  ;;  %v3734_v51 = vpop.permute.xlu0 %544 }
  0xdc   : > { %5219 = vst [vmem:[#allocation36_spill] sm:$0xff] %v3732_v20 }
  0xdd   : > { %5220 = vst [vmem:[#allocation37_spill] sm:$0xff] %v3734_v51 }
  0xe0   : > { %678 = vrot.lane.b32.xlu2 %v3424_v59, %s5183_s14 }
  0xe1   : > { %676 = vrot.lane.b32.xlu1 %v3427_v60, %s5183_s14  ;;  %674 = vrot.lane.b32.xlu0 %v3386_v45, %s5183_s14 }
  0xe2   : > { %v3742_v23 = vpop.permute.xlu2 %572 }
  0xe3   : > { %5221 = vst [vmem:[#allocation38_spill] sm:$0xff] %v3742_v23  ;;  %v3744_v14 = vpop.permute.xlu1 %552  ;;  %v3746_v55 = vpop.permute.xlu0 %550 }
  0xe4   : > { %5222 = vst [vmem:[#allocation39_spill] sm:$0xff] %v3744_v14  ;;  %v453_v14 = vrot.slane %v3686_v38, 1 }
  0xe5   : > { %5223 = vst [vmem:[#allocation40_spill] sm:$0xff] %v3746_v55  ;;  %v5180_v55 = vrot.slane %v3683_v5, 1 }
  0xe8   : > { %684 = vrot.lane.b32.xlu2 %v3455_v17, %s5183_s14 }
  0xe9   : > { %682 = vrot.lane.b32.xlu1 %v3458_v18, %s5183_s14  ;;  %680 = vrot.lane.b32.xlu0 %v3421_v58, %s5183_s14 }
  0xea   : > { %v3754_v19 = vpop.permute.xlu2 %598 }
  0xeb   : > { %v3756_v20 = vpop.permute.xlu1 %558  ;;  %v3758_v51 = vpop.permute.xlu0 %556 }
  0xec   : > { %5224 = vst [vmem:[#allocation41_spill] sm:$0xff] %v3756_v20 }
  0xed   : > { %5225 = vst [vmem:[#allocation42_spill] sm:$0xff] %v3758_v51  ;;  %v3777_v51 = vsel %vm348_vm0, %v453_v14, %v5180_v55 }
  0xf0   : > { %690 = vrot.lane.b32.xlu2 %v3482_v42, %s5183_s14 }
  0xf1   : > { %688 = vrot.lane.b32.xlu1 %v3485_v43, %s5183_s14  ;;  %686 = vrot.lane.b32.xlu0 %v3452_v11, %s5183_s14 }
  0xf2   : > { %v3766_v23 = vpop.permute.xlu2 %604 }
  0xf3   : > { %v3770_v32 = vpop.permute.xlu1 %564  ;;  %v3772_v20 = vpop.permute.xlu0 %562 }
  0xf4   : > { %5226 = vst [vmem:[#allocation43_spill] sm:$0xff] %v3770_v32 }
  0xf5   : > { %5227 = vst [vmem:[#allocation44_spill] sm:$0xff] %v3772_v20 }
  0xf8   : > { %776 = vrot.lane.b32.xlu2 %v3275_v0, %s3152_s16 }
  0xf9   : > { %716 = vrot.lane.b32.xlu1 %v3500_v57, %s3153_s17  ;;  %692 = vrot.lane.b32.xlu0 %v3777_v51, %s5183_s14 }
  0xfa   : > { %v3785_v38 = vpop.permute.xlu2 %610 }
  0xfb   : > { %v3787_v32 = vpop.permute.xlu1 %570  ;;  %v3789_v20 = vpop.permute.xlu0 %568 }
  0xfc   : > { %5228 = vst [vmem:[#allocation45_spill] sm:$0xff] %v3787_v32 }
  0xfd   : > { %5229 = vst [vmem:[#allocation46_spill] sm:$0xff] %v3789_v20 }
 0x100   : > { %718 = vrot.lane.b32.xlu2 %v3497_v56, %s3153_s17 }
 0x101   : > { %896 = vrot.lane.b32.xlu1 %v3520_v31, %s3154_s18  ;;  %836 = vrot.lane.b32.xlu0 %v3302_v13, %s3155_s19 }
 0x102   : > { %v3797_v57 = vpop.permute.xlu2 %616 }
 0x103   : > { %5230 = vst [vmem:[#allocation47_spill] sm:$0xff] %v3797_v57  ;;  %v3799_v14 = vpop.permute.xlu1 %596  ;;  %v3801_v55 = vpop.permute.xlu0 %574 }
 0x104   : > { %5231 = vst [vmem:[#allocation48_spill] sm:$0xff] %v3801_v55 }
 0x108   : > { %898 = vrot.lane.b32.xlu2 %v3517_v30, %s3154_s18 }
 0x109   : > { %838 = vrot.lane.b32.xlu1 %v3323_v21, %s3155_s19  ;;  %778 = vrot.lane.b32.xlu0 %v3278_v1, %s3152_s16 }
 0x10a   : > { %v3809_v56 = vpop.permute.xlu2 %622 }
 0x10b   : > { %5232 = vst [vmem:[#allocation49_spill] sm:$0xff] %v3809_v56  ;;  %v3811_v32 = vpop.permute.xlu1 %602  ;;  %v3813_v13 = vpop.permute.xlu0 %600 }
 0x110   : > { %840 = vrot.lane.b32.xlu2 %v3361_v36, %s3155_s19 }
 0x111   : > { %780 = vrot.lane.b32.xlu1 %v3342_v28, %s3152_s16  ;;  %720 = vrot.lane.b32.xlu0 %v3520_v31, %s3153_s17 }
 0x112   : > { %v3821_v55 = vpop.permute.xlu2 %628 }
 0x113   : > { %5233 = vst [vmem:[#allocation50_spill] sm:$0xff] %v3821_v55  ;;  %v3823_v21 = vpop.permute.xlu1 %608  ;;  %v3825_v20 = vpop.permute.xlu0 %606 }
 0x118   : > { %782 = vrot.lane.b32.xlu2 %v3336_v26, %s3152_s16 }
 0x119   : > { %722 = vrot.lane.b32.xlu1 %v3517_v30, %s3153_s17  ;;  %900 = vrot.lane.b32.xlu0 %v3514_v29, %s3154_s18 }
 0x11a   : > { %v3833_v36 = vpop.permute.xlu2 %634 }
 0x11b   : > { %5234 = vst [vmem:[#allocation51_spill] sm:$0xff] %v3833_v36  ;;  %v3835_v56 = vpop.permute.xlu1 %614  ;;  %v3837_v31 = vpop.permute.xlu0 %612 }
 0x120   : > { %724 = vrot.lane.b32.xlu2 %v3514_v29, %s3153_s17 }
 0x121   : > { %902 = vrot.lane.b32.xlu1 %v3539_v54, %s3154_s18  ;;  %842 = vrot.lane.b32.xlu0 %v3358_v35, %s3155_s19 }
 0x122   : > { %v3845_v55 = vpop.permute.xlu2 %660 }
 0x123   : > { %v3847_v30 = vpop.permute.xlu1 %620  ;;  %v3849_v57 = vpop.permute.xlu0 %618 }
 0x124   : > { %5235 = vst [vmem:[#allocation52_spill] sm:$0xff] %v3847_v30 }
 0x125   : > { %5236 = vst [vmem:[#allocation53_spill] sm:$0xff] %v3849_v57 }
 0x128   : > { %904 = vrot.lane.b32.xlu2 %v3536_v53, %s3154_s18 }
 0x129   : > { %844 = vrot.lane.b32.xlu1 %v3355_v34, %s3155_s19  ;;  %784 = vrot.lane.b32.xlu0 %v3330_v24, %s3152_s16 }
 0x12a   : > { %v3857_v29 = vpop.permute.xlu2 %666 }
 0x12b   : > { %v3859_v36 = vpop.permute.xlu1 %626  ;;  %v3861_v35 = vpop.permute.xlu0 %624 }
 0x12c   : > { %5237 = vst [vmem:[#allocation54_spill] sm:$0xff] %v3859_v36  ;;  %v1128_v36 = vld [vmem:[%s5243_s1 + $0x20] sm:$0xf] }
 0x12d   : > { %5238 = vst [vmem:[#allocation55_spill] sm:$0xff] %v3861_v35  ;;  %2609 = vmatpush.msk.msra.mxu0 %vm5184_vm2, %v1128_v36  ;;  %2677 = vmatpush.msk.msra.mxu3 %vm5184_vm2, %v1128_v36 }
 0x130   : > { %846 = vrot.lane.b32.xlu2 %v3392_v47, %s3155_s19 }
 0x131   : > { %786 = vrot.lane.b32.xlu1 %v3333_v25, %s3152_s16  ;;  %726 = vrot.lane.b32.xlu0 %v3539_v54, %s3153_s17 }
 0x132   : > { %v3869_v30 = vpop.permute.xlu2 %672 }
 0x133   : > { %v3871_v34 = vpop.permute.xlu1 %632  ;;  %v3873_v57 = vpop.permute.xlu0 %630 }
 0x134   : > { %5239 = vst [vmem:[#allocation56_spill] sm:$0xff] %v3871_v34 }
 0x135   : > { %5240 = vst [vmem:[#allocation57_spill] sm:$0xff] %v3873_v57 }
 0x138   : > { %788 = vrot.lane.b32.xlu2 %v3370_v39, %s3152_s16 }
 0x139   : > { %728 = vrot.lane.b32.xlu1 %v3536_v53, %s3153_s17  ;;  %906 = vrot.lane.b32.xlu0 %v3533_v44, %s3154_s18 }
 0x13a   : > { %v3881_v47 = vpop.permute.xlu2 %678 }
 0x13b   : > { %v3883_v25 = vpop.permute.xlu1 %658  ;;  %v657_v54 = vpop.permute.xlu0 %656 }
 0x140   : > { %730 = vrot.lane.b32.xlu2 %v3533_v44, %s3153_s17 }
 0x141   : > { %908 = vrot.lane.b32.xlu1 %v3559_v9, %s3154_s18  ;;  %848 = vrot.lane.b32.xlu0 %v3389_v46, %s3155_s19 }
 0x142   : > { %v3891_v39 = vpop.permute.xlu2 %684 }
 0x143   : > { %5241 = vst [vmem:[#allocation58_spill] sm:$0xff] %v3891_v39  ;;  %v3893_v53 = vpop.permute.xlu1 %664  ;;  %v3895_v34 = vpop.permute.xlu0 %662  ;;  %v1127_v39 = vld [vmem:[%s5243_s1 + $0x18] sm:$0xff] }
 0x144   : > { %1210 = vmatpush.msra.mxu0 %v1127_v39  ;;  %2678 = vmatpush.msra.mxu3 %v1127_v39 }
 0x148   : > { %910 = vrot.lane.b32.xlu2 %v3556_v6, %s3154_s18 }
 0x149   : > { %850 = vrot.lane.b32.xlu1 %v3386_v45, %s3155_s19  ;;  %790 = vrot.lane.b32.xlu0 %v3364_v37, %s3152_s16  ;;  %v1126_v37 = vld [vmem:[%s5243_s1 + $0x10] sm:$0xff]  ;;  %v1125_v45 = vld [vmem:[%s5243_s1 + $0x8] sm:$0xff] }
 0x14a   : > { %v3903_v44 = vpop.permute.xlu2 %690  ;;  %1211 = vmatpush.msra.mxu0 %v1126_v37  ;;  %2679 = vmatpush.msra.mxu3 %v1126_v37 }
 0x14b   : > { %5242 = vst [vmem:[#allocation59_spill] sm:$0xff] %v3903_v44  ;;  %v3905_v57 = vpop.permute.xlu1 %670  ;;  %v3907_v46 = vpop.permute.xlu0 %668 }
 0x14c   : > { %1212 = vmatpush.msra.mxu0 %v1125_v45  ;;  %2680 = vmatpush.msra.mxu3 %v1125_v45 }
 0x150   : > { %852 = vrot.lane.b32.xlu2 %v3427_v60, %s3155_s19  ;;  %v1124_v60 = vld [vmem:[%s5243_s1] sm:$0xff] }
 0x151   : > { %792 = vrot.lane.b32.xlu1 %v3407_v52, %s3152_s16  ;;  %732 = vrot.lane.b32.xlu0 %v3559_v9, %s3153_s17 }
 0x152   : > { %v777_v36 = vpop.permute.xlu2 %776  ;;  %1213 = vmatpush.msra.mxu0 %v1124_v60  ;;  %2681 = vmatpush.msra.mxu3 %v1124_v60 }
 0x153   : > { %v3929_v44 = vpop.permute.xlu1 %676  ;;  %v3931_v35 = vpop.permute.xlu0 %674 }
 0x158   : > { %794 = vrot.lane.b32.xlu2 %v3401_v50, %s3152_s16 }
 0x159   : > { %734 = vrot.lane.b32.xlu1 %v3556_v6, %s3153_s17  ;;  %912 = vrot.lane.b32.xlu0 %v3553_v15, %s3154_s18 }
 0x15a   : > { %v719_v52 = vpop.permute.xlu2 %718 }
 0x15b   : > { %v3942_v9 = vpop.permute.xlu1 %682  ;;  %v3944_v39 = vpop.permute.xlu0 %680 }
 0x160   : > { %736 = vrot.lane.b32.xlu2 %v3553_v15, %s3153_s17 }
 0x161   : > { %914 = vrot.lane.b32.xlu1 %v3578_v27, %s3154_s18  ;;  %854 = vrot.lane.b32.xlu0 %v3424_v59, %s3155_s19  ;;  %v957_v59 = vsel %vm956_vm3, %v3290_v7, %v3632_v40 }
 0x162   : > { %v899_v50 = vpop.permute.xlu2 %898 }
 0x163   : > { %v3952_v37 = vpop.permute.xlu1 %688  ;;  %v3954_v6 = vpop.permute.xlu0 %686 }
 0x164   : > { %5244 = vst [vmem:[#allocation60_spill] sm:$0xff] %v3952_v37  ;;  %v978_v37 = vsel %vm977_vm4, %v957_v59, %v3664_v62 }
 0x165   : > { %5245 = vst [vmem:[#allocation61_spill] sm:$0xff] %v3954_v6  ;;  %v999_v6 = vsel %vm998_vm5, %v978_v37, %v3799_v14 }
 0x168   : > { %916 = vrot.lane.b32.xlu2 %v3575_v41, %s3154_s18 }
 0x169   : > { %856 = vrot.lane.b32.xlu1 %v3421_v58, %s3155_s19  ;;  %796 = vrot.lane.b32.xlu0 %v3395_v48, %s3152_s16  ;;  %v1020_v58 = vsel %vm1019_vm6, %v999_v6, %v657_v54 }
 0x16a   : > { %v841_v15 = vpop.permute.xlu2 %840 }
 0x16b   : > { %v717_v45 = vpop.permute.xlu1 %716  ;;  %v3962_v60 = vpop.permute.xlu0 %692 }
 0x16c   : > { %v1041_v48 = vsel %vm1040_vm7, %v1020_v58, %v717_v45 }
 0x16d   : > { %v1062_v40 = vsel %vm1061_vm8, %v1041_v48, %v777_v36 }
 0x170   : > { %858 = vrot.lane.b32.xlu2 %v3458_v18, %s3155_s19 }
 0x171   : > { %798 = vrot.lane.b32.xlu1 %v3398_v49, %s3152_s16  ;;  %738 = vrot.lane.b32.xlu0 %v3578_v27, %s3153_s17  ;;  %v958_v49 = vsel %vm956_vm3, %v3293_v8, %v3644_v4 }
 0x172   : > { %v783_v7 = vpop.permute.xlu2 %782  ;;  %v979_v18 = vsel %vm977_vm4, %v958_v49, %v3722_v16 }
 0x173   : > { %v897_v62 = vpop.permute.xlu1 %896  ;;  %v837_v14 = vpop.permute.xlu0 %836  ;;  %v1000_v27 = vsel %vm998_vm5, %v979_v18, %v3754_v19 }
 0x174   : > { %v1083_v54 = vsel %vm1082_vm9, %v1062_v40, %v837_v14  ;;  %v1021_v36 = vsel %vm1019_vm6, %v1000_v27, %v3883_v25 }
 0x175   : > { %v1104_v37 = vsel %vm1103_vm10, %v1083_v54, %v897_v62  ;;  %v1042_v8 = vsel %vm1040_vm7, %v1021_v36, %v719_v52  ;;  %v5246_v62 = vld [vmem:[#allocation18_spill] sm:$0xff]  ;;  %v5248_v54 = vld [vmem:[#allocation24_spill] sm:$0xff] }
 0x176   : > { %2610 = vmatmul.msk.f32.vlgmr.msra.gmra.mxu0 %vm1133_vm11, %v1104_v37 }
 0x178   : > { %800 = vrot.lane.b32.xlu2 %v3436_v63, %s3152_s16 }
 0x179   : > { %740 = vrot.lane.b32.xlu1 %v3575_v41, %s3153_s17  ;;  %918 = vrot.lane.b32.xlu0 %v3572_v33, %s3154_s18  ;;  %v959_v41 = vsel %vm956_vm3, %v3281_v2, %v3630_v3 }
 0x17a   : > { %v725_v6 = vpop.permute.xlu2 %724  ;;  %v980_v25 = vsel %vm977_vm4, %v959_v41, %v3720_v22 }
 0x17b   : > { %v839_v4 = vpop.permute.xlu1 %838  ;;  %v779_v16 = vpop.permute.xlu0 %778 }
 0x17c   : > { %v1063_v45 = vsel %vm1061_vm8, %v1042_v8, %v779_v16  ;;  %v5251_v16 = vld [vmem:[#allocation37_spill] sm:$0xff] }
 0x17d   : > { %v1084_v63 = vsel %vm1082_vm9, %v1063_v45, %v839_v4  ;;  %v5250_v4 = vld [vmem:[#allocation11_spill] sm:$0xff] }
 0x17e   : > { %v1105_v19 = vsel %vm1103_vm10, %v1084_v63, %v899_v50  ;;  %v1001_v50 = vsel %vm998_vm5, %v980_v25, %v3813_v13  ;;  %v5253_v63 = vld [vmem:[#allocation12_spill] sm:$0xff] }
 0x17f   : > { %2611 = vmatmul.msk.f32.gmra.mxu0 %vm1133_vm11, %v1105_v19 }
 0x180   : > { %742 = vrot.lane.b32.xlu2 %v3572_v33, %s3153_s17  ;;  %v1022_v33 = vsel %vm1019_vm6, %v1001_v50, %v3845_v55  ;;  %v5247_v55 = vld [vmem:[#allocation8_spill] sm:$0xff] }
 0x181   : > { %920 = vrot.lane.b32.xlu1 %v3600_v12, %s3154_s18  ;;  %860 = vrot.lane.b32.xlu0 %v3455_v17, %s3155_s19  ;;  %v960_v40 = vsel %vm956_vm3, %v5247_v55, %v5246_v62 }
 0x182   : > { %v905_v52 = vpop.permute.xlu2 %904  ;;  %v981_v37 = vsel %vm977_vm4, %v960_v40, %v5248_v54  ;;  %v314_v54 = vld [vmem:[%s3272_s30 + $0x100] sm:$0x3] }
 0x183   : > { %v781_v59 = vpop.permute.xlu1 %780  ;;  %v721_v58 = vpop.permute.xlu0 %720 }
 0x184   : > { %v1043_v2 = vsel %vm1040_vm7, %v1022_v33, %v721_v58  ;;  %v5256_v33 = vld [vmem:[#allocation27_spill] sm:$0xff] }
 0x185   : > { %v1064_v3 = vsel %vm1061_vm8, %v1043_v2, %v781_v59  ;;  %v458_v2 = vrot.slane %v5256_v33, 2 }
 0x186   : > { %v1085_v48 = vsel %vm1082_vm9, %v1064_v3, %v841_v15  ;;  %v5249_v15 = vld [vmem:[#allocation10_spill] sm:$0xff]  ;;  %v5257_v3 = vld [vmem:[#allocation36_spill] sm:$0xff] }
 0x188   : > { %922 = vrot.lane.b32.xlu2 %v3597_v10, %s3154_s18 }
 0x189   : > { %862 = vrot.lane.b32.xlu1 %v3452_v11, %s3155_s19  ;;  %802 = vrot.lane.b32.xlu0 %v3430_v61, %s3152_s16  ;;  %v1002_v11 = vsel %vm998_vm5, %v981_v37, %v3811_v32 }
 0x18a   : > { %v847_v17 = vpop.permute.xlu2 %846  ;;  %v1023_v61 = vsel %vm1019_vm6, %v1002_v11, %v3895_v34 }
 0x18b   : > { %v723_v22 = vpop.permute.xlu1 %722  ;;  %v901_v13 = vpop.permute.xlu0 %900 }
 0x18c   : > { %v1106_v14 = vsel %vm1103_vm10, %v1085_v48, %v901_v13  ;;  %v1044_v49 = vsel %vm1040_vm7, %v1023_v61, %v723_v22  ;;  %v459_v13 = vrot.slane %v3683_v5, 2  ;;  %v456_v61 = vrot.slane %v314_v54, 1 }
 0x18d   : > { %2612 = vmatmul.msk.f32.gmra.mxu0 %vm1133_vm11, %v1106_v14  ;;  %v1065_v36 = vsel %vm1061_vm8, %v1044_v49, %v783_v7  ;;  %v5258_v49 = vld [vmem:[#allocation21_spill] sm:$0xff] }
 0x190   : > { %864 = vrot.lane.b32.xlu2 %v3485_v43, %s3155_s19  ;;  %v961_v43 = vsel %vm956_vm3, %v3275_v0, %v5250_v4 }
 0x191   : > { %804 = vrot.lane.b32.xlu1 %v5249_v15, %s3152_s16  ;;  %744 = vrot.lane.b32.xlu0 %v3600_v12, %s3153_s17  ;;  %v982_v45 = vsel %vm977_vm4, %v961_v43, %v5251_v16  ;;  %v5252_v12 = vld [vmem:[#allocation9_spill] sm:$0xff]  ;;  %v963_v15 = vsel %vm956_vm3, %v3342_v28, %v5258_v49 }
 0x192   : > { %v789_v18 = vpop.permute.xlu2 %788  ;;  %v1003_v7 = vsel %vm998_vm5, %v982_v45, %v3766_v23 }
 0x193   : > { %v903_v27 = vpop.permute.xlu1 %902  ;;  %v843_v8 = vpop.permute.xlu0 %842  ;;  %v1024_v19 = vsel %vm1019_vm6, %v1003_v7, %v3893_v53 }
 0x194   : > { %v1086_v32 = vsel %vm1082_vm9, %v1065_v36, %v843_v8  ;;  %v1045_v0 = vsel %vm1040_vm7, %v1024_v19, %v725_v6  ;;  %v5255_v6 = vld [vmem:[#allocation14_spill] sm:$0xff]  ;;  %v5259_v36 = vld [vmem:[#allocation28_spill] sm:$0xff] }
 0x195   : > { %v1107_v34 = vsel %vm1103_vm10, %v1086_v32, %v903_v27  ;;  %v984_v8 = vsel %vm977_vm4, %v963_v15, %v5259_v36  ;;  %v316_v19 = vld [vmem:[%s3272_s30 + $0x110] sm:$0xff]  ;;  %v5266_v36 = vld [vmem:[#allocation23_spill] sm:$0xff] }
 0x196   : > { %2613 = vmatmul.msk.f32.gmra.mxu0 %vm1133_vm11, %v1107_v34 }
 0x198   : > { %806 = vrot.lane.b32.xlu2 %v5252_v12, %s3152_s16 }
 0x199   : > { %746 = vrot.lane.b32.xlu1 %v3597_v10, %s3153_s17  ;;  %924 = vrot.lane.b32.xlu0 %v5253_v63, %s3154_s18  ;;  %v5254_v10 = vld [vmem:[#allocation13_spill] sm:$0xff] }
 0x19a   : > { %v4064_v41 = vpop.permute.xlu2 %730  ;;  %v962_v53 = vsel %vm956_vm3, %v3278_v1, %v5254_v10 }
 0x19b   : > { %v845_v25 = vpop.permute.xlu1 %844  ;;  %v785_v50 = vpop.permute.xlu0 %784 }
 0x19c   : > { %v1066_v59 = vsel %vm1061_vm8, %v1045_v0, %v785_v50  ;;  %v317_v0 = vld [vmem:[%s3272_s30 + $0x118] sm:$0x3] }
 0x19d   : > { %v1087_v58 = vsel %vm1082_vm9, %v1066_v59, %v845_v25  ;;  %v5262_v25 = vld [vmem:[#allocation40_spill] sm:$0xff]  ;;  %v474_v59 = vrot.slane %v317_v0, 2 }
 0x19e   : > { %v1108_v23 = vsel %vm1103_vm10, %v1087_v58, %v905_v52  ;;  %v983_v52 = vsel %vm977_vm4, %v962_v53, %v5257_v3 }
 0x19f   : > { %2614 = vmatmul.msk.f32.gmra.mxu0 %vm1133_vm11, %v1108_v23  ;;  %v1004_v48 = vsel %vm998_vm5, %v983_v52, %v3825_v20  ;;  %v469_v23 = vrot.slane %v317_v0, 1 }
 0x1a0   : > { %748 = vrot.lane.b32.xlu2 %v5253_v63, %s3153_s17  ;;  %v1025_v1 = vsel %vm1019_vm6, %v1004_v48, %v3857_v29  ;;  %v5261_v63 = vld [vmem:[#allocation20_spill] sm:$0xff] }
 0x1a1   : > { %926 = vrot.lane.b32.xlu1 %v5255_v6, %s3154_s18  ;;  %866 = vrot.lane.b32.xlu0 %v3482_v42, %s3155_s19  ;;  %v4090_v42 = vsel %vm5185_vm1, %v458_v2, %v459_v13 }
 0x1a2   : > { %v911_v22 = vpop.permute.xlu2 %910 }
 0x1a3   : > { %v787_v62 = vpop.permute.xlu1 %786  ;;  %v727_v55 = vpop.permute.xlu0 %726 }
 0x1a4   : > { %v1046_v40 = vsel %vm1040_vm7, %v1025_v1, %v727_v55  ;;  %v5265_v1 = vld [vmem:[#allocation39_spill] sm:$0xff] }
 0x1a5   : > { %v1067_v14 = vsel %vm1061_vm8, %v1046_v40, %v787_v62 }
 0x1a6   : > { %v1088_v11 = vsel %vm1082_vm9, %v1067_v14, %v847_v17  ;;  %v5260_v17 = vrot.slane %v3683_v5, 1 }
 0x1a8   : > { %928 = vrot.lane.b32.xlu2 %v4090_v42, %s3154_s18  ;;  %v457_v34 = vsel %vm348_vm0, %v5260_v17, %v456_v61 }
 0x1a9   : > { %868 = vrot.lane.b32.xlu1 %v3777_v51, %s3155_s19  ;;  %808 = vrot.lane.b32.xlu0 %v5256_v33, %s3152_s16  ;;  %v1005_v51 = vsel %vm998_vm5, %v984_v8, %v3823_v21  ;;  %v461_v21 = vrot.slane %v314_v54, 2  ;;  %v472_v33 = vrot.slane %v316_v19, 2 }
 0x1aa   : > { %v4100_v20 = vpop.permute.xlu2 %852  ;;  %v1026_v32 = vsel %vm1019_vm6, %v1005_v51, %v3907_v46 }
 0x1ab   : > { %v729_v29 = vpop.permute.xlu1 %728  ;;  %v907_v37 = vpop.permute.xlu0 %906  ;;  %v462_v7 = vsel %vm5185_vm1, %v459_v13, %v461_v21  ;;  %v475_v3 = vsel %vm5185_vm1, %v472_v33, %v474_v59 }
 0x1ac   : > { %v1109_v27 = vsel %vm1103_vm10, %v1088_v11, %v907_v37  ;;  %v1047_v28 = vsel %vm1040_vm7, %v1026_v32, %v729_v29  ;;  %v5267_v32 = vld [vmem:[#allocation31_spill] sm:$0xff] }
 0x1ad   : > { %2615 = vmatmul.msk.f32.gmra.mxu0 %vm1133_vm11, %v1109_v27  ;;  %v1068_v46 = vsel %vm1061_vm8, %v1047_v28, %v789_v18  ;;  %v3008_v27 = vld [vmem:[%s3272_s30 + $0x68] sm:$0xff] }
 0x1ae   : > { %v966_v8 = vsel %vm956_vm3, %v3008_v27, %v5266_v36 }
 0x1af   : > { %v987_v17 = vsel %vm977_vm4, %v966_v8, %v5267_v32  ;;  %v3012_v8 = vld [vmem:[%s3272_s30 + $0x98] sm:$0xff] }
 0x1b0   : > { %870 = vrot.lane.b32.xlu2 %v457_v34, %s3155_s19 }
 0x1b1   : > { %810 = vrot.lane.b32.xlu1 %v3683_v5, %s3152_s16  ;;  %750 = vrot.lane.b32.xlu0 %v5255_v6, %s3153_s17  ;;  %v964_v5 = vsel %vm956_vm3, %v3336_v26, %v5261_v63  ;;  %v467_v26 = vrot.slane %v316_v19, 1  ;;  %v5269_v63 = vld [vmem:[#allocation42_spill] sm:$0xff] }
 0x1b2   : > { %v4124_v16 = vpop.permute.xlu2 %794  ;;  %v985_v18 = vsel %vm977_vm4, %v964_v5, %v5262_v25 }
 0x1b3   : > { %v909_v4 = vpop.permute.xlu1 %908  ;;  %v849_v43 = vpop.permute.xlu0 %848  ;;  %v1006_v50 = vsel %vm998_vm5, %v985_v18, %v3785_v38  ;;  %v470_v48 = vsel %vm348_vm0, %v467_v26, %v469_v23 }
 0x1b4   : > { %v1089_v45 = vsel %vm1082_vm9, %v1068_v46, %v849_v43  ;;  %v1027_v58 = vsel %vm1019_vm6, %v1006_v50, %v3905_v57  ;;  %v315_v57 = vld [vmem:[%s3272_s30 + $0x108] sm:$0xff] }
 0x1b5   : > { %v1110_v12 = vsel %vm1103_vm10, %v1089_v45, %v909_v4  ;;  %v1048_v10 = vsel %vm1040_vm7, %v1027_v58, %v4064_v41  ;;  %v5264_v41 = vld [vmem:[#allocation15_spill] sm:$0xff]  ;;  %v466_v55 = vrot.slane %v315_v57, 1 }
 0x1b6   : > { %2616 = vmatmul.msk.f32.gmra.mxu0 %vm1133_vm11, %v1110_v12  ;;  %v965_v62 = vsel %vm956_vm3, %v3330_v24, %v5264_v41  ;;  %v3009_v12 = vld [vmem:[%s3272_s30 + $0x78] sm:$0xff] }
 0x1b7   : > { %v986_v40 = vsel %vm977_vm4, %v965_v62, %v5265_v1  ;;  %v468_v24 = vsel %vm348_vm0, %v466_v55, %v467_v26 }
 0x1b8   : > { %754 = vrot.lane.b32.xlu2 %v462_v7, %s3153_s17 }
 0x1b9   : > { %694 = vrot.lane.b32.xlu1 %v457_v34, %s5263_s9  ;;  %930 = vrot.lane.b32.xlu0 %v462_v7, %s3154_s18  ;;  %v5268_v7 = vld [vmem:[#allocation22_spill] sm:$0xff] }
 0x1ba   : > { %v737_v52 = vpop.permute.xlu2 %736 }
 0x1bb   : > { %v851_v53 = vpop.permute.xlu1 %850  ;;  %v791_v6 = vpop.permute.xlu0 %790 }
 0x1bc   : > { %v1069_v2 = vsel %vm1061_vm8, %v1048_v10, %v791_v6  ;;  %v3010_v10 = vld [vmem:[%s3272_s30 + $0x80] sm:$0xff] }
 0x1bd   : > { %v1090_v38 = vsel %vm1082_vm9, %v1069_v2, %v851_v53  ;;  %v5271_v53 = vld [vmem:[#allocation16_spill] sm:$0xff]  ;;  %v5273_v2 = vld [vmem:[#allocation53_spill] sm:$0xff] }
 0x1be   : > { %v1111_v13 = vsel %vm1103_vm10, %v1090_v38, %v911_v22  ;;  %v1007_v22 = vsel %vm998_vm5, %v986_v40, %v3837_v31  ;;  %v471_v31 = vrot.slane %v315_v57, 2  ;;  %v968_v6 = vsel %vm956_vm3, %v3010_v10, %v5271_v53  ;;  %v4265_v10 = vld [vmem:[%s5166_s2] ss:$0 sm:$0xff] }
 0x1bf   : > { %2617 = vmatmul.msk.f32.gmra.mxu0 %vm1133_vm11, %v1111_v13  ;;  %v1028_v29 = vsel %vm1019_vm6, %v1007_v22, %v3869_v30  ;;  %v3011_v22 = vld [vmem:[%s3272_s30 + $0x90] sm:$0xff] }
 0x1c0   : > { %934 = vrot.lane.b32.xlu2 %v475_v3, %s3154_s18  ;;  %v473_v34 = vsel %vm5185_vm1, %v471_v31, %v472_v33  ;;  %v5272_v33 = vld [vmem:[#allocation41_spill] sm:$0xff] }
 0x1c1   : > { %814 = vrot.lane.b32.xlu0 %v316_v19, %s3152_s16  ;;  %874 = vrot.lane.b32.xlu1 %v470_v48, %s3155_s19  ;;  %v5270_v19 = vld [vmem:[#allocation47_spill] sm:$0xff] }
 0x1c2   : > { %v917_v11 = vpop.permute.xlu2 %916 }
 0x1c3   : > { %v793_v14 = vpop.permute.xlu1 %792  ;;  %v733_v54 = vpop.permute.xlu0 %732 }
 0x1c4   : > { %v1049_v37 = vsel %vm1040_vm7, %v1028_v29, %v733_v54  ;;  %v5275_v29 = vld [vmem:[#allocation34_spill] sm:$0xff] }
 0x1c5   : > { %v1070_v61 = vsel %vm1061_vm8, %v1049_v37, %v793_v14  ;;  %v5274_v14 = vld [vmem:[#allocation26_spill] sm:$0xff]  ;;  %v5276_v37 = vld [vmem:[#allocation52_spill] sm:$0xff] }
 0x1c6   : > { %v1091_v30 = vsel %vm1082_vm9, %v1070_v61, %v4100_v20  ;;  %v969_v54 = vsel %vm956_vm3, %v3011_v22, %v5274_v14 }
 0x1c8   : > { %872 = vrot.lane.b32.xlu2 %v468_v24, %s3155_s19  ;;  %s3157_s19 = smov 64  }
 0x1c9   : > { %752 = vrot.lane.b32.xlu0 %v4090_v42, %s3153_s17  ;;  %812 = vrot.lane.b32.xlu1 %v315_v57, %s3152_s16  ;;  %v1008_v42 = vsel %vm998_vm5, %v987_v17, %v3835_v56  ;;  %v5278_v17 = vld [vmem:[#allocation44_spill] sm:$0xff]  ;;  %s2607_s16 = sshll.u32 %s3130_s24, 3  ;;  %s2669_s17 = sshll.u32 %s3134_s25, 5 }
 0x1ca   : > { %v1029_v20 = vsel %vm1019_vm6, %v1008_v42, %v3931_v35  ;;  %v859_v21 = vpop.permute.xlu2 %858  ;;  %v967_v35 = vsel %vm956_vm3, %v3009_v12, %v5268_v7  ;;  %v4250_v7 = vstv %s2607_s16  ;;  %s2676_s16 = sshll.u32 %s3130_s24, 4 }
 0x1cb   : > { %v735_v49 = vpop.permute.xlu1 %734  ;;  %v913_v15 = vpop.permute.xlu0 %912  ;;  %v988_v5 = vsel %vm977_vm4, %v967_v35, %v5269_v63  ;;  %v3013_v35 = vld [vmem:[%s3272_s30 + $0xa8] sm:$0xff]  ;;  %vm1314_vm14 = vcmp.ge.s32.totalorder %v4250_v7, 0  ;;  %vm1324_vm15 = vcmp.lt.s32.totalorder %v4250_v7, 16 }
 0x1cc   : > { %v1112_v51 = vsel %vm1103_vm10, %v1091_v30, %v913_v15  ;;  %v1050_v28 = vsel %vm1040_vm7, %v1029_v20, %v735_v49  ;;  %v1009_v0 = vsel %vm998_vm5, %v988_v5, %v5270_v19  ;;  %v5280_v63 = vld [vmem:[#allocation17_spill] sm:$0xff]  ;;  %v5281_v19 = vld [vmem:[#allocation43_spill] sm:$0xff]  ;;  %vm1334_vm1 = vmand %vm1314_vm14, %vm1324_vm15  ;;  %vm5294_vm14 = vcmask 1045504  }
 0x1cd   : > { %2618 = vmatmul.msk.f32.gmra.mxu0 %vm1133_vm11, %v1112_v51  ;;  %v1071_v46 = vsel %vm1061_vm8, %v1050_v28, %v4124_v16  ;;  %v1030_v16 = vsel %vm1019_vm6, %v1009_v0, %v3929_v44  ;;  %v989_v44 = vsel %vm977_vm4, %v968_v6, %v5272_v33  ;;  %v5277_v51 = vld [vmem:[#allocation25_spill] sm:$0xff]  ;;  %v971_v5 = vsel %vm956_vm3, %v3013_v35, %v5280_v63  ;;  %v3015_v35 = vld [vmem:[%s3272_s30 + $0xc0] sm:$0xff]  ;;  %vm5299_vm15 = vmmov %vm5294_vm14 }
 0x1ce   : > { %v1051_v25 = vsel %vm1040_vm7, %v1030_v16, %v737_v52  ;;  %v1010_v38 = vsel %vm998_vm5, %v989_v44, %v5273_v2  ;;  %v970_v32 = vsel %vm956_vm3, %v3012_v8, %v5277_v51  ;;  %v992_v0 = vsel %vm977_vm4, %v971_v5, %v5281_v19  ;;  %v5290_v63 = vld [vmem:[#allocation29_spill] sm:$0xff]  ;;  %v5291_v19 = vld [vmem:[#allocation46_spill] sm:$0xff] }
 0x1cf   : > { %v1031_v13 = vsel %vm1019_vm6, %v1010_v38, %v3881_v47  ;;  %v990_v47 = vsel %vm977_vm4, %v969_v54, %v5275_v29  ;;  %v991_v42 = vsel %vm977_vm4, %v970_v32, %v5278_v17  ;;  %v973_v5 = vsel %vm956_vm3, %v3015_v35, %v5290_v63 }
 0x1d0   : > { %v1011_v24 = vsel %vm998_vm5, %v990_v47, %v5276_v37  ;;  %v5288_v47 = vld [vmem:[#allocation54_spill] sm:$0xff] }
 0x1d1   : > { %932 = vrot.lane.b32.xlu0 %v473_v34, %s3154_s18  ;;  %v5279_v34 = vld [vmem:[#allocation49_spill] sm:$0xff] }
 0x1d2   : > { %v801_v59 = vpop.permute.xlu2 %800  ;;  %v1012_v20 = vsel %vm998_vm5, %v991_v42, %v5279_v34 }
 0x1d3   : > { %v915_v4 = vpop.permute.xlu1 %914  ;;  %v855_v43 = vpop.permute.xlu0 %854 }
 0x1d4   : > { %v1092_v45 = vsel %vm1082_vm9, %v1071_v46, %v855_v43 }
 0x1d5   : > { %v1113_v56 = vsel %vm1103_vm10, %v1092_v45, %v915_v4 }
 0x1d6   : > { %2619 = vmatmul.msk.f32.gmra.mxu0 %vm1133_vm11, %v1113_v56 }
 0x1da   : > { %v743_v57 = vpop.permute.xlu2 %742 }
 0x1db   : > { %v857_v18 = vpop.permute.xlu1 %856  ;;  %v797_v50 = vpop.permute.xlu0 %796 }
 0x1dc   : > { %v1072_v58 = vsel %vm1061_vm8, %v1051_v25, %v797_v50  ;;  %v5282_v25 = vld [vmem:[#allocation55_spill] sm:$0xff] }
 0x1dd   : > { %v1093_v26 = vsel %vm1082_vm9, %v1072_v58, %v857_v18  ;;  %v1013_v18 = vsel %vm998_vm5, %v992_v0, %v5282_v25  ;;  %v994_v0 = vsel %vm977_vm4, %v973_v5, %v5291_v19 }
 0x1de   : > { %v1114_v23 = vsel %vm1103_vm10, %v1093_v26, %v917_v11  ;;  %v1032_v11 = vsel %vm1019_vm6, %v1011_v24, %v3944_v39  ;;  %v5283_v26 = vld [vmem:[#allocation58_spill] sm:$0xff]  ;;  %v3156_v24 = vmov 0.0  }
 0x1df   : > { %2620 = vmatmul.msk.f32.gmra.mxu0 %vm1133_vm11, %v1114_v23  ;;  %v1034_v23 = vsel %vm1019_vm6, %v1013_v18, %v5283_v26 }
 0x1e2   : > { %v923_v61 = vpop.permute.xlu2 %922 }
 0x1e3   : > { %v799_v3 = vpop.permute.xlu1 %798  ;;  %v739_v52 = vpop.permute.xlu0 %738 }
 0x1e4   : > { %v1052_v48 = vsel %vm1040_vm7, %v1031_v13, %v739_v52 }
 0x1e5   : > { %v1073_v41 = vsel %vm1061_vm8, %v1052_v48, %v799_v3 }
 0x1e6   : > { %v1094_v1 = vsel %vm1082_vm9, %v1073_v41, %v859_v21  ;;  %v1033_v21 = vsel %vm1019_vm6, %v1012_v20, %v3942_v9  ;;  %v3014_v41 = vld [vmem:[%s3272_s30 + $0xb0] sm:$0xff] }
 0x1e7   : > { %v1054_v46 = vsel %vm1040_vm7, %v1033_v21, %v743_v57 }
 0x1ea   : > { %v865_v28 = vpop.permute.xlu2 %864 }
 0x1eb   : > { %v741_v62 = vpop.permute.xlu1 %740  ;;  %v919_v55 = vpop.permute.xlu0 %918 }
 0x1ec   : > { %v1115_v40 = vsel %vm1103_vm10, %v1094_v1, %v919_v55  ;;  %v1053_v31 = vsel %vm1040_vm7, %v1032_v11, %v741_v62  ;;  %v5286_v62 = vld [vmem:[#allocation30_spill] sm:$0xff] }
 0x1ed   : > { %2621 = vmatmul.msk.f32.gmra.mxu0 %vm1133_vm11, %v1115_v40  ;;  %v1074_v15 = vsel %vm1061_vm8, %v1053_v31, %v801_v59  ;;  %v2630_v59 = vadd.s32 4294967295, %v4250_v7  ;;  %v972_v55 = vsel %vm956_vm3, %v3014_v41, %v5286_v62  ;;  %v5287_v40 = vld [vmem:[#allocation35_spill] sm:$0xff]  ;;  %v5289_v31 = vld [vmem:[#allocation61_spill] sm:$0xff] }
 0x1ee   : > { %v993_v22 = vsel %vm977_vm4, %v972_v55, %v5287_v40 }
 0x1ef   : > { %vm1313_vm12 = vcmp.ge.s32.totalorder %v2630_v59, 0  ;;  %vm1323_vm13 = vcmp.lt.s32.totalorder %v2630_v59, 16  ;;  %v1014_v37 = vsel %vm998_vm5, %v993_v22, %v5288_v47 }
 0x1f0   : > { %vm4273_vm2 = vmand %vm1313_vm12, %vm1323_vm13 }
 0x1f1   : > { %v2639_v11 = vsel %vm4273_vm2, 1.0, %v3156_v24 }
 0x1f2   : > { %v807_v50 = vpop.permute.xlu2 %806 }
 0x1f3   : > { %v921_v49 = vpop.permute.xlu1 %920  ;;  %v861_v30 = vpop.permute.xlu0 %860 }
 0x1f4   : > { %v1095_v27 = vsel %vm1082_vm9, %v1074_v15, %v861_v30  ;;  %v1215_v39 = vpop.f32.mrf.mxu0 }
 0x1f5   : > { %v1116_v36 = vsel %vm1103_vm10, %v1095_v27, %v921_v49  ;;  %v1216_v44 = vadd.f32 %v4265_v10, %v1215_v39  ;;  %v1035_v49 = vsel %vm1019_vm6, %v1014_v37, %v5289_v31  ;;  %v1296_v27 = vadd.s32 2, %v4250_v7  ;;  %v3016_v31 = vld [vmem:[%s3272_s30 + $0xc8] sm:$0xff] }
 0x1f6   : > { %2622 = vmatmul.msk.f32.gmra.mxu0 %vm1133_vm11, %v1116_v36 }
 0x1f7   : > { %v1275_v14 = vmax.f32 %v1216_v44, 0.0 }
 0x1f9   : > { %v1363_v36 = vmul.f32 %v2639_v11, %v1275_v14  ;;  %v2036_v14 = vld [vmem:[%s5167_s3 + $0x100] sm:$0xff] }
 0x1fa   : > { %v749_v54 = vpop.permute.xlu2 %748 }
 0x1fb   : > { %v863_v4 = vpop.permute.xlu1 %862  ;;  %v803_v43 = vpop.permute.xlu0 %802  ;;  %v1404_v21 = vrot.slane %v1363_v36, 7  ;;  %v5296_v36 = vld [vmem:[#allocation45_spill] sm:$0xff] }
 0x1fc   : > { %v1075_v45 = vsel %vm1061_vm8, %v1054_v46, %v803_v43  ;;  %v1218_v9 = vpop.f32.mrf.mxu0 }
 0x1fd   : > { %v1096_v56 = vsel %vm1082_vm9, %v1075_v45, %v863_v4  ;;  %v1219_v6 = vadd.f32 %v4265_v10, %v1218_v9  ;;  %v2039_v9 = vld [vmem:[%s5167_s3 + $0x118] sm:$0xff] }
 0x1fe   : > { %v1117_v12 = vsel %vm1103_vm10, %v1096_v56, %v923_v61  ;;  %v2640_v61 = vsel %vm1334_vm1, 1.0, %v3156_v24  ;;  %vm1403_vm1 = vcmask 1040384   ;;  %2218 = vmatpush.msrb.mxu3 %v2039_v9 }
 0x1ff   : > { %2623 = vmatmul.msk.f32.gmra.mxu0 %vm1133_vm11, %v1117_v12  ;;  %v1276_v13 = vmax.f32 %v1219_v6, 0.0 }
 0x201   : > { %v1364_v15 = vmul.f32 %v2639_v11, %v1276_v13 }
 0x202   : > { %v929_v45 = vpop.permute.xlu2 %928 }
 0x203   : > { %v805_v16 = vpop.permute.xlu1 %804  ;;  %v745_v58 = vpop.permute.xlu0 %744  ;;  %v1405_v39 = vrot.slane %v1364_v15, 7 }
 0x204   : > { %v1055_v53 = vsel %vm1040_vm7, %v1034_v23, %v745_v58  ;;  %v2038_v23 = vld [vmem:[%s5167_s3 + $0x110] sm:$0xff] }
 0x205   : > { %v1076_v33 = vsel %vm1061_vm8, %v1055_v53, %v805_v16  ;;  %v4302_v56 = vsel %vm1403_vm1, %v1404_v21, %v1405_v39  ;;  %v4313_v16 = vsel %vm1403_vm1, 0.0, %v1404_v21  ;;  %v5293_v53 = vld [vmem:[#allocation60_spill] sm:$0xff]  ;;  %2219 = vmatpush.msrb.mxu3 %v2038_v23 }
 0x206   : > { %v1097_v57 = vsel %vm1082_vm9, %v1076_v33, %v865_v28  ;;  %v2631_v28 = vadd.s32 4294967295, %v1296_v27  ;;  %v1499_v58 = vrot.slane %v4302_v56, 1  ;;  %v1498_v38 = vrot.slane %v4313_v16, 1 }
 0x208   : > { %vm1315_vm2 = vcmp.ge.s32.totalorder %v2631_v28, 0  ;;  %vm1325_vm12 = vcmp.lt.s32.totalorder %v2631_v28, 16  ;;  %v1500_v40 = vsel %vm348_vm0, %v1498_v38, %v1499_v58  ;;  %v5298_v28 = vld [vmem:[#allocation59_spill] sm:$0xff] }
 0x209   : > { %vm1335_vm13 = vmand %vm1315_vm2, %vm1325_vm12 }
 0x20a   : > { %v1221_v2 = vpop.f32.mrf.mxu0  ;;  %v2641_v55 = vsel %vm1335_vm13, 1.0, %v3156_v24  ;;  %v871_v11 = vpop.permute.xlu2 %870  ;;  %vm5300_vm2 = vmmov %vm5294_vm14 }
 0x20b   : > { %v1222_v3 = vadd.f32 %v4265_v10, %v1221_v2  ;;  %v747_v52 = vpop.permute.xlu1 %746  ;;  %v925_v48 = vpop.permute.xlu0 %924 }
 0x20c   : > { %v1118_v1 = vsel %vm1103_vm10, %v1097_v57, %v925_v48  ;;  %v1056_v30 = vsel %vm1040_vm7, %v1035_v49, %v747_v52  ;;  %v2037_v48 = vld [vmem:[%s5167_s3 + $0x108] sm:$0xff]  ;;  %v5295_v49 = vld [vmem:[#allocation19_spill] sm:$0xff] }
 0x20d   : > { %v1277_v29 = vmax.f32 %v1222_v3, 0.0  ;;  %2624 = vmatmul.msk.f32.gmra.mxu0 %vm1133_vm11, %v1118_v1  ;;  %v1077_v42 = vsel %vm1061_vm8, %v1056_v30, %v807_v50  ;;  %v5292_v50 = vld [vmem:[#allocation50_spill] sm:$0xff]  ;;  %2220 = vmatpush.msrb.mxu3 %v2037_v48  ;;  %v974_v15 = vsel %vm956_vm3, %v3016_v31, %v5295_v49  ;;  %v1539_v30 = vrot.slane %v4302_v56, 2  ;;  %v5303_v48 = vld [vmem:[#allocation51_spill] sm:$0xff] }
 0x20e   : > { %v1015_v59 = vsel %vm998_vm5, %v994_v0, %v5292_v50 }
 0x20f   : > { %v1365_v8 = vmul.f32 %v2640_v61, %v1277_v29  ;;  %v1036_v6 = vsel %vm1019_vm6, %v1015_v59, %v5293_v53  ;;  %2221 = vmatpush.msrb.mxu3 %v2036_v14 }
 0x210   : > { %v1057_v3 = vsel %vm1040_vm7, %v1036_v6, %v749_v54  ;;  %v1472_v54 = vsel %vm1403_vm1, %v1405_v39, 0.0  ;;  %v5297_v39 = vld [vmem:[#allocation57_spill] sm:$0xff]  ;;  %v3017_v6 = vld [vmem:[%s3272_s30 + $0xe0] sm:$0xff] }
 0x211   : > { %v1407_v4 = vrot.slane %v1365_v8, 7  ;;  %v995_v8 = vsel %vm977_vm4, %v974_v15, %v5296_v36  ;;  %v1541_v38 = vrot.slane %v1472_v54, 2 }
 0x213   : > { %v927_v51 = vpop.permute.xlu1 %926  ;;  %v1224_v32 = vpop.f32.mrf.mxu0  ;;  %v4316_v25 = vsel %vm1403_vm1, 0.0, %v1407_v4 }
 0x214   : > { %v1225_v17 = vadd.f32 %v4265_v10, %v1224_v32  ;;  %v867_v34 = vpop.permute.xlu0 %866  ;;  %v1543_v52 = vrot.slane %v4316_v25, 2  ;;  %v1503_v14 = vrot.slane %v4316_v25, 1 }
 0x215   : > { %v1098_v20 = vsel %vm1082_vm9, %v1077_v42, %v867_v34  ;;  %v1538_v42 = vrot.slane %v4313_v16, 2 }
 0x216   : > { %v1278_v46 = vmax.f32 %v1225_v17, 0.0  ;;  %v1119_v43 = vsel %vm1103_vm10, %v1098_v20, %v927_v51  ;;  %v1501_v51 = vrot.slane %v1472_v54, 1  ;;  %v1016_v17 = vsel %vm998_vm5, %v995_v8, %v5297_v39 }
 0x217   : > { %2625 = vmatmul.msk.f32.gmra.mxu0 %vm1133_vm11, %v1119_v43  ;;  %v1037_v21 = vsel %vm1019_vm6, %v1016_v17, %v5298_v28 }
 0x218   : > { %v1366_v12 = vmul.f32 %v2640_v61, %v1278_v46  ;;  %v1297_v46 = vadd.s32 3, %v4250_v7  ;;  %v1502_v63 = vsel %vm348_vm0, %v1499_v58, %v1501_v51 }
 0x21a   : > { %v1408_v18 = vrot.slane %v1366_v12, 7  ;;  %v1540_v12 = vsel %vm5300_vm2, %v1538_v42, %v1539_v30  ;;  %v2632_v19 = vadd.s32 4294967295, %v1297_v46 }
 0x21b   : > { %v869_v26 = vpop.permute.xlu1 %868 }
 0x21c   : > { %v4327_v33 = vsel %vm1403_vm1, %v1407_v4, %v1408_v18  ;;  %v809_v44 = vpop.permute.xlu0 %808  ;;  %v1227_v2 = vpop.f32.mrf.mxu0  ;;  %v4339_v57 = vsel %vm1403_vm1, %v1408_v18, 0.0  ;;  %vm1316_vm12 = vcmp.ge.s32.totalorder %v2632_v19, 0  ;;  %vm1326_vm13 = vcmp.lt.s32.totalorder %v2632_v19, 16  ;;  %v5306_v19 = vld [vmem:[#allocation38_spill] sm:$0xff] }
 0x21d   : > { %v1544_v13 = vrot.slane %v4327_v33, 2  ;;  %v1078_v41 = vsel %vm1061_vm8, %v1057_v3, %v809_v44  ;;  %v1228_v62 = vadd.f32 %v4265_v10, %v1227_v2  ;;  %v1546_v61 = vrot.slane %v4339_v57, 2  ;;  %v755_v18 = vpop.permute.xlu2 %754  ;;  %v5301_v44 = vld [vmem:[#allocation32_spill] sm:$0xff] }
 0x21e   : > { %v1099_v1 = vsel %vm1082_vm9, %v1078_v41, %v869_v26  ;;  %v976_v2 = vsel %vm956_vm3, %v3017_v6, %v5301_v44  ;;  %v5302_v3 = vld [vmem:[#allocation48_spill] sm:$0xff] }
 0x21f   : > { %v4347_v22 = vsel %vm5294_vm14, %v1543_v52, %v1544_v13  ;;  %v1279_v29 = vmax.f32 %v1228_v62, 0.0  ;;  %v1120_v47 = vsel %vm1103_vm10, %v1099_v1, %v929_v45  ;;  %v4370_v4 = vsel %vm5299_vm15, %v1544_v13, %v1546_v61  ;;  %vm1336_vm14 = vmand %vm1316_vm12, %vm1326_vm13 }
 0x220   : > { %v2771_v37 = vpack.i.bf16 %v1500_v40, %v4347_v22  ;;  %2626 = vmatmul.msk.f32.gmra.mxu0 %vm1133_vm11, %v1120_v47  ;;  %v2786_v5 = vpack.i.bf16 %v1502_v63, %v4370_v4  ;;  %v997_v52 = vsel %vm977_vm4, %v976_v2, %v5302_v3  ;;  %vm5304_vm15 = vmmov %vm5300_vm2  ;;  %v1298_v3 = vadd.s32 4, %v4250_v7 }
 0x221   : > { %v1367_v27 = vmul.f32 %v2641_v55, %v1279_v29  ;;  %v1018_v41 = vsel %vm998_vm5, %v997_v52, %v5303_v48  ;;  %v1542_v40 = vsel %vm5304_vm15, %v1539_v30, %v1541_v38  ;;  %v1504_v29 = vrot.slane %v4327_v33, 1  ;;  %vm5311_vm13 = vmmov %vm5300_vm2 }
 0x222   : > { %2772 = vrot.lane.b32.xlu1 %v2771_v37, %s3154_s18  ;;  %v2642_v37 = vsel %vm1336_vm14, 1.0, %v3156_v24  ;;  %vm5312_vm14 = vmmov %vm5300_vm2 }
 0x223   : > { %v811_v32 = vpop.permute.xlu1 %810  ;;  %v1410_v34 = vrot.slane %v1367_v27, 7 }
 0x224   : > { %v751_v20 = vpop.permute.xlu0 %750 }
 0x225   : > { %v4374_v43 = vsel %vm1403_vm1, 0.0, %v1410_v34  ;;  %v1058_v45 = vsel %vm1040_vm7, %v1037_v21, %v751_v20  ;;  %v935_v15 = vpop.permute.xlu2 %934 }
 0x226   : > { %v2776_v35 = vpack.i.bf16 %v1540_v12, %v4374_v43  ;;  %v1079_v9 = vsel %vm1061_vm8, %v1058_v45, %v811_v32  ;;  %v1548_v27 = vrot.slane %v4374_v43, 2  ;;  %v3018_v12 = vld [vmem:[%s3272_s30 + $0xd8] sm:$0xff]  ;;  %s2460_s30 = sadd.s32 %s2676_s16, %s2669_s17  ;;  %s2672_s16 = sshll.u32 %s3134_s25, 3 }
 0x227   : > { %v1100_v26 = vsel %vm1082_vm9, %v1079_v9, %v871_v11  ;;  %v1508_v11 = vrot.slane %v4374_v43, 1  ;;  %s2670_s20 = sshll.u32 %s2460_s30, 3  ;;  %s2479_s30 = sadd.s32 %s2672_s16, %s2671_s0 }
 0x228   : > { %2777 = vrot.lane.b32.xlu2 %v2776_v35, %s3157_s19  ;;  %v5305_v35 = vld [vmem:[#allocation33_spill] sm:$0xff] }
 0x229   : > { %v975_v63 = vsel %vm956_vm3, %v3018_v12, %v5305_v35  ;;  %vm5308_vm3 = vmmov %vm5300_vm2 }
 0x22a   : > { %2787 = vrot.lane.b32.xlu1 %v2786_v5, %s3154_s18  ;;  %v1230_v0 = vpop.f32.mrf.mxu0 }
 0x22b   : > { %v1231_v50 = vadd.f32 %v4265_v10, %v1230_v0  ;;  %v695_v59 = vpop.permute.xlu1 %694  ;;  %v996_v0 = vsel %vm977_vm4, %v975_v63, %v5306_v19  ;;  %v1299_v63 = vadd.s32 5, %v4250_v7 }
 0x22c   : > { %v931_v23 = vpop.permute.xlu0 %930  ;;  %v1039_v1 = vsel %vm1019_vm6, %v1018_v41, %v695_v59 }
 0x22d   : > { %v1280_v58 = vmax.f32 %v1231_v50, 0.0  ;;  %v1121_v53 = vsel %vm1103_vm10, %v1100_v26, %v931_v23  ;;  %v1060_v61 = vsel %vm1040_vm7, %v1039_v1, %v755_v18  ;;  %v5307_v50 = vld [vmem:[#allocation56_spill] sm:$0xff]  ;;  %v1506_v26 = vrot.slane %v4339_v57, 1 }
 0x22e   : > { %2627 = vmatmul.msk.f32.gmra.mxu0 %vm1133_vm11, %v1121_v53  ;;  %v1017_v59 = vsel %vm998_vm5, %v996_v0, %v5307_v50 }
 0x22f   : > { %v1368_v13 = vmul.f32 %v2641_v55, %v1280_v58  ;;  %v1038_v23 = vsel %vm1019_vm6, %v1017_v59, %v3962_v60  ;;  %v4456_v48 = vsel %vm348_vm0, %v1504_v29, %v1506_v26  ;;  %vm5309_vm6 = vmmov %vm5300_vm2  ;;  %v2634_v26 = vadd.s32 4294967295, %v1299_v63 }
 0x231   : > { %v1411_v62 = vrot.slane %v1368_v13, 7 }
 0x233   : > { %v4400_v54 = vsel %vm1403_vm1, %v1410_v34, %v1411_v62  ;;  %v1233_v47 = vpop.f32.mrf.mxu0  ;;  %v875_v55 = vpop.permute.xlu1 %874  ;;  %v1474_v32 = vsel %vm1403_vm1, %v1411_v62, 0.0  ;;  %v4416_v34 = vsel %vm348_vm0, %v1503_v14, %v1504_v29 }
 0x234   : > { %v1234_v31 = vadd.f32 %v4265_v10, %v1233_v47  ;;  %v815_v49 = vpop.permute.xlu0 %814  ;;  %v2791_v30 = vpack.i.bf16 %v1542_v40, %v4400_v54  ;;  %v1549_v8 = vrot.slane %v4400_v54, 2  ;;  %v1509_v51 = vrot.slane %v4400_v54, 1  ;;  %v873_v14 = vpop.permute.xlu2 %872 }
 0x235   : > { %v1081_v36 = vsel %vm1061_vm8, %v1060_v61, %v815_v49  ;;  %v1511_v5 = vrot.slane %v1474_v32, 1  ;;  %v1551_v9 = vrot.slane %v1474_v32, 2 }
 0x236   : > { %v1281_v39 = vmax.f32 %v1234_v31, 0.0  ;;  %v1102_v17 = vsel %vm1082_vm9, %v1081_v36, %v875_v55  ;;  %2792 = vrot.lane.b32.xlu2 %v2791_v30, %s3157_s19  ;;  %v4419_v20 = vsel %vm5300_vm2, %v1548_v27, %v1549_v8  ;;  %v4422_v28 = vsel %vm348_vm0, %v1508_v11, %v1509_v51 }
 0x237   : > { %v1123_v42 = vsel %vm1103_vm10, %v1102_v17, %v935_v15  ;;  %v2801_v46 = vpack.i.bf16 %v4416_v34, %v4419_v20  ;;  %v2781_v45 = vpack.i.bf16 %v4316_v25, %v4422_v28  ;;  %v4446_v2 = vsel %vm5308_vm3, %v1549_v8, %v1551_v9 }
 0x238   : > { %v1369_v21 = vmul.f32 %v2642_v37, %v1281_v39  ;;  %2629 = vmatmul.msk.f32.vlgmr.msra.gmra.mxu3 %vm1133_vm11, %v1123_v42  ;;  %v4449_v38 = vsel %vm348_vm0, %v1509_v51, %v1511_v5  ;;  %v2816_v41 = vpack.i.bf16 %v4456_v48, %v4446_v2 }
 0x239   : > { %2802 = vrot.lane.b32.xlu1 %v2801_v46, %s3154_s18  ;;  %2782 = vrot.lane.b32.xlu0 %v2781_v45, %s3158_s13  ;;  %v2796_v62 = vpack.i.bf16 %v4327_v33, %v4449_v38 }
 0x23a   : > { %v1413_v18 = vrot.slane %v1369_v21, 7 }
 0x23b   : > { %v813_v52 = vpop.permute.xlu1 %812 }
 0x23c   : > { %v4442_v58 = vsel %vm1403_vm1, 0.0, %v1413_v18  ;;  %v753_v53 = vpop.permute.xlu0 %752  ;;  %v1236_v6 = vpop.f32.mrf.mxu0 }
 0x23d   : > { %v1237_v44 = vadd.f32 %v4265_v10, %v1236_v6  ;;  %v1059_v57 = vsel %vm1040_vm7, %v1038_v23, %v753_v53  ;;  %v2806_v60 = vpack.i.bf16 %v4347_v22, %v4442_v58  ;;  %v2633_v22 = vadd.s32 4294967295, %v1298_v3 }
 0x23e   : > { %v1080_v1 = vsel %vm1061_vm8, %v1059_v57, %v813_v52  ;;  %v1553_v31 = vrot.slane %v4442_v58, 2  ;;  %v1513_v15 = vrot.slane %v4442_v58, 1  ;;  %vm5310_vm8 = vmmov %vm5300_vm2 }
 0x23f   : > { %v1282_v13 = vmax.f32 %v1237_v44, 0.0  ;;  %2807 = vrot.lane.b32.xlu2 %v2806_v60, %s3157_s19  ;;  %v1101_v47 = vsel %vm1082_vm9, %v1080_v1, %v873_v14  ;;  %vm1317_vm4 = vcmp.ge.s32.totalorder %v2633_v22, 0  ;;  %vm1327_vm5 = vcmp.lt.s32.totalorder %v2633_v22, 16 }
 0x240   : > { %2649 = vmatmul.msk.f32.vlgmr.msrb.gmra.mxu3 %vm1103_vm10, %v4419_v20  ;;  %vm1337_vm7 = vmand %vm1317_vm4, %vm1327_vm5  ;;  %vm1318_vm9 = vcmp.ge.s32.totalorder %v2634_v26, 0 }
 0x241   : > { %v1370_v40 = vmul.f32 %v2642_v37, %v1282_v13  ;;  %2817 = vrot.lane.b32.xlu1 %v2816_v41, %s3154_s18  ;;  %2797 = vrot.lane.b32.xlu0 %v2796_v62, %s3158_s13  ;;  %v2643_v21 = vsel %vm1337_vm7, 1.0, %v3156_v24  ;;  %vm5313_vm4 = vmmov %vm5309_vm6 }
 0x242   : > { %vm5314_vm5 = vmmov %vm5313_vm4 }
 0x243   : > { %v1414_v29 = vrot.slane %v1370_v40, 7 }
 0x244   : > { %v933_v55 = vpop.permute.xlu0 %932 }
 0x245   : > { %v4470_v11 = vsel %vm1403_vm1, %v1413_v18, %v1414_v29  ;;  %v1122_v61 = vsel %vm1103_vm10, %v1101_v47, %v933_v55  ;;  %v1475_v30 = vsel %vm1403_vm1, %v1414_v29, 0.0 }
 0x246   : > { %2628 = vmatmul.msk.f32.gmra.mxu0 %vm1133_vm11, %v1122_v61  ;;  %v2821_v37 = vpack.i.bf16 %v4370_v4, %v4470_v11  ;;  %v1554_v49 = vrot.slane %v4470_v11, 2  ;;  %v1514_v27 = vrot.slane %v4470_v11, 1  ;;  %v1556_v51 = vrot.slane %v1475_v30, 2 }
 0x247   : > { %v1516_v17 = vrot.slane %v1475_v30, 1  ;;  %vm1328_vm11 = vcmp.lt.s32.totalorder %v2634_v26, 16  ;;  %v2018_v26 = vld [vmem:[%s5167_s3 + $0x70] sm:$0xff] }
 0x248   : > { %2650 = vmatmul.msk.f32.gmra.mxu3 %vm1103_vm10, %v4446_v2  ;;  %2822 = vrot.lane.b32.xlu2 %v2821_v37, %s3157_s19  ;;  %v4485_v36 = vsel %vm5309_vm6, %v1553_v31, %v1554_v49  ;;  %v4490_v8 = vsel %vm348_vm0, %v1513_v15, %v1514_v27  ;;  %v4499_v45 = vsel %vm5310_vm8, %v1554_v49, %v1556_v51  ;;  %vm1338_vm12 = vmand %vm1318_vm9, %vm1328_vm11 }
 0x249   : > { %v2831_v4 = vpack.i.bf16 %v4422_v28, %v4485_v36  ;;  %v2811_v39 = vpack.i.bf16 %v4374_v43, %v4490_v8  ;;  %v4502_v35 = vsel %vm348_vm0, %v1514_v27, %v1516_v17  ;;  %v2846_v9 = vpack.i.bf16 %v4449_v38, %v4499_v45  ;;  %vm5315_vm8 = vmmov %vm5313_vm4 }
 0x24a   : > { %v1239_v32 = vpop.f32.mrf.mxu0  ;;  %v2826_v19 = vpack.i.bf16 %v4400_v54, %v4502_v35  ;;  %v2644_v62 = vsel %vm1338_vm12, 1.0, %v3156_v24  ;;  %vm5316_vm11 = vmmov %vm5313_vm4 }
 0x24b   : > { %v1240_v42 = vadd.f32 %v4265_v10, %v1239_v32  ;;  %2832 = vrot.lane.b32.xlu1 %v2831_v4, %s3154_s18  ;;  %2812 = vrot.lane.b32.xlu0 %v2811_v39, %s3158_s13  ;;  %v1300_v4 = vadd.s32 6, %v4250_v7 }
 0x24d   : > { %v1283_v46 = vmax.f32 %v1240_v42, 0.0  ;;  %v2635_v39 = vadd.s32 4294967295, %v1300_v4  ;;  %v2030_v4 = vld [vmem:[%s5167_s3 + $0xd0] sm:$0xff] }
 0x24f   : > { %v1371_v12 = vmul.f32 %v2643_v21, %v1283_v46  ;;  %vm1319_vm15 = vcmp.ge.s32.totalorder %v2635_v39, 0  ;;  %vm1329_vm2 = vcmp.lt.s32.totalorder %v2635_v39, 16  ;;  %v2019_v46 = vld [vmem:[%s5167_s3 + $0x78] sm:$0xff] }
 0x250   : > { %2651 = vmatmul.msk.f32.gmra.mxu3 %vm1103_vm10, %v4485_v36  ;;  %vm1339_vm3 = vmand %vm1319_vm15, %vm1329_vm2  ;;  %2076 = vmatpush.msra.mxu1 %v2019_v46 }
 0x251   : > { %v1416_v5 = vrot.slane %v1371_v12, 7  ;;  %v2035_v12 = vld [vmem:[%s5167_s3 + $0xf8] sm:$0xff]  ;;  %vm5317_vm15 = vmmov %vm5313_vm4 }
 0x252   : > { %2141 = vmatpush.msra.mxu2 %v2035_v12  ;;  %2077 = vmatpush.msra.mxu1 %v2018_v26  ;;  %vm5318_vm2 = vmmov %vm5313_vm4 }
 0x253   : > { %v4512_v0 = vsel %vm1403_vm1, 0.0, %v1416_v5  ;;  %2847 = vrot.lane.b32.xlu1 %v2846_v9, %s3154_s18  ;;  %v1242_v18 = vpop.f32.mrf.mxu0  ;;  %2827 = vrot.lane.b32.xlu0 %v2826_v19, %s3158_s13 }
 0x254   : > { %v1243_v50 = vadd.f32 %v4265_v10, %v1242_v18  ;;  %v2836_v59 = vpack.i.bf16 %v4419_v20, %v4512_v0  ;;  %v1558_v52 = vrot.slane %v4512_v0, 2  ;;  %v1518_v13 = vrot.slane %v4512_v0, 1 }
 0x256   : > { %v1284_v23 = vmax.f32 %v1243_v50, 0.0  ;;  %2837 = vrot.lane.b32.xlu2 %v2836_v59, %s3157_s19 }
 0x258   : > { %v1372_v53 = vmul.f32 %v2643_v21, %v1284_v23  ;;  %2652 = vmatmul.msk.f32.gmra.mxu3 %vm1103_vm10, %v4499_v45  ;;  %v2034_v23 = vld [vmem:[%s5167_s3 + $0xf0] sm:$0xff] }
 0x259   : > { %2142 = vmatpush.msra.mxu2 %v2034_v23  ;;  %v2010_v23 = vld [vmem:[%s5167_s3 + $0x30] sm:$0xff] }
 0x25a   : > { %v1417_v6 = vrot.slane %v1372_v53, 7 }
 0x25c   : > { %v4523_v44 = vsel %vm1403_vm1, %v1416_v5, %v1417_v6  ;;  %v1245_v3 = vpop.f32.mrf.mxu0  ;;  %v1476_v41 = vsel %vm1403_vm1, %v1417_v6, 0.0 }
 0x25d   : > { %v1246_v57 = vadd.f32 %v4265_v10, %v1245_v3  ;;  %v2851_v20 = vpack.i.bf16 %v4446_v2, %v4523_v44  ;;  %v1559_v60 = vrot.slane %v4523_v44, 2  ;;  %v1519_v1 = vrot.slane %v4523_v44, 1 }
 0x25e   : > { %v1561_v55 = vrot.slane %v1476_v41, 2  ;;  %v1521_v61 = vrot.slane %v1476_v41, 1 }
 0x25f   : > { %v1285_v40 = vmax.f32 %v1246_v57, 0.0  ;;  %2852 = vrot.lane.b32.xlu2 %v2851_v20, %s3157_s19  ;;  %v4536_v14 = vsel %vm5311_vm13, %v1558_v52, %v1559_v60  ;;  %v4543_v22 = vsel %vm348_vm0, %v1518_v13, %v1519_v1  ;;  %v2017_v20 = vld [vmem:[%s5167_s3 + $0x68] sm:$0xff] }
 0x260   : > { %v2861_v2 = vpack.i.bf16 %v4490_v8, %v4536_v14  ;;  %2653 = vmatmul.msk.f32.gmra.mxu3 %vm1103_vm10, %v4536_v14  ;;  %v2841_v47 = vpack.i.bf16 %v4442_v58, %v4543_v22  ;;  %v4553_v49 = vsel %vm5312_vm14, %v1559_v60, %v1561_v55  ;;  %v4558_v30 = vsel %vm348_vm0, %v1519_v1, %v1521_v61  ;;  %v2033_v52 = vld [vmem:[%s5167_s3 + $0xe8] sm:$0xff]  ;;  %v2031_v55 = vld [vmem:[%s5167_s3 + $0xd8] sm:$0xff] }
 0x261   : > { %v1373_v29 = vmul.f32 %v2644_v62, %v1285_v40  ;;  %v2876_v27 = vpack.i.bf16 %v4502_v35, %v4553_v49  ;;  %v2856_v51 = vpack.i.bf16 %v4470_v11, %v4558_v30  ;;  %2078 = vmatpush.msra.mxu1 %v2017_v20  ;;  %2143 = vmatpush.msra.mxu2 %v2033_v52  ;;  %v2016_v40 = vld [vmem:[%s5167_s3 + $0x60] sm:$0xff]  ;;  %v2009_v20 = vld [vmem:[%s5167_s3 + $0x28] sm:$0xff] }
 0x262   : > { %2862 = vrot.lane.b32.xlu1 %v2861_v2, %s3154_s18  ;;  %2842 = vrot.lane.b32.xlu0 %v2841_v47, %s3158_s13  ;;  %v2032_v2 = vld [vmem:[%s5167_s3 + $0xe0] sm:$0xff]  ;;  %v2015_v47 = vld [vmem:[%s5167_s3 + $0x58] sm:$0xff] }
 0x263   : > { %v1419_v31 = vrot.slane %v1373_v29, 7  ;;  %2079 = vmatpush.msra.mxu1 %v2016_v40  ;;  %2144 = vmatpush.msra.mxu2 %v2032_v2  ;;  %v2008_v40 = vld [vmem:[%s5167_s3 + $0x20] sm:$0xff] }
 0x265   : > { %v4550_v37 = vsel %vm1403_vm1, 0.0, %v1419_v31  ;;  %2080 = vmatpush.msra.mxu1 %v2015_v47  ;;  %2145 = vmatpush.msra.mxu2 %v2031_v55  ;;  %v2024_v55 = vld [vmem:[%s5167_s3 + $0xa0] sm:$0xff] }
 0x266   : > { %v2866_v15 = vpack.i.bf16 %v4485_v36, %v4550_v37  ;;  %v1523_v63 = vrot.slane %v4550_v37, 1  ;;  %v1563_v18 = vrot.slane %v4550_v37, 2 }
 0x267   : > { %2146 = vmatpush.msra.mxu2 %v2030_v4 }
 0x268   : > { %2867 = vrot.lane.b32.xlu2 %v2866_v15, %s3157_s19  ;;  %2654 = vmatmul.msk.f32.gmra.mxu3 %vm1103_vm10, %v4553_v49 }
 0x26a   : > { %2877 = vrot.lane.b32.xlu1 %v2876_v27, %s3154_s18  ;;  %v1248_v32 = vpop.f32.mrf.mxu0  ;;  %2857 = vrot.lane.b32.xlu0 %v2856_v51, %s3158_s13  ;;  %v2014_v27 = vld [vmem:[%s5167_s3 + $0x50] sm:$0xff] }
 0x26b   : > { %v1249_v36 = vadd.f32 %v4265_v10, %v1248_v32  ;;  %2081 = vmatpush.msra.mxu1 %v2014_v27 }
 0x26d   : > { %v1286_v17 = vmax.f32 %v1249_v36, 0.0 }
 0x26f   : > { %v1374_v42 = vmul.f32 %v2644_v62, %v1286_v17  ;;  %v1301_v17 = vadd.s32 7, %v4250_v7 }
 0x271   : > { %v1420_v21 = vrot.slane %v1374_v42, 7  ;;  %v2013_v42 = vld [vmem:[%s5167_s3 + $0x48] sm:$0xff] }
 0x272   : > { %2082 = vmatpush.msra.mxu1 %v2013_v42 }
 0x273   : > { %v4579_v5 = vsel %vm1403_vm1, %v1419_v31, %v1420_v21  ;;  %v1251_v9 = vpop.f32.mrf.mxu0  ;;  %v1477_v53 = vsel %vm1403_vm1, %v1420_v21, 0.0 }
 0x274   : > { %v2881_v19 = vpack.i.bf16 %v4499_v45, %v4579_v5  ;;  %v1564_v50 = vrot.slane %v4579_v5, 2  ;;  %v1524_v59 = vrot.slane %v4579_v5, 1  ;;  %v1252_v6 = vadd.f32 %v4265_v10, %v1251_v9  ;;  %v2028_v9 = vld [vmem:[%s5167_s3 + $0xc0] sm:$0xff] }
 0x275   : > { %v2645_v45 = vsel %vm1339_vm3, 1.0, %v3156_v24  ;;  %v1526_v62 = vrot.slane %v1477_v53, 1  ;;  %v1566_v1 = vrot.slane %v1477_v53, 2  ;;  %v2026_v53 = vld [vmem:[%s5167_s3 + $0xb0] sm:$0xff]  ;;  %vm1922_vm3 = vcmask 523264  }
 0x276   : > { %2882 = vrot.lane.b32.xlu2 %v2881_v19, %s3157_s19  ;;  %v4597_v3 = vsel %vm5313_vm4, %v1563_v18, %v1564_v50  ;;  %v4600_v57 = vsel %vm348_vm0, %v1523_v63, %v1524_v59  ;;  %v1287_v60 = vmax.f32 %v1252_v6, 0.0  ;;  %v2012_v63 = vld [vmem:[%s5167_s3 + $0x40] sm:$0xff]  ;;  %v2636_v18 = vadd.s32 4294967295, %v1301_v17  ;;  %v2006_v17 = vld [vmem:[%s5167_s3 + $0x10] sm:$0xff] }
 0x277   : > { %v2891_v13 = vpack.i.bf16 %v4543_v22, %v4597_v3  ;;  %2655 = vmatmul.msk.f32.gmra.mxu3 %vm1103_vm10, %v4597_v3  ;;  %v2871_v41 = vpack.i.bf16 %v4512_v0, %v4600_v57  ;;  %v4629_v31 = vsel %vm5314_vm5, %v1564_v50, %v1566_v1  ;;  %v4632_v15 = vsel %vm348_vm0, %v1524_v59, %v1526_v62  ;;  %v2011_v50 = vld [vmem:[%s5167_s3 + $0x38] sm:$0xff]  ;;  %v2025_v1 = vld [vmem:[%s5167_s3 + $0xa8] sm:$0xff]  ;;  %vm5319_vm5 = vmmov %vm5318_vm2 }
 0x278   : > { %v1375_v29 = vmul.f32 %v2645_v45, %v1287_v60  ;;  %v2906_v21 = vpack.i.bf16 %v4558_v30, %v4629_v31  ;;  %v2886_v46 = vpack.i.bf16 %v4523_v44, %v4632_v15  ;;  %2083 = vmatpush.msra.mxu1 %v2012_v63  ;;  %v2027_v59 = vld [vmem:[%s5167_s3 + $0xb8] sm:$0xff]  ;;  %vm1320_vm6 = vcmp.ge.s32.totalorder %v2636_v18, 0 }
 0x279   : > { %2892 = vrot.lane.b32.xlu1 %v2891_v13, %s3154_s18  ;;  %2872 = vrot.lane.b32.xlu0 %v2871_v41, %s3158_s13  ;;  %vm1330_vm7 = vcmp.lt.s32.totalorder %v2636_v18, 16  ;;  %v2004_v18 = vld [vmem:[%s5167_s3] sm:$0xff]  ;;  %vm1939_vm4 = vcmask 785408  }
 0x27a   : > { %v1422_v61 = vrot.slane %v1375_v29, 7  ;;  %2084 = vmatpush.msra.mxu1 %v2011_v50  ;;  %vm1340_vm9 = vmand %vm1320_vm6, %vm1330_vm7 }
 0x27b   : > { %v2646_v42 = vsel %vm1340_vm9, 1.0, %v3156_v24 }
 0x27c   : > { %v4641_v51 = vsel %vm1403_vm1, 0.0, %v1422_v61  ;;  %v1254_v32 = vpop.f32.mrf.mxu0  ;;  %2085 = vmatpush.msra.mxu1 %v2010_v23  ;;  %v1302_v23 = vadd.s32 8, %v4250_v7 }
 0x27d   : > { %v1255_v36 = vadd.f32 %v4265_v10, %v1254_v32  ;;  %v2896_v39 = vpack.i.bf16 %v4536_v14, %v4641_v51  ;;  %v2029_v14 = vld [vmem:[%s5167_s3 + $0xc8] sm:$0xff]  ;;  %v1528_v6 = vrot.slane %v4641_v51, 1  ;;  %v1568_v60 = vrot.slane %v4641_v51, 2 }
 0x27e   : > { %2147 = vmatpush.msra.mxu2 %v2029_v14  ;;  %2086 = vmatpush.msra.mxu1 %v2009_v20  ;;  %v2005_v14 = vld [vmem:[%s5167_s3 + $0x8] sm:$0xff] }
 0x27f   : > { %2656 = vmatmul.msk.f32.gmra.mxu3 %vm1103_vm10, %v4629_v31  ;;  %v1288_v12 = vmax.f32 %v1255_v36, 0.0  ;;  %2897 = vrot.lane.b32.xlu2 %v2896_v39, %s3157_s19  ;;  %v2023_v39 = vld [vmem:[%s5167_s3 + $0x98] sm:$0xff] }
 0x280   : > { %2148 = vmatpush.msra.mxu2 %v2028_v9  ;;  %2087 = vmatpush.msra.mxu1 %v2008_v40 }
 0x281   : > { %2907 = vrot.lane.b32.xlu1 %v2906_v21, %s3154_s18  ;;  %2887 = vrot.lane.b32.xlu0 %v2886_v46, %s3158_s13  ;;  %v1376_v19 = vmul.f32 %v2645_v45, %v1288_v12  ;;  %v2022_v46 = vld [vmem:[%s5167_s3 + $0x90] sm:$0xff] }
 0x282   : > { %2149 = vmatpush.msra.mxu2 %v2027_v59 }
 0x283   : > { %v1423_v26 = vrot.slane %v1376_v19, 7  ;;  %v2021_v19 = vld [vmem:[%s5167_s3 + $0x88] sm:$0xff] }
 0x284   : > { %2150 = vmatpush.msra.mxu2 %v2026_v53  ;;  %v2020_v53 = vld [vmem:[%s5167_s3 + $0x80] sm:$0xff] }
 0x285   : > { %v4682_v45 = vsel %vm1403_vm1, %v1422_v61, %v1423_v26  ;;  %v1478_v62 = vsel %vm1403_vm1, %v1423_v26, 0.0  ;;  %v2007_v61 = vld [vmem:[%s5167_s3 + $0x18] sm:$0xff] }
 0x286   : > { %v2911_v52 = vpack.i.bf16 %v4553_v49, %v4682_v45  ;;  %v1569_v13 = vrot.slane %v4682_v45, 2  ;;  %v1529_v41 = vrot.slane %v4682_v45, 1  ;;  %v1531_v27 = vrot.slane %v1478_v62, 1  ;;  %2151 = vmatpush.msra.mxu2 %v2025_v1  ;;  %2088 = vmatpush.msra.mxu1 %v2007_v61 }
 0x287   : > { %v1571_v32 = vrot.slane %v1478_v62, 2 }
 0x288   : > { %2912 = vrot.lane.b32.xlu2 %v2911_v52, %s3157_s19  ;;  %v4701_v49 = vsel %vm5315_vm8, %v1568_v60, %v1569_v13  ;;  %v4704_v2 = vsel %vm348_vm0, %v1528_v6, %v1529_v41  ;;  %2152 = vmatpush.msra.mxu2 %v2024_v55  ;;  %v4740_v63 = vsel %vm348_vm0, %v1529_v41, %v1531_v27  ;;  %vm5320_vm8 = vmmov %vm5318_vm2 }
 0x289   : > { %v2921_v29 = vpack.i.bf16 %v4600_v57, %v4701_v49  ;;  %2657 = vmatmul.msk.f32.gmra.mxu3 %vm1103_vm10, %v4701_v49  ;;  %v2901_v47 = vpack.i.bf16 %v4550_v37, %v4704_v2  ;;  %v4737_v12 = vsel %vm5316_vm11, %v1569_v13, %v1571_v32  ;;  %2089 = vmatpush.msra.mxu1 %v2006_v17  ;;  %v2637_v13 = vadd.s32 4294967295, %v1302_v23  ;;  %vm5321_vm11 = vmmov %vm5318_vm2 }
 0x28a   : > { %v1257_v4 = vpop.f32.mrf.mxu0  ;;  %2153 = vmatpush.msra.mxu2 %v2023_v39  ;;  %v2936_v59 = vpack.i.bf16 %v4632_v15, %v4737_v12  ;;  %v2916_v26 = vpack.i.bf16 %v4579_v5, %v4740_v63 }
 0x28b   : > { %v1258_v36 = vadd.f32 %v4265_v10, %v1257_v4  ;;  %2922 = vrot.lane.b32.xlu1 %v2921_v29, %s3154_s18  ;;  %2902 = vrot.lane.b32.xlu0 %v2901_v47, %s3158_s13  ;;  %vm1321_vm12 = vcmp.ge.s32.totalorder %v2637_v13, 0  ;;  %vm1331_vm13 = vcmp.lt.s32.totalorder %v2637_v13, 16 }
 0x28c   : > { %2154 = vmatpush.msra.mxu2 %v2022_v46  ;;  %2090 = vmatpush.msra.mxu1 %v2005_v14  ;;  %vm1341_vm14 = vmand %vm1321_vm12, %vm1331_vm13  ;;  %vm2411_vm13 = vcmask 1041408  }
 0x28d   : > { %v1289_v21 = vmax.f32 %v1258_v36, 0.0  ;;  %v2647_v36 = vsel %vm1341_vm14, 1.0, %v3156_v24  ;;  %vm5322_vm12 = vmmov %vm5318_vm2  ;;  %vm2416_vm14 = vcmask 1042432  }
 0x28e   : > { %2155 = vmatpush.msra.mxu2 %v2021_v19  ;;  %2091 = vmatpush.msra.mxu1 %v2004_v18 }
 0x28f   : > { %v1377_v9 = vmul.f32 %v2646_v42, %v1289_v21 }
 0x290   : > { %2156 = vmatpush.msra.mxu2 %v2020_v53 }
 0x291   : > { %v1425_v50 = vrot.slane %v1377_v9, 7  ;;  %2658 = vmatmul.msk.f32.gmra.mxu3 %vm1103_vm10, %v4737_v12 }
 0x293   : > { %v4759_v6 = vsel %vm1403_vm1, 0.0, %v1425_v50  ;;  %2937 = vrot.lane.b32.xlu1 %v2936_v59, %s3154_s18  ;;  %2917 = vrot.lane.b32.xlu0 %v2916_v26, %s3158_s13  ;;  %v2778_v26 = vpop.permute.xlu2 %2777 }
 0x294   : > { %v1260_v20 = vpop.f32.mrf.mxu0  ;;  %v2926_v60 = vpack.i.bf16 %v4597_v3, %v4759_v6  ;;  %v1533_v40 = vrot.slane %v4759_v6, 1  ;;  %v1573_v3 = vrot.slane %v4759_v6, 2 }
 0x295   : > { %v1261_v52 = vadd.f32 %v4265_v10, %v1260_v20 }
 0x296   : > { %2927 = vrot.lane.b32.xlu2 %v2926_v60, %s3157_s19 }
 0x297   : > { %v1290_v41 = vmax.f32 %v1261_v52, 0.0 }
 0x299   : > { %v1378_v62 = vmul.f32 %v2646_v42, %v1290_v41 }
 0x29b   : > { %v1426_v1 = vrot.slane %v1378_v62, 7 }
 0x29d   : > { %v4769_v29 = vsel %vm1403_vm1, %v1425_v50, %v1426_v1  ;;  %v1263_v47 = vpop.f32.mrf.mxu0  ;;  %v1479_v4 = vsel %vm1403_vm1, %v1426_v1, 0.0 }
 0x29e   : > { %v2941_v55 = vpack.i.bf16 %v4629_v31, %v4769_v29  ;;  %v1574_v61 = vrot.slane %v4769_v29, 2  ;;  %v1534_v27 = vrot.slane %v4769_v29, 1  ;;  %v1264_v32 = vadd.f32 %v4265_v10, %v1263_v47  ;;  %v2773_v31 = vpop.permute.xlu1 %2772 }
 0x29f   : > { %v1536_v14 = vrot.slane %v1479_v4, 1  ;;  %v1576_v9 = vrot.slane %v1479_v4, 2  ;;  %v2775_v23 = vunpack.i.h.bf16 %v2773_v31  ;;  %v2774_v53 = vunpack.i.l.bf16 %v2773_v31 }
 0x2a0   : > { %2942 = vrot.lane.b32.xlu2 %v2941_v55, %s3157_s19  ;;  %v4781_v39 = vsel %vm5317_vm15, %v1573_v3, %v1574_v61  ;;  %v4784_v17 = vsel %vm348_vm0, %v1533_v40, %v1534_v27  ;;  %v1291_v42 = vmax.f32 %v1264_v32, 0.0  ;;  %v2780_v40 = vunpack.i.h.bf16 %v2778_v26 }
 0x2a1   : > { %v2951_v21 = vpack.i.bf16 %v4704_v2, %v4781_v39  ;;  %2659 = vmatmul.msk.f32.gmra.mxu3 %vm1103_vm10, %v4781_v39  ;;  %v2931_v46 = vpack.i.bf16 %v4641_v51, %v4784_v17  ;;  %v4795_v50 = vsel %vm5318_vm2, %v1574_v61, %v1576_v9  ;;  %v4798_v59 = vsel %vm348_vm0, %v1534_v27, %v1536_v14 }
 0x2a2   : > { %v1379_v19 = vmul.f32 %v2647_v36, %v1291_v42  ;;  %v2966_v60 = vpack.i.bf16 %v4740_v63, %v4795_v50  ;;  %v2946_v13 = vpack.i.bf16 %v4682_v45, %v4798_v59  ;;  %v1956_v1 = vsel %vm1103_vm10, %v4416_v34, %v2774_v53  ;;  %v2793_v42 = vpop.permute.xlu2 %2792 }
 0x2a3   : > { %2952 = vrot.lane.b32.xlu1 %v2951_v21, %s3154_s18  ;;  %2932 = vrot.lane.b32.xlu0 %v2931_v46, %s3158_s13  ;;  %v2779_v47 = vunpack.i.l.bf16 %v2778_v26  ;;  %v2795_v9 = vunpack.i.h.bf16 %v2793_v42  ;;  %v1303_v26 = vadd.s32 9, %v4250_v7  ;;  %vm2425_vm15 = vcmask 1044480  }
 0x2a4   : > { %v1428_v18 = vrot.slane %v1379_v19, 7  ;;  %vm5323_vm2 = vcmask 1043456  }
 0x2a5   : > { %v1972_v31 = vsel %vm1922_vm3, %v1956_v1, %v2779_v47 }
 0x2a6   : > { %v4801_v20 = vsel %vm1403_vm1, 0.0, %v1428_v18  ;;  %v2788_v41 = vpop.permute.xlu1 %2787 }
 0x2a7   : > { %v2956_v52 = vpack.i.bf16 %v4701_v49, %v4801_v20  ;;  %v1906_v49 = vsel %vm1103_vm10, %v4313_v16, %v2775_v23  ;;  %v2790_v46 = vunpack.i.h.bf16 %v2788_v41  ;;  %v2789_v34 = vunpack.i.l.bf16 %v2788_v41 }
 0x2a8   : > { %v1923_v32 = vsel %vm1922_vm3, %v1906_v49, %v2780_v40  ;;  %v2794_v23 = vunpack.i.l.bf16 %v2793_v42  ;;  %v1601_v49 = vrot.slane %v4801_v20, 2 }
 0x2a9   : > { %2660 = vmatmul.msk.f32.gmra.mxu3 %vm1103_vm10, %v4795_v50  ;;  %2957 = vrot.lane.b32.xlu2 %v2956_v52, %s3157_s19 }
 0x2ab   : > { %2967 = vrot.lane.b32.xlu1 %v2966_v60, %s3154_s18  ;;  %2947 = vrot.lane.b32.xlu0 %v2946_v13, %s3158_s13  ;;  %v1266_v62 = vpop.f32.mrf.mxu0  ;;  %v2783_v3 = vpop.permute.xlu0 %2782  ;;  %v1907_v60 = vsel %vm1103_vm10, %v4302_v56, %v2790_v46  ;;  %v1957_v13 = vsel %vm1103_vm10, %v4456_v48, %v2789_v34 }
 0x2ac   : > { %v1267_v55 = vadd.f32 %v4265_v10, %v1266_v62  ;;  %v2785_v61 = vunpack.i.h.bf16 %v2783_v3  ;;  %v2784_v27 = vunpack.i.l.bf16 %v2783_v3  ;;  %v1924_v56 = vsel %vm1922_vm3, %v1907_v60, %v2795_v9 }
 0x2ad   : > { %v1973_v47 = vsel %vm1922_vm3, %v1957_v13, %v2794_v23  ;;  %v3019_v23 = vld [vmem:[%s5166_s2] ss:$0 sm:$0xff] }
 0x2ae   : > { %v1292_v4 = vmax.f32 %v1267_v55, 0.0  ;;  %v1940_v16 = vsel %vm1939_vm4, %v1923_v32, %v2785_v61  ;;  %v1988_v21 = vsel %vm1939_vm4, %v1972_v31, %v2784_v27  ;;  %v2803_v19 = vpop.permute.xlu1 %2802  ;;  %v2638_v55 = vadd.s32 4294967295, %v1303_v26 }
 0x2af   : > { %2092 = vmatmul.f32.vlgmr.msra.gmra.mxu1 %v1940_v16  ;;  %2157 = vmatmul.f32.vlgmr.msra.gmra.mxu2 %v1988_v21  ;;  %v2805_v31 = vunpack.i.h.bf16 %v2803_v19  ;;  %v2804_v42 = vunpack.i.l.bf16 %v2803_v19 }
 0x2b0   : > { %v1380_v14 = vmul.f32 %v2647_v36, %v1292_v4  ;;  %v1580_v36 = vrot.slane %v4801_v20, 1  ;;  %v2808_v4 = vpop.permute.xlu2 %2807  ;;  %vm1322_vm6 = vcmp.ge.s32.totalorder %v2638_v55, 0  ;;  %vm1332_vm7 = vcmp.lt.s32.totalorder %v2638_v55, 16 }
 0x2b1   : > { %v1958_v9 = vsel %vm1103_vm10, %v4422_v28, %v2804_v42  ;;  %v2810_v19 = vunpack.i.h.bf16 %v2808_v4  ;;  %v2809_v26 = vunpack.i.l.bf16 %v2808_v4  ;;  %vm1342_vm9 = vmand %vm1322_vm6, %vm1332_vm7 }
 0x2b2   : > { %v1429_v10 = vrot.slane %v1380_v14, 7  ;;  %v2648_v55 = vsel %vm1342_vm9, 1.0, %v3156_v24  ;;  %vm5327_vm6 = vmmov %vm5323_vm2 }
 0x2b3   : > { %v2798_v52 = vpop.permute.xlu0 %2797 }
 0x2b4   : > { %v4825_v53 = vsel %vm1403_vm1, %v1428_v18, %v1429_v10  ;;  %v1480_v41 = vsel %vm1403_vm1, %v1429_v10, 0.0  ;;  %v2800_v7 = vunpack.i.h.bf16 %v2798_v52  ;;  %v2799_v1 = vunpack.i.l.bf16 %v2798_v52 }
 0x2b5   : > { %v1581_v62 = vrot.slane %v4825_v53, 1  ;;  %v2971_v18 = vpack.i.bf16 %v4737_v12, %v4825_v53  ;;  %v1602_v40 = vrot.slane %v4825_v53, 2  ;;  %v1583_v32 = vrot.slane %v1480_v41, 1 }
 0x2b6   : > { %v1941_v3 = vsel %vm1939_vm4, %v1924_v56, %v2800_v7  ;;  %v1989_v61 = vsel %vm1939_vm4, %v1973_v47, %v2799_v1  ;;  %v1604_v21 = vrot.slane %v1480_v41, 2  ;;  %v2818_v34 = vpop.permute.xlu1 %2817  ;;  %v1908_v10 = vsel %vm1103_vm10, %v4316_v25, %v2805_v31 }
 0x2b7   : > { %v4841_v48 = vsel %vm348_vm0, %v1580_v36, %v1581_v62  ;;  %2972 = vrot.lane.b32.xlu2 %v2971_v18, %s3157_s19  ;;  %v1603_v27 = vsel %vm5319_vm5, %v1601_v49, %v1602_v40  ;;  %2095 = vmatmul.f32.gmra.mxu1 %v1941_v3  ;;  %v4854_v14 = vsel %vm348_vm0, %v1581_v62, %v1583_v32  ;;  %v2820_v62 = vunpack.i.h.bf16 %v2818_v34 }
 0x2b8   : > { %v2961_v12 = vpack.i.bf16 %v4759_v6, %v4841_v48  ;;  %2160 = vmatmul.f32.gmra.mxu2 %v1989_v61  ;;  %v2981_v16 = vpack.i.bf16 %v4784_v17, %v1603_v27  ;;  %2661 = vmatmul.msk.f32.gmra.mxu3 %vm1103_vm10, %v1603_v27  ;;  %v1605_v13 = vsel %vm5320_vm8, %v1602_v40, %v1604_v21  ;;  %v2819_v7 = vunpack.i.l.bf16 %v2818_v34  ;;  %v2823_v47 = vpop.permute.xlu2 %2822 }
 0x2b9   : > { %v2976_v25 = vpack.i.bf16 %v4769_v29, %v4854_v14  ;;  %v1925_v28 = vsel %vm1922_vm3, %v1908_v10, %v2810_v19  ;;  %v1974_v49 = vsel %vm1922_vm3, %v1958_v9, %v2809_v26  ;;  %v2996_v1 = vpack.i.bf16 %v4798_v59, %v1605_v13 }
 0x2ba   : > { %2962 = vrot.lane.b32.xlu0 %v2961_v12, %s3158_s13  ;;  %2982 = vrot.lane.b32.xlu1 %v2981_v16, %s3154_s18  ;;  %v1909_v27 = vsel %vm1103_vm10, %v4327_v33, %v2820_v62  ;;  %v1959_v12 = vsel %vm1103_vm10, %v4449_v38, %v2819_v7  ;;  %v2825_v4 = vunpack.i.h.bf16 %v2823_v47  ;;  %v2824_v32 = vunpack.i.l.bf16 %v2823_v47 }
 0x2bb   : > { %v1272_v46 = vpop.f32.mrf.mxu3 }
 0x2bc   : > { %v1273_v52 = vadd.f32 %v3019_v23, %v1272_v46  ;;  %v1926_v34 = vsel %vm1922_vm3, %v1909_v27, %v2825_v4  ;;  %v1975_v10 = vsel %vm1922_vm3, %v1959_v12, %v2824_v32 }
 0x2bd   : > { %v2813_v60 = vpop.permute.xlu0 %2812 }
 0x2be   : > { %v2815_v36 = vunpack.i.h.bf16 %v2813_v60  ;;  %v2814_v41 = vunpack.i.l.bf16 %v2813_v60  ;;  %v1294_v40 = vmax.f32 %v1273_v52, 0.0  ;;  %v2833_v26 = vpop.permute.xlu1 %2832 }
 0x2bf   : > { %v2834_v7 = vunpack.i.l.bf16 %v2833_v26 }
 0x2c0   : > { %v1942_v18 = vsel %vm1939_vm4, %v1925_v28, %v2815_v36  ;;  %v1990_v56 = vsel %vm1939_vm4, %v1974_v49, %v2814_v41  ;;  %2662 = vmatmul.msk.f32.gmra.mxu3 %vm1103_vm10, %v1605_v13  ;;  %v1382_v31 = vmul.f32 %v2648_v55, %v1294_v40  ;;  %v2838_v28 = vpop.permute.xlu2 %2837  ;;  %v2835_v49 = vunpack.i.h.bf16 %v2833_v26 }
 0x2c1   : > { %2098 = vmatmul.f32.gmra.mxu1 %v1942_v18  ;;  %2163 = vmatmul.f32.gmra.mxu2 %v1990_v56  ;;  %v1960_v40 = vsel %vm1103_vm10, %v4490_v8, %v2834_v7  ;;  %v2840_v47 = vunpack.i.h.bf16 %v2838_v28 }
 0x2c2   : > { %2977 = vrot.lane.b32.xlu0 %v2976_v25, %s3158_s13  ;;  %2997 = vrot.lane.b32.xlu1 %v2996_v1, %s3154_s18  ;;  %v1432_v33 = vrot.slane %v1382_v31, 7  ;;  %v1910_v56 = vsel %vm1103_vm10, %v4374_v43, %v2835_v49 }
 0x2c3   : > { %v1269_v3 = vpop.f32.mrf.mxu0  ;;  %v1927_v31 = vsel %vm1922_vm3, %v1910_v56, %v2840_v47 }
 0x2c4   : > { %v1270_v61 = vadd.f32 %v3019_v23, %v1269_v3  ;;  %v1481_v18 = vsel %vm1403_vm1, %v1432_v33, 0.0 }
 0x2c5   : > { %v2828_v16 = vpop.permute.xlu0 %2827  ;;  %v1616_v12 = vrot.slane %v1481_v18, 2  ;;  %v1611_v4 = vrot.slane %v1481_v18, 1 }
 0x2c6   : > { %v1293_v42 = vmax.f32 %v1270_v61, 0.0  ;;  %v2830_v21 = vunpack.i.h.bf16 %v2828_v16  ;;  %v2829_v46 = vunpack.i.l.bf16 %v2828_v16 }
 0x2c8   : > { %v1381_v24 = vmul.f32 %v2648_v55, %v1293_v42  ;;  %v1943_v9 = vsel %vm1939_vm4, %v1926_v34, %v2830_v21  ;;  %v1991_v19 = vsel %vm1939_vm4, %v1975_v10, %v2829_v46  ;;  %v2839_v55 = vunpack.i.l.bf16 %v2838_v28  ;;  %v2853_v46 = vpop.permute.xlu2 %2852 }
 0x2c9   : > { %2101 = vmatmul.f32.gmra.mxu1 %v1943_v9  ;;  %2166 = vmatmul.f32.gmra.mxu2 %v1991_v19  ;;  %v2855_v10 = vunpack.i.h.bf16 %v2853_v46  ;;  %v2854_v9 = vunpack.i.l.bf16 %v2853_v46 }
 0x2ca   : > { %v1431_v23 = vrot.slane %v1381_v24, 7  ;;  %1744 = vrot.lane.b32.xlu1 %v4825_v53, %s3158_s13  ;;  %v1976_v42 = vsel %vm1922_vm3, %v1960_v40, %v2839_v55 }
 0x2cc   : > { %v1433_v38 = vsel %vm1403_vm1, %v1431_v23, %v1432_v33  ;;  %v1471_v52 = vsel %vm1403_vm1, 0.0, %v1431_v23 }
 0x2cd   : > { %v1608_v60 = vrot.slane %v1471_v52, 1  ;;  %v1609_v13 = vrot.slane %v1433_v38, 1  ;;  %v2986_v36 = vpack.i.bf16 %v4781_v39, %v1471_v52  ;;  %v1613_v41 = vrot.slane %v1471_v52, 2  ;;  %v2848_v39 = vpop.permute.xlu1 %2847 }
 0x2ce   : > { %v1614_v62 = vrot.slane %v1433_v38, 2  ;;  %v3001_v61 = vpack.i.bf16 %v4795_v50, %v1433_v38  ;;  %v2850_v32 = vunpack.i.h.bf16 %v2848_v39  ;;  %v2849_v43 = vunpack.i.l.bf16 %v2848_v39 }
 0x2cf   : > { %2987 = vrot.lane.b32.xlu2 %v2986_v36, %s3157_s19  ;;  %v1610_v25 = vsel %vm348_vm0, %v1608_v60, %v1609_v13  ;;  %v1612_v50 = vsel %vm348_vm0, %v1609_v13, %v1611_v4 }
 0x2d0   : > { %v1615_v53 = vsel %vm5321_vm11, %v1613_v41, %v1614_v62  ;;  %v2991_v1 = vpack.i.bf16 %v4801_v20, %v1610_v25  ;;  %v1617_v16 = vsel %vm5322_vm12, %v1614_v62, %v1616_v12  ;;  %v1911_v24 = vsel %vm1103_vm10, %v4400_v54, %v2850_v32  ;;  %v2868_v54 = vpop.permute.xlu2 %2867 }
 0x2d1   : > { %2663 = vmatmul.msk.f32.gmra.mxu3 %vm1103_vm10, %v1615_v53  ;;  %v1961_v34 = vsel %vm1103_vm10, %v4502_v35, %v2849_v43  ;;  %v1928_v23 = vsel %vm1922_vm3, %v1911_v24, %v2855_v10  ;;  %v2870_v25 = vunpack.i.h.bf16 %v2868_v54  ;;  %v2869_v28 = vunpack.i.l.bf16 %v2868_v54 }
 0x2d2   : > { %2992 = vrot.lane.b32.xlu0 %v2991_v1, %s3158_s13  ;;  %v1977_v38 = vsel %vm1922_vm3, %v1961_v34, %v2854_v9 }
 0x2d4   : > { %v2843_v3 = vpop.permute.xlu0 %2842 }
 0x2d5   : > { %v2845_v27 = vunpack.i.h.bf16 %v2843_v3  ;;  %v2844_v20 = vunpack.i.l.bf16 %v2843_v3  ;;  %v2863_v13 = vpop.permute.xlu1 %2862 }
 0x2d6   : > { %v2865_v36 = vunpack.i.h.bf16 %v2863_v13  ;;  %v2864_v41 = vunpack.i.l.bf16 %v2863_v13 }
 0x2d7   : > { %3002 = vrot.lane.b32.xlu2 %v3001_v61, %s3157_s19  ;;  %v1944_v8 = vsel %vm1939_vm4, %v1927_v31, %v2845_v27  ;;  %v1992_v21 = vsel %vm1939_vm4, %v1976_v42, %v2844_v20 }
 0x2d8   : > { %2104 = vmatmul.f32.gmra.mxu1 %v1944_v8  ;;  %2169 = vmatmul.f32.gmra.mxu2 %v1992_v21  ;;  %v1912_v35 = vsel %vm1103_vm10, %v4442_v58, %v2865_v36  ;;  %v1962_v62 = vsel %vm1103_vm10, %v4543_v22, %v2864_v41  ;;  %v2883_v56 = vpop.permute.xlu2 %2882 }
 0x2d9   : > { %2664 = vmatmul.msk.f32.gmra.mxu3 %vm1103_vm10, %v1617_v16  ;;  %v1929_v18 = vsel %vm1922_vm3, %v1912_v35, %v2870_v25  ;;  %v1978_v39 = vsel %vm1922_vm3, %v1962_v62, %v2869_v28  ;;  %v2885_v61 = vunpack.i.h.bf16 %v2883_v56  ;;  %v2884_v27 = vunpack.i.l.bf16 %v2883_v56 }
 0x2da   : > { %1888 = vrot.lane.b32.xlu0 %v1612_v50, %s3158_s13  ;;  %s4980_s13 = sand.u32 1, %s3122_s22  }
 0x2db   : > { %s2604_s29 = sshll.u32 %s4980_s13, 7  ;;  %s2605_s14 = sshll.u32 %s4980_s13, 5 }
 0x2dc   : > { %v2858_v19 = vpop.permute.xlu0 %2857  ;;  %s4992_s12 = scalar_lea.vmem [#allocation2], %s2604_s29  ;;  %s5030_s9 = scalar_lea.vmem [#allocation4], %s2605_s14 }
 0x2dd   : > { %v2860_v33 = vunpack.i.h.bf16 %v2858_v19  ;;  %v2859_v26 = vunpack.i.l.bf16 %v2858_v19  ;;  %v2878_v49 = vpop.permute.xlu1 %2877  ;;  %s2462_s29 = scalar_lea.hbm %s5169_s5, %s2670_s20  ;;  %s2463_s14 = sshll.u32 %s4992_s12, 4  ;;  %s2464_s14 = int_to_ptr.vmem [resolvable:$true] %s2463_s14 }
 0x2de   : > { %v2880_v40 = vunpack.i.h.bf16 %v2878_v49  ;;  %v2879_v47 = vunpack.i.l.bf16 %v2878_v49  ;;  %s2465_s17 = sshll.u32 %s2462_s29, 4  ;;  %s2673_s20 = sshll.u32 %s2479_s30, 3  ;;  %s2466_s17 = int_to_ptr.hbm [resolvable:$true] %s2465_s17 }
 0x2df   : > { %v1945_v52 = vsel %vm1939_vm4, %v1928_v23, %v2860_v33  ;;  %v1993_v60 = vsel %vm1939_vm4, %v1977_v38, %v2859_v26  ;;  %s2443_s24 = scalar_lea.sflag [#allocation3], %s4980_s13  ;;  %s3034_s18 = sshra.s32 %s2466_s17, 4  ;;  %s3035_s18 = int_to_ptr.hbm [resolvable:$true] %s3034_s18 }
 0x2e0   : > { %2107 = vmatmul.f32.gmra.mxu1 %v1945_v52  ;;  %2172 = vmatmul.f32.gmra.mxu2 %v1993_v60  ;;  %v1913_v22 = vsel %vm1103_vm10, %v4470_v11, %v2880_v40  ;;  %v1963_v3 = vsel %vm1103_vm10, %v4558_v30, %v2879_v47  ;;  %v2898_v11 = vpop.permute.xlu2 %2897  ;;  %s3036_s25 = scalar_lea.hbm %s3035_s18, 128  ;;  %s3040_s29 = scalar_lea.hbm %s5169_s5, 512 }
 0x2e1   : > { %v1930_v31 = vsel %vm1922_vm3, %v1913_v22, %v2885_v61  ;;  %v1979_v42 = vsel %vm1922_vm3, %v1963_v3, %v2884_v27  ;;  %v2900_v46 = vunpack.i.h.bf16 %v2898_v11  ;;  %v2899_v24 = vunpack.i.l.bf16 %v2898_v11  ;;  %p3037_p13 = scmp.ne.s32.totalorder %s3035_s18, %s3036_s25  ;;  %p3041_p2 = scmp.lt.s32.totalorder %s3035_s18, %s5169_s5 }
 0x2e2   : > { %p3042_p4 = scmp.lt.s32.totalorder %s3040_s29, %s3036_s25 }
 0x2e3   : > { %p3038_p0 = pnand %p3037_p13, %p3246_p3 }
 0x2e4   : > { %p3043_p5 = por %p3042_p4, %p3041_p2 }
 0x2e5   : > { %p3039_p1 = pneg %p3038_p0 }
 0x2e7   : > { %p3044_p6 = pnand %p3043_p5, %p3039_p1 }
 0x2eb   : > { %v2873_v7 = vpop.permute.xlu0 %2872  ;;  %v2893_v20 = vpop.permute.xlu1 %2892 }
 0x2ec   : > { %v2875_v53 = vunpack.i.h.bf16 %v2873_v7  ;;  %v2874_v1 = vunpack.i.l.bf16 %v2873_v7  ;;  %v2895_v8 = vunpack.i.h.bf16 %v2893_v20  ;;  %v2894_v21 = vunpack.i.l.bf16 %v2893_v20 }
 0x2ee   : > { %v1946_v55 = vsel %vm1939_vm4, %v1929_v18, %v2875_v53  ;;  %v1994_v58 = vsel %vm1939_vm4, %v1978_v39, %v2874_v1  ;;  %v1914_v30 = vsel %vm1103_vm10, %v4512_v0, %v2895_v8  ;;  %v1964_v50 = vsel %vm1103_vm10, %v4600_v57, %v2894_v21  ;;  %v2913_v0 = vpop.permute.xlu2 %2912 }
 0x2ef   : > { %2110 = vmatmul.f32.gmra.mxu1 %v1946_v55  ;;  %2175 = vmatmul.f32.gmra.mxu2 %v1994_v58  ;;  %v1931_v33 = vsel %vm1922_vm3, %v1914_v30, %v2900_v46  ;;  %v1980_v26 = vsel %vm1922_vm3, %v1964_v50, %v2899_v24  ;;  %v2915_v54 = vunpack.i.h.bf16 %v2913_v0  ;;  %v2914_v36 = vunpack.i.l.bf16 %v2913_v0 }
 0x2f3   : > { %v2888_v12 = vpop.permute.xlu0 %2887  ;;  %v2908_v34 = vpop.permute.xlu1 %2907 }
 0x2f4   : > { %v2890_v4 = vunpack.i.h.bf16 %v2888_v12  ;;  %v2889_v32 = vunpack.i.l.bf16 %v2888_v12  ;;  %v2910_v23 = vunpack.i.h.bf16 %v2908_v34  ;;  %v2909_v38 = vunpack.i.l.bf16 %v2908_v34 }
 0x2f6   : > { %v1947_v43 = vsel %vm1939_vm4, %v1930_v31, %v2890_v4  ;;  %v1995_v16 = vsel %vm1939_vm4, %v1979_v42, %v2889_v32  ;;  %v1915_v57 = vsel %vm1103_vm10, %v4523_v44, %v2910_v23  ;;  %v1965_v13 = vsel %vm1103_vm10, %v4632_v15, %v2909_v38  ;;  %v2928_v44 = vpop.permute.xlu2 %2927 }
 0x2f7   : > { %2113 = vmatmul.f32.gmra.mxu1 %v1947_v43  ;;  %2178 = vmatmul.f32.gmra.mxu2 %v1995_v16  ;;  %v1932_v25 = vsel %vm1922_vm3, %v1915_v57, %v2915_v54  ;;  %v1981_v28 = vsel %vm1922_vm3, %v1965_v13, %v2914_v36  ;;  %v2930_v56 = vunpack.i.h.bf16 %v2928_v44  ;;  %v2929_v40 = vunpack.i.l.bf16 %v2928_v44 }
 0x2fd   : > { %v2903_v10 = vpop.permute.xlu0 %2902  ;;  %v2923_v53 = vpop.permute.xlu1 %2922 }
 0x2fe   : > { %v2905_v9 = vunpack.i.h.bf16 %v2903_v10  ;;  %v2904_v19 = vunpack.i.l.bf16 %v2903_v10  ;;  %v2925_v1 = vunpack.i.h.bf16 %v2923_v53  ;;  %v2924_v18 = vunpack.i.l.bf16 %v2923_v53 }
 0x300   : > { %v1948_v52 = vsel %vm1939_vm4, %v1931_v33, %v2905_v9  ;;  %v1996_v60 = vsel %vm1939_vm4, %v1980_v26, %v2904_v19  ;;  %v1916_v15 = vsel %vm1103_vm10, %v4550_v37, %v2925_v1  ;;  %v1966_v39 = vsel %vm1103_vm10, %v4704_v2, %v2924_v18  ;;  %v2943_v37 = vpop.permute.xlu2 %2942 }
 0x301   : > { %2116 = vmatmul.f32.gmra.mxu1 %v1948_v52  ;;  %2181 = vmatmul.f32.gmra.mxu2 %v1996_v60  ;;  %v1933_v3 = vsel %vm1922_vm3, %v1916_v15, %v2930_v56  ;;  %v1982_v61 = vsel %vm1922_vm3, %v1966_v39, %v2929_v40  ;;  %v2945_v31 = vunpack.i.h.bf16 %v2943_v37  ;;  %v2944_v42 = vunpack.i.l.bf16 %v2943_v37  ;;  %v4973_v52 = vld [vmem:[%s5168_s4] ss:$0 sm:$0xff] }
 0x305   : > { %v2918_v41 = vpop.permute.xlu0 %2917  ;;  %v2938_v47 = vpop.permute.xlu1 %2937 }
 0x306   : > { %v2920_v35 = vunpack.i.h.bf16 %v2918_v41  ;;  %v2919_v62 = vunpack.i.l.bf16 %v2918_v41  ;;  %v2940_v27 = vunpack.i.h.bf16 %v2938_v47  ;;  %v2939_v20 = vunpack.i.l.bf16 %v2938_v47 }
 0x308   : > { %v1949_v49 = vsel %vm1939_vm4, %v1932_v25, %v2920_v35  ;;  %v1997_v7 = vsel %vm1939_vm4, %v1981_v28, %v2919_v62  ;;  %v1917_v2 = vsel %vm1103_vm10, %v4579_v5, %v2940_v27  ;;  %v1967_v32 = vsel %vm1103_vm10, %v4740_v63, %v2939_v20  ;;  %v2958_v34 = vpop.permute.xlu2 %2957  ;;  %v2223_v35 = vpop.f32.mrf.mxu3 }
 0x309   : > { %2119 = vmatmul.f32.gmra.mxu1 %v1949_v49  ;;  %2184 = vmatmul.f32.gmra.mxu2 %v1997_v7  ;;  %v1934_v8 = vsel %vm1922_vm3, %v1917_v2, %v2945_v31  ;;  %v1983_v21 = vsel %vm1922_vm3, %v1967_v32, %v2944_v42  ;;  %v2960_v9 = vunpack.i.h.bf16 %v2958_v34  ;;  %v2959_v19 = vunpack.i.l.bf16 %v2958_v34 }
 0x311   : > { %v2973_v36 = vpop.permute.xlu2 %2972 }
 0x312   : > { %v2975_v49 = vunpack.i.h.bf16 %v2973_v36  ;;  %v2974_v7 = vunpack.i.l.bf16 %v2973_v36 }
 0x315   : > { %v2933_v55 = vpop.permute.xlu0 %2932  ;;  %v2953_v46 = vpop.permute.xlu1 %2952 }
 0x316   : > { %v2935_v58 = vunpack.i.h.bf16 %v2933_v55  ;;  %v2934_v22 = vunpack.i.l.bf16 %v2933_v55  ;;  %v2955_v5 = vunpack.i.h.bf16 %v2953_v46  ;;  %v2954_v24 = vunpack.i.l.bf16 %v2953_v46 }
 0x318   : > { %v1950_v12 = vsel %vm1939_vm4, %v1933_v3, %v2935_v58  ;;  %v1998_v4 = vsel %vm1939_vm4, %v1982_v61, %v2934_v22  ;;  %v1918_v63 = vsel %vm1103_vm10, %v4641_v51, %v2955_v5  ;;  %v1968_v10 = vsel %vm1103_vm10, %v4784_v17, %v2954_v24  ;;  %v2226_v3 = vpop.f32.mrf.mxu3 }
 0x319   : > { %2122 = vmatmul.f32.gmra.mxu1 %v1950_v12  ;;  %2187 = vmatmul.f32.gmra.mxu2 %v1998_v4  ;;  %v1935_v0 = vsel %vm1922_vm3, %v1918_v63, %v2960_v9  ;;  %v1984_v51 = vsel %vm1922_vm3, %v1968_v10, %v2959_v19 }
 0x31d   : > { %v2948_v43 = vpop.permute.xlu0 %2947  ;;  %v2968_v33 = vpop.permute.xlu1 %2967 }
 0x31e   : > { %v2950_v16 = vunpack.i.h.bf16 %v2948_v43  ;;  %v2949_v11 = vunpack.i.l.bf16 %v2948_v43  ;;  %v2970_v57 = vunpack.i.h.bf16 %v2968_v33  ;;  %v2969_v13 = vunpack.i.l.bf16 %v2968_v33 }
 0x320   : > { %v1951_v30 = vsel %vm1939_vm4, %v1934_v8, %v2950_v16  ;;  %v1999_v50 = vsel %vm1939_vm4, %v1983_v21, %v2949_v11  ;;  %v1919_v25 = vsel %vm1103_vm10, %v4682_v45, %v2970_v57  ;;  %v1969_v28 = vsel %vm1103_vm10, %v4798_v59, %v2969_v13  ;;  %v2229_v5 = vpop.f32.mrf.mxu3 }
 0x321   : > { %2125 = vmatmul.f32.gmra.mxu1 %v1951_v30  ;;  %2190 = vmatmul.f32.gmra.mxu2 %v1999_v50  ;;  %v1936_v39 = vsel %vm1922_vm3, %v1919_v25, %v2975_v49  ;;  %v1985_v56 = vsel %vm1922_vm3, %v1969_v28, %v2974_v7 }
 0x328   : > { %v2232_v25 = vpop.f32.mrf.mxu3 }
 0x329   : > { %v2988_v27 = vpop.permute.xlu2 %2987 }
 0x32a   : > { %v2990_v43 = vunpack.i.h.bf16 %v2988_v27  ;;  %v2989_v16 = vunpack.i.l.bf16 %v2988_v27 }
 0x32c   : > { %v2963_v26 = vpop.permute.xlu0 %2962  ;;  %v2093_v60 = vpop.f32.mrf.mxu1 }
 0x32d   : > { %v2965_v23 = vunpack.i.h.bf16 %v2963_v26  ;;  %v2964_v38 = vunpack.i.l.bf16 %v2963_v26  ;;  %v2094_v41 = vadd.f32 %v4973_v52, %v2093_v60  ;;  %v2983_v45 = vpop.permute.xlu1 %2982 }
 0x32e   : > { %v2985_v20 = vunpack.i.h.bf16 %v2983_v45  ;;  %v2984_v12 = vunpack.i.l.bf16 %v2983_v45 }
 0x32f   : > { %v1952_v17 = vsel %vm1939_vm4, %v1935_v0, %v2965_v23  ;;  %v2000_v54 = vsel %vm1939_vm4, %v1984_v51, %v2964_v38 }
 0x330   : > { %2128 = vmatmul.f32.gmra.mxu1 %v1952_v17  ;;  %2193 = vmatmul.f32.gmra.mxu2 %v2000_v54  ;;  %v1920_v31 = vsel %vm1103_vm10, %v4759_v6, %v2985_v20  ;;  %v1970_v42 = vsel %vm1103_vm10, %v4841_v48, %v2984_v12 }
 0x331   : > { %v1937_v50 = vsel %vm1922_vm3, %v1920_v31, %v2990_v43  ;;  %v1986_v46 = vsel %vm1922_vm3, %v1970_v42, %v2989_v16  ;;  %v3003_v9 = vpop.permute.xlu2 %3002 }
 0x332   : > { %v2158_v62 = vpop.f32.mrf.mxu2  ;;  %v3005_v38 = vunpack.i.h.bf16 %v3003_v9  ;;  %v3004_v60 = vunpack.i.l.bf16 %v3003_v9 }
 0x333   : > { %v2159_v53 = vadd.f32 %v2158_v62, %v2094_v41 }
 0x334   : > { %v2978_v44 = vpop.permute.xlu0 %2977  ;;  %v2096_v58 = vpop.f32.mrf.mxu1 }
 0x335   : > { %v2980_v1 = vunpack.i.h.bf16 %v2978_v44  ;;  %v2979_v18 = vunpack.i.l.bf16 %v2978_v44  ;;  %v2224_v15 = vadd.f32 %v2223_v35, %v2159_v53  ;;  %v2097_v59 = vadd.f32 %v4973_v52, %v2096_v58  ;;  %v2998_v32 = vpop.permute.xlu1 %2997 }
 0x336   : > { %v3000_v24 = vunpack.i.h.bf16 %v2998_v32  ;;  %v2999_v34 = vunpack.i.l.bf16 %v2998_v32 }
 0x337   : > { %v1953_v40 = vsel %vm1939_vm4, %v1936_v39, %v2980_v1  ;;  %v2001_v47 = vsel %vm1939_vm4, %v1985_v56, %v2979_v18  ;;  %v2271_v55 = vmax.f32 %v2224_v15, 0.0 }
 0x338   : > { %2131 = vmatmul.f32.gmra.mxu1 %v1953_v40  ;;  %2196 = vmatmul.f32.gmra.mxu2 %v2001_v47  ;;  %v1921_v26 = vsel %vm1103_vm10, %v4769_v29, %v3000_v24  ;;  %v1971_v23 = vsel %vm1103_vm10, %v4854_v14, %v2999_v34 }
 0x339   : > { %2287 = vst.msk [vmem:[%s4992_s12] sm:$0xff] %vm1103_vm10, %v2271_v55  ;;  %v1938_v54 = vsel %vm1922_vm3, %v1921_v26, %v3005_v38  ;;  %v1987_v36 = vsel %vm1922_vm3, %v1971_v23, %v3004_v60  ;;  %vm5324_vm3 = vmmov %vm5319_vm5 }
 0x33a   : > { %vm5326_vm5 = vmmov %vm5324_vm3 }
 0x33b   : > { %v2161_v22 = vpop.f32.mrf.mxu2  ;;  %vm5328_vm7 = vmmov %vm5324_vm3 }
 0x33c   : > { %v2162_v61 = vadd.f32 %v2161_v22, %v2097_v59  ;;  %v2235_v59 = vpop.f32.mrf.mxu3 }
 0x33d   : > { %v1745_v0 = vpop.permute.xlu1 %1744 }
 0x33e   : > { %v2227_v4 = vadd.f32 %v2226_v3, %v2162_v61  ;;  %v2099_v2 = vpop.f32.mrf.mxu1  ;;  %v1955_v29 = vsel %vm1939_vm4, %v1938_v54, %v1745_v0 }
 0x33f   : > { %v2100_v30 = vadd.f32 %v4973_v52, %v2099_v2 }
 0x340   : > { %v2272_v37 = vmax.f32 %v2227_v4, 0.0 }
 0x342   : > { %2288 = vst.msk [vmem:[%s4992_s12 + $0x8] sm:$0xff] %vm1103_vm10, %v2272_v37 }
 0x344   : > { %v2993_v11 = vpop.permute.xlu0 %2992  ;;  %v2164_v63 = vpop.f32.mrf.mxu2 }
 0x345   : > { %v2995_v8 = vunpack.i.h.bf16 %v2993_v11  ;;  %v2994_v21 = vunpack.i.l.bf16 %v2993_v11  ;;  %v2165_v10 = vadd.f32 %v2164_v63, %v2100_v30 }
 0x346   : > { %v2102_v33 = vpop.f32.mrf.mxu1 }
 0x347   : > { %v1954_v6 = vsel %vm1939_vm4, %v1937_v50, %v2995_v8  ;;  %v2002_v48 = vsel %vm1939_vm4, %v1986_v46, %v2994_v21  ;;  %v2230_v19 = vadd.f32 %v2229_v5, %v2165_v10  ;;  %v2103_v17 = vadd.f32 %v4973_v52, %v2102_v33  ;;  %v2238_v8 = vpop.f32.mrf.mxu3 }
 0x348   : > { %2134 = vmatmul.f32.gmra.mxu1 %v1954_v6  ;;  %2199 = vmatmul.f32.gmra.mxu2 %v2002_v48 }
 0x349   : > { %v2273_v51 = vmax.f32 %v2230_v19, 0.0 }
 0x34b   : > { %2289 = vst.msk [vmem:[%s4992_s12 + $0x10] sm:$0xff] %vm1103_vm10, %v2273_v51  ;;  %v2303_v13 = vmax.f32 %v2271_v55, %v2273_v51 }
 0x34c   : > { %v1889_v57 = vpop.permute.xlu0 %1888  ;;  %v2167_v41 = vpop.f32.mrf.mxu2 }
 0x34d   : > { %v2003_v14 = vsel %vm1939_vm4, %v1987_v36, %v1889_v57  ;;  %v2315_v35 = vrot.slane %v2303_v13, 1  ;;  %v2168_v62 = vadd.f32 %v2167_v41, %v2103_v17  ;;  %vm5325_vm4 = vmmov %vm5323_vm2 }
 0x34f   : > { %v2323_v28 = vmax.f32 %v2303_v13, %v2315_v35  ;;  %v2233_v49 = vadd.f32 %v2232_v25, %v2168_v62  ;;  %v2241_v5 = vpop.f32.mrf.mxu3 }
 0x350   : > { %2137 = vmatmul.f32.gmra.mxu1 %v1955_v29  ;;  %2202 = vmatmul.f32.gmra.mxu2 %v2003_v14 }
 0x351   : > { %v2347_v7 = vrot.slane %v2323_v28, 1  ;;  %v2274_v53 = vmax.f32 %v2233_v49, 0.0  ;;  %v2355_v44 = vrot.slane %v2323_v28, 2  ;;  %v2363_v47 = vrot.slane %v2323_v28, 3 }
 0x353   : > { %2290 = vst.msk [vmem:[%s4992_s12 + $0x18] sm:$0xff] %vm1103_vm10, %v2274_v53  ;;  %v2304_v1 = vmax.f32 %v2272_v37, %v2274_v53  ;;  %v2407_v18 = vsel %vm1403_vm1, %v2323_v28, %v2347_v7 }
 0x354   : > { %v2412_v56 = vsel %vm2411_vm13, %v2407_v18, %v2355_v44 }
 0x355   : > { %v2105_v15 = vpop.f32.mrf.mxu1  ;;  %v2331_v39 = vrot.slane %v2304_v1, 1  ;;  %v2417_v22 = vsel %vm2416_vm14, %v2412_v56, %v2363_v47 }
 0x356   : > { %v2106_v58 = vadd.f32 %v4973_v52, %v2105_v15 }
 0x357   : > { %v2339_v40 = vmax.f32 %v2304_v1, %v2331_v39  ;;  %v2244_v23 = vpop.f32.mrf.mxu3 }
 0x359   : > { %v2375_v45 = vrot.slane %v2339_v40, 4  ;;  %v2383_v55 = vrot.slane %v2339_v40, 5  ;;  %v2391_v61 = vrot.slane %v2339_v40, 6  ;;  %v2399_v12 = vrot.slane %v2339_v40, 7 }
 0x35b   : > { %v2170_v3 = vpop.f32.mrf.mxu2  ;;  %v2421_v27 = vsel %vm5323_vm2, %v2417_v22, %v2375_v45 }
 0x35c   : > { %v2171_v20 = vadd.f32 %v2170_v3, %v2106_v58  ;;  %v2426_v4 = vsel %vm2425_vm15, %v2421_v27, %v2383_v55 }
 0x35d   : > { %v2430_v37 = vsel %vm5324_vm3, %v2426_v4, %v2391_v61  ;;  %v2108_v31 = vpop.f32.mrf.mxu1 }
 0x35e   : > { %v2236_v2 = vadd.f32 %v2235_v59, %v2171_v20  ;;  %v2434_v32 = vsel %vm348_vm0, %v2430_v37, %v2399_v12  ;;  %v2109_v43 = vadd.f32 %v4973_v52, %v2108_v31 }
 0x35f   : > { %2438 = vst.msk [vmem:[%s5030_s9] sm:$0xff] %vm1103_vm10, %v2434_v32  ;;  %v2247_v29 = vpop.f32.mrf.mxu3 }
 0x360   : > { %v2275_v42 = vmax.f32 %v2236_v2, 0.0 }
 0x362   : > { %2291 = vst.msk [vmem:[%s4992_s12 + $0x20] sm:$0xff] %vm1103_vm10, %v2275_v42 }
 0x363   : > { %v2173_v16 = vpop.f32.mrf.mxu2 }
 0x364   : > { %v2174_v11 = vadd.f32 %v2173_v16, %v2109_v43 }
 0x366   : > { %v2239_v21 = vadd.f32 %v2238_v8, %v2174_v11 }
 0x367   : > { %v2250_v22 = vpop.f32.mrf.mxu3 }
 0x368   : > { %v2276_v30 = vmax.f32 %v2239_v21, 0.0 }
 0x36a   : > { %2292 = vst.msk [vmem:[%s4992_s12 + $0x28] sm:$0xff] %vm1103_vm10, %v2276_v30 }
 0x36c   : > { %v2111_v50 = vpop.f32.mrf.mxu1 }
 0x36d   : > { %v2112_v46 = vadd.f32 %v4973_v52, %v2111_v50 }
 0x36f   : > { %v2253_v12 = vpop.f32.mrf.mxu3 }
 0x372   : > { %v2176_v24 = vpop.f32.mrf.mxu2 }
 0x373   : > { %v2177_v34 = vadd.f32 %v2176_v24, %v2112_v46 }
 0x374   : > { %v2114_v6 = vpop.f32.mrf.mxu1 }
 0x375   : > { %v2242_v63 = vadd.f32 %v2241_v5, %v2177_v34  ;;  %v2115_v9 = vadd.f32 %v4973_v52, %v2114_v6 }
 0x377   : > { %v2277_v48 = vmax.f32 %v2242_v63, 0.0  ;;  %v2256_v21 = vpop.f32.mrf.mxu3 }
 0x379   : > { %2293 = vst.msk [vmem:[%s4992_s12 + $0x30] sm:$0xff] %vm1103_vm10, %v2277_v48  ;;  %v2305_v10 = vmax.f32 %v2275_v42, %v2277_v48 }
 0x37a   : > { %v2179_v19 = vpop.f32.mrf.mxu2 }
 0x37b   : > { %v2316_v33 = vrot.slane %v2305_v10, 1  ;;  %v2180_v26 = vadd.f32 %v2179_v19, %v2115_v9 }
 0x37d   : > { %v2324_v38 = vmax.f32 %v2305_v10, %v2316_v33  ;;  %v2245_v60 = vadd.f32 %v2244_v23, %v2180_v26 }
 0x37e   : > { %v2117_v0 = vpop.f32.mrf.mxu1 }
 0x37f   : > { %v2348_v51 = vrot.slane %v2324_v38, 1  ;;  %v2278_v57 = vmax.f32 %v2245_v60, 0.0  ;;  %v2356_v13 = vrot.slane %v2324_v38, 2  ;;  %v2118_v41 = vadd.f32 %v4973_v52, %v2117_v0 }
 0x380   : > { %v2364_v28 = vrot.slane %v2324_v38, 3 }
 0x381   : > { %2294 = vst.msk [vmem:[%s4992_s12 + $0x38] sm:$0xff] %vm1103_vm10, %v2278_v57  ;;  %v2306_v17 = vmax.f32 %v2276_v30, %v2278_v57  ;;  %v2408_v54 = vsel %vm1403_vm1, %v2324_v38, %v2348_v51  ;;  %v2259_v38 = vpop.f32.mrf.mxu3 }
 0x382   : > { %v2413_v35 = vsel %vm2411_vm13, %v2408_v54, %v2356_v13 }
 0x383   : > { %v2332_v36 = vrot.slane %v2306_v17, 1  ;;  %v2418_v53 = vsel %vm2416_vm14, %v2413_v35, %v2364_v28 }
 0x384   : > { %v2182_v14 = vpop.f32.mrf.mxu2 }
 0x385   : > { %v2340_v62 = vmax.f32 %v2306_v17, %v2332_v36  ;;  %v2183_v25 = vadd.f32 %v2182_v14, %v2118_v41 }
 0x386   : > { %v2120_v1 = vpop.f32.mrf.mxu1 }
 0x387   : > { %v2376_v49 = vrot.slane %v2340_v62, 4  ;;  %v2384_v7 = vrot.slane %v2340_v62, 5  ;;  %v2248_v44 = vadd.f32 %v2247_v29, %v2183_v25  ;;  %v2392_v18 = vrot.slane %v2340_v62, 6 }
 0x388   : > { %v2400_v39 = vrot.slane %v2340_v62, 7  ;;  %v2121_v45 = vadd.f32 %v4973_v52, %v2120_v1 }
 0x389   : > { %v2422_v15 = vsel %vm5325_vm4, %v2418_v53, %v2376_v49  ;;  %v2279_v40 = vmax.f32 %v2248_v44, 0.0  ;;  %v2262_v49 = vpop.f32.mrf.mxu3 }
 0x38a   : > { %v2427_v56 = vsel %vm2425_vm15, %v2422_v15, %v2384_v7 }
 0x38b   : > { %v2431_v47 = vsel %vm5326_vm5, %v2427_v56, %v2392_v18  ;;  %2295 = vst.msk [vmem:[%s4992_s12 + $0x40] sm:$0xff] %vm1103_vm10, %v2279_v40 }
 0x38c   : > { %v2435_v55 = vsel %vm348_vm0, %v2431_v47, %v2400_v39  ;;  %v2185_v58 = vpop.f32.mrf.mxu2 }
 0x38d   : > { %v2186_v59 = vadd.f32 %v2185_v58, %v2121_v45  ;;  %2439 = vst.msk [vmem:[%s5030_s9 + $0x8] sm:$0xff] %vm1103_vm10, %v2435_v55 }
 0x38f   : > { %v2251_v3 = vadd.f32 %v2250_v22, %v2186_v59 }
 0x391   : > { %v2280_v61 = vmax.f32 %v2251_v3, 0.0  ;;  %v2265_v18 = vpop.f32.mrf.mxu3 }
 0x393   : > { %2296 = vst.msk [vmem:[%s4992_s12 + $0x48] sm:$0xff] %vm1103_vm10, %v2280_v61 }
 0x396   : > { %v2123_v27 = vpop.f32.mrf.mxu1 }
 0x397   : > { %v2124_v20 = vadd.f32 %v4973_v52, %v2123_v27 }
 0x399   : > { %v2268_v3 = vpop.f32.mrf.mxu3 }
 0x39c   : > { %v2188_v4 = vpop.f32.mrf.mxu2 }
 0x39d   : > { %v2189_v37 = vadd.f32 %v2188_v4, %v2124_v20 }
 0x39e   : > { %v2126_v32 = vpop.f32.mrf.mxu1 }
 0x39f   : > { %v2254_v2 = vadd.f32 %v2253_v12, %v2189_v37  ;;  %v2127_v43 = vadd.f32 %v4973_v52, %v2126_v32 }
 0x3a1   : > { %v2281_v31 = vmax.f32 %v2254_v2, 0.0 }
 0x3a3   : > { %2297 = vst.msk [vmem:[%s4992_s12 + $0x50] sm:$0xff] %vm1103_vm10, %v2281_v31  ;;  %v2307_v42 = vmax.f32 %v2279_v40, %v2281_v31 }
 0x3a4   : > { %v2191_v16 = vpop.f32.mrf.mxu2 }
 0x3a5   : > { %v2317_v11 = vrot.slane %v2307_v42, 1  ;;  %v2192_v8 = vadd.f32 %v2191_v16, %v2127_v43 }
 0x3a7   : > { %v2325_v30 = vmax.f32 %v2307_v42, %v2317_v11  ;;  %v2257_v50 = vadd.f32 %v2256_v21, %v2192_v8 }
 0x3a9   : > { %v2349_v46 = vrot.slane %v2325_v30, 1  ;;  %v2282_v5 = vmax.f32 %v2257_v50, 0.0  ;;  %v2357_v24 = vrot.slane %v2325_v30, 2  ;;  %v2365_v19 = vrot.slane %v2325_v30, 3 }
 0x3ab   : > { %2298 = vst.msk [vmem:[%s4992_s12 + $0x58] sm:$0xff] %vm1103_vm10, %v2282_v5  ;;  %v2308_v34 = vmax.f32 %v2280_v61, %v2282_v5  ;;  %v2409_v63 = vsel %vm1403_vm1, %v2325_v30, %v2349_v46 }
 0x3ac   : > { %v2414_v10 = vsel %vm2411_vm13, %v2409_v63, %v2357_v24 }
 0x3ad   : > { %v2129_v6 = vpop.f32.mrf.mxu1  ;;  %v2333_v48 = vrot.slane %v2308_v34, 1  ;;  %v2419_v60 = vsel %vm2416_vm14, %v2414_v10, %v2365_v19 }
 0x3ae   : > { %v2130_v23 = vadd.f32 %v4973_v52, %v2129_v6 }
 0x3af   : > { %v2341_v9 = vmax.f32 %v2308_v34, %v2333_v48 }
 0x3b1   : > { %v2377_v33 = vrot.slane %v2341_v9, 4  ;;  %v2385_v26 = vrot.slane %v2341_v9, 5  ;;  %v2393_v51 = vrot.slane %v2341_v9, 6  ;;  %v2401_v17 = vrot.slane %v2341_v9, 7 }
 0x3b3   : > { %v2194_v0 = vpop.f32.mrf.mxu2  ;;  %v2423_v57 = vsel %vm5327_vm6, %v2419_v60, %v2377_v33 }
 0x3b4   : > { %v2195_v13 = vadd.f32 %v2194_v0, %v2130_v23  ;;  %v2428_v54 = vsel %vm2425_vm15, %v2423_v57, %v2385_v26 }
 0x3b5   : > { %v2432_v36 = vsel %vm5328_vm7, %v2428_v54, %v2393_v51  ;;  %v2132_v14 = vpop.f32.mrf.mxu1 }
 0x3b6   : > { %v2260_v41 = vadd.f32 %v2259_v38, %v2195_v13  ;;  %v2436_v29 = vsel %vm348_vm0, %v2432_v36, %v2401_v17  ;;  %v2133_v62 = vadd.f32 %v4973_v52, %v2132_v14 }
 0x3b7   : > { %2440 = vst.msk [vmem:[%s5030_s9 + $0x10] sm:$0xff] %vm1103_vm10, %v2436_v29 }
 0x3b8   : > { %v2283_v35 = vmax.f32 %v2260_v41, 0.0 }
 0x3ba   : > { %2299 = vst.msk [vmem:[%s4992_s12 + $0x60] sm:$0xff] %vm1103_vm10, %v2283_v35 }
 0x3bb   : > { %v2197_v25 = vpop.f32.mrf.mxu2 }
 0x3bc   : > { %v2198_v28 = vadd.f32 %v2197_v25, %v2133_v62 }
 0x3be   : > { %v2263_v7 = vadd.f32 %v2262_v49, %v2198_v28 }
 0x3c0   : > { %v2284_v53 = vmax.f32 %v2263_v7, 0.0 }
 0x3c2   : > { %2300 = vst.msk [vmem:[%s4992_s12 + $0x68] sm:$0xff] %vm1103_vm10, %v2284_v53 }
 0x3c5   : > { %v2135_v44 = vpop.f32.mrf.mxu1 }
 0x3c6   : > { %v2136_v1 = vadd.f32 %v4973_v52, %v2135_v44 }
 0x3cb   : > { %v2200_v15 = vpop.f32.mrf.mxu2 }
 0x3cc   : > { %v2201_v39 = vadd.f32 %v2200_v15, %v2136_v1 }
 0x3cd   : > { %v2138_v40 = vpop.f32.mrf.mxu1 }
 0x3ce   : > { %v2266_v56 = vadd.f32 %v2265_v18, %v2201_v39  ;;  %v2139_v55 = vadd.f32 %v4973_v52, %v2138_v40 }
 0x3d0   : > { %v2285_v47 = vmax.f32 %v2266_v56, 0.0 }
 0x3d2   : > { %2301 = vst.msk [vmem:[%s4992_s12 + $0x70] sm:$0xff] %vm1103_vm10, %v2285_v47  ;;  %v2309_v45 = vmax.f32 %v2283_v35, %v2285_v47 }
 0x3d3   : > { %v2203_v58 = vpop.f32.mrf.mxu2 }
 0x3d4   : > { %v2318_v59 = vrot.slane %v2309_v45, 1  ;;  %v2204_v22 = vadd.f32 %v2203_v58, %v2139_v55 }
 0x3d6   : > { %v2326_v61 = vmax.f32 %v2309_v45, %v2318_v59  ;;  %v2269_v27 = vadd.f32 %v2268_v3, %v2204_v22 }
 0x3d8   : > { %v2350_v52 = vrot.slane %v2326_v61, 1  ;;  %v2286_v20 = vmax.f32 %v2269_v27, 0.0  ;;  %v2358_v12 = vrot.slane %v2326_v61, 2 }
 0x3da   : > { %2302 = vst.msk [vmem:[%s4992_s12 + $0x78] sm:$0xff] %vm1103_vm10, %v2286_v20  ;;  %v2310_v4 = vmax.f32 %v2284_v53, %v2286_v20  ;;  %v2410_v37 = vsel %vm1403_vm1, %v2326_v61, %v2350_v52 }
 0x3db   : > { %3047 = shalt.err (!%p3044_p6)
}
 0x3dc   : > { %s3159_s12 = smov 128   ;;  %s5329_s30 = smov 8   ;;  %v2334_v2 = vrot.slane %v2310_v4, 1  ;;  %v2415_v32 = vsel %vm2411_vm13, %v2410_v37, %v2358_v12  ;;  %v2366_v42 = vrot.slane %v2326_v61, 3  ;;  %vm5330_vm1 = vmmov %vm5323_vm2 }
 0x3dd   : > { %2683 = dma.vmem_to_hbm [thread:$0]  (%p3246_p3), %s2464_s14, 2048, %s2466_s17, %s2443_s24, %s3159_s12, %s3159_s12, %s5329_s30   ;;  %vm5331_vm8 = vmmov %vm5324_vm3 }
 0x3de   : > { %v2342_v31 = vmax.f32 %v2310_v4, %v2334_v2  ;;  %s2481_s1 = scalar_lea.hbm %s5170_s6, %s2673_s20  ;;  %v2420_v11 = vsel %vm2416_vm14, %v2415_v32, %v2366_v42  ;;  %s2482_s18 = sshll.u32 %s5030_s9, 4  ;;  %s2483_s18 = int_to_ptr.vmem [resolvable:$true] %s2482_s18 }
 0x3df   : > { %s2484_s25 = sshll.u32 %s2481_s1, 4  ;;  %s2448_s14 = scalar_lea.sflag [#allocation5], %s4980_s13  ;;  %s2485_s25 = int_to_ptr.hbm [resolvable:$true] %s2484_s25 }
 0x3e0   : > { %v2378_v43 = vrot.slane %v2342_v31, 4  ;;  %v2386_v16 = vrot.slane %v2342_v31, 5  ;;  %v2394_v8 = vrot.slane %v2342_v31, 6  ;;  %v2402_v30 = vrot.slane %v2342_v31, 7  ;;  %s3062_s17 = sshra.s32 %s2485_s25, 4  ;;  %s3068_s16 = scalar_lea.hbm %s5170_s6, 128  ;;  %s3063_s17 = int_to_ptr.hbm [resolvable:$true] %s3062_s17 }
 0x3e1   : > { %s3064_s20 = scalar_lea.hbm %s3063_s17, 32  ;;  %p3069_p11 = scmp.lt.s32.totalorder %s3063_s17, %s5170_s6 }
 0x3e2   : > { %v2424_v21 = vsel %vm5330_vm1, %v2420_v11, %v2378_v43  ;;  %p3065_p7 = scmp.ne.s32.totalorder %s3063_s17, %s3064_s20  ;;  %p3070_p12 = scmp.lt.s32.totalorder %s3068_s16, %s3064_s20 }
 0x3e3   : > { %v2429_v50 = vsel %vm2425_vm15, %v2424_v21, %v2386_v16 }
 0x3e4   : > { %v2433_v46 = vsel %vm5331_vm8, %v2429_v50, %v2394_v8  ;;  %p3066_p9 = pnand %p3065_p7, %p3246_p3  ;;  %p3071_p13 = por %p3070_p12, %p3069_p11 }
 0x3e5   : > { %v2437_v5 = vsel %vm348_vm0, %v2433_v46, %v2402_v30 }
 0x3e6   : > { %2441 = vst.msk [vmem:[%s5030_s9 + $0x18] sm:$0xff] %vm1103_vm10, %v2437_v5  ;;  %p3067_p10 = pneg %p3066_p9 }
 0x3e8   : > { %p3072_p0 = pnand %p3071_p13, %p3067_p10 }
 0x3ea   : > { %3075 = shalt.err (!%p3072_p0)
}
 0x3eb   : > { %2684 = dma.vmem_to_hbm [thread:$0]  (%p3246_p3), %s2483_s18, 512, %s2485_s25, %s2448_s14, %s3159_s12, %s3159_s12, %s5329_s30  }
 0x3ec PF: > { %p2694_p1 = scmp.ge.s32.totalorder %s3146_s28, 2  ;;  %s2499_s13 = sand.u32 1, %s3118_s21  }
 0x3ed   : > { %s2500_s9 = scalar_lea.sflag [#allocation3], %s2499_s13 }
 0x3ee   : > { %p2688_p2 = pnand %p2694_p1, %p3255_p8 }
 0x3f0   : > { %p2689_p4 = pneg %p2688_p2 }
 0x3f2   : > { %3109 = dma.done.wait (%p2689_p4), %s2500_s9, 2048  }
 0x3f3   : > { %3111 = vsyncadd (%p2689_p4), %s2500_s9, 4294965248  ;;  %s2510_s1 = scalar_lea.sflag [#allocation5], %s2499_s13 }
 0x3f4   : > { %3113 = dma.done.wait (%p2689_p4), %s2510_s1, 512  }
 0x3f5   : > { %3115 = vsyncadd (%p2689_p4), %s2510_s1, 4294966784  ;;  %s23_s28 = sadd.s32 1, %s3146_s28   ;;  %s5332_s21 = smov %s3122_s22 }
 0x3f6   : > { %p20_p5 = scmp.ge.s32.totalorder %s23_s28, 6   ;;  %s5333_s22 = smov %s3126_s23 }
 0x3f7   : > { %s5334_s23 = smov %s3264_s15  ;;  %s5335_s24 = smov %s3138_s26 }
 0x3f8   : > { %s5336_s25 = smov %s3142_s27  ;;  %s5337_s26 = smov %s5340_s7 }
 0x3f9   : > { %s5338_s27 = smov %s5344_s8  ;;  %22 = sbr.rel (!%p20_p5) target bundleno = 10 (0xa), region = 93 }
 0x3fe   :  { %2516 = vsyncpa [#allocation3], 1 }
 0x3ff   :  { %2518 = vsyncpa [#allocation3 + $0x1], 1 }
 0x400   :  { %2519 = vsyncpa [#allocation5], 1 }
 0x401   :  { %2521 = vsyncpa [#allocation5 + $0x1], 1 }

</bundles_post_ra>
